<compile_context>
chip_gen: v5e
topology: v5e:2x2
jax: 0.10.0
libtpu: 0.0.40
codegen_flags: <defaults>
</compile_context>

<pallas_src>
import functools
import inspect

import jax
import jax.numpy as jnp
from jax.experimental import pallas as pl
from jax.experimental.pallas import tpu as pltpu


# ------------------------------ fused kernel --------------------------------

def _encoder_kernel(x_ref, win_ref, bin_ref,
                    w1_ref, b1_ref, g1_ref, be1_ref,
                    w2_ref, b2_ref, g2_ref, be2_ref,
                    a_ref, wout_ref, bout_ref, o_ref,
                    *, kernel_size, dilations, seq_len, eps):
    k = kernel_size
    S = seq_len
    x = x_ref[...]                                   # (R, F), R = Bblk * S
    R = x.shape[0]
    D = win_ref.shape[1]
    inv_d = 1.0 / D

    # Intra-sequence position of every stacked row (one tiny iota, hoisted).
    pos = jax.lax.broadcasted_iota(jnp.int32, (R, 1), 0) % S

    def shifted(inp, sh):
        # inp[r - sh] within each length-S segment; zero where pos < sh
        # (covers the causal left-pad AND cross-segment wrap of the roll).
        if sh == 0:
            return inp
        if sh >= S:
            return jnp.zeros_like(inp)
        rolled = pltpu.roll(inp, sh, axis=0)         # XLU sublane rotate
        return jnp.where(pos >= sh, rolled, 0.0)

    def causal_conv(inp, w_cat, b, dil):
        # out[t] = b + sum_j inp[t - (k-1-j)*dil] @ W[j]
        # All k taps fused into one matmul with K = k*D (lane concat).
        pieces = [shifted(inp, (k - 1 - j) * dil) for j in range(k)]
        xc = jnp.concatenate(pieces, axis=-1).astype(jnp.bfloat16)
        out = jnp.dot(xc, w_cat, preferred_element_type=jnp.float32)
        return out + b                               # bias added once, f32

    def ln_relu(h, g, be):
        m1 = jnp.sum(h, axis=-1, keepdims=True) * inv_d
        m2 = jnp.sum(h * h, axis=-1, keepdims=True) * inv_d
        var = jnp.maximum(m2 - m1 * m1, 0.0)         # clamp: no negative rsqrt
        hn = (h - m1) * jax.lax.rsqrt(var + eps)
        return jnp.maximum(hn * g + be, 0.0)

    # ---- input projection (bf16 operands, f32 accumulate) -------------------
    h = (jnp.dot(x.astype(jnp.bfloat16), win_ref[...],
                 preferred_element_type=jnp.float32) + bin_ref[...])

    # ---- TCN residual blocks (statically unrolled; dropout == identity) -----
    for i, dil in enumerate(dilations):
        out = ln_relu(causal_conv(h, w1_ref[i], b1_ref[i], dil),
                      g1_ref[i], be1_ref[i])
        out2 = ln_relu(causal_conv(out, w2_ref[i], b2_ref[i], 2 * dil),
                       g2_ref[i], be2_ref[i])
        h = a_ref[i] * out2 + h                      # learnable residual scale

    # ---- TCN output projection ----------------------------------------------
    o_ref[...] = (jnp.dot(h.astype(jnp.bfloat16), wout_ref[...],
                          preferred_element_type=jnp.float32)
                  + bout_ref[...]).astype(o_ref.dtype)


# ------------------------------ wrapper --------------------------------------

def encoder_forward(x, params, *, kernel_size, dilations):
    B, S, F = x.shape
    D = params["win"].shape[1]
    nblk = params["w1"].shape[0]
    k = kernel_size

    # Two parallel grid steps when possible (feeds both v7x TensorCores);
    # otherwise one big step (fewer, larger steps is best on v5e/v6e).
    G = 2 if (B % 2 == 0 and B >= 2) else 1
    Bblk = B // G
    R = Bblk * S

    x2 = x.reshape(B * S, F).astype(jnp.float32)

    # bf16 matmul operands; conv taps pre-reshaped to (k*D, D) so each conv is
    # a single K = k*D matmul inside the kernel.
    win = params["win"].astype(jnp.bfloat16)
    wout = params["wout"].astype(jnp.bfloat16)
    w1 = params["w1"].reshape(nblk, k * D, D).astype(jnp.bfloat16)
    w2 = params["w2"].reshape(nblk, k * D, D).astype(jnp.bfloat16)

    args = (x2, win, params["bin"],
            w1, params["b1"], params["g1"], params["be1"],
            w2, params["b2"], params["g2"], params["be2"],
            params["a"], wout, params["bout"])

    kern = functools.partial(_encoder_kernel, kernel_size=k,
                             dilations=tuple(dilations), seq_len=S, eps=1e-8)

    def _nbytes(a):
        return int(a.size) * a.dtype.itemsize

    weight_bytes = sum(_nbytes(a) for a in args[1:])
    act_bytes = 16 * R * max(F, (k + 1) * D) * 4     # generous temp headroom
    vmem_limit = int(min(112 << 20,
                         (8 << 20) + 2 * weight_bytes
                         + 4 * R * (F + D) * 4 + act_bytes))

    try:
        can_single_buffer = (
            hasattr(pl, "Buffered")
            and "pipeline_mode" in inspect.signature(pl.BlockSpec).parameters)
    except (TypeError, ValueError):
        can_single_buffer = False

    def build(single_buffer_weights):
        def const_spec(shape):
            kw = {}
            if single_buffer_weights:
                # Grid-invariant weights: no need for double buffering.
                kw["pipeline_mode"] = pl.Buffered(1)
            return pl.BlockSpec(shape, lambda i: (0,) * len(shape), **kw)

        return pl.pallas_call(
            kern,
            grid=(G,),
            in_specs=[
                pl.BlockSpec((R, F), lambda i: (i, 0)),                 # x rows
                const_spec((F, D)), const_spec((1, D)),                 # in proj
                const_spec((nblk, k * D, D)), const_spec((nblk, 1, D)),  # conv1
                const_spec((nblk, 1, D)), const_spec((nblk, 1, D)),      # ln1
                const_spec((nblk, k * D, D)), const_spec((nblk, 1, D)),  # conv2
                const_spec((nblk, 1, D)), const_spec((nblk, 1, D)),      # ln2
                pl.BlockSpec(memory_space=pltpu.MemorySpace.SMEM),       # a
                const_spec((D, D)), const_spec((1, D)),                 # out proj
            ],
            out_specs=pl.BlockSpec((R, D), lambda i: (i, 0)),
            out_shape=jax.ShapeDtypeStruct((B * S, D), jnp.float32),
            compiler_params=pltpu.CompilerParams(
                dimension_semantics=("parallel",),
                vmem_limit_bytes=vmem_limit),
        )

    if can_single_buffer:
        try:
            out = build(True)(*args)
        except Exception:            # older Pallas: fall back to default buffering
            out = build(False)(*args)
    else:
        out = build(False)(*args)

    return out.reshape(B, S, D)


# --------------------------- parameters & reference -------------------------

def init_params(key, feat_num, hidden_dim, dilations, kernel_size):
    D = hidden_dim
    nblk = len(dilations)
    keys = iter(jax.random.split(key, 2 + 4 * nblk))

    def nrm(kk, shape, scale=0.1):
        return scale * jax.random.normal(kk, shape, dtype=jnp.float32)

    w1, b1, w2, b2 = [], [], [], []
    for _ in range(nblk):
        w1.append(nrm(next(keys), (kernel_size, D, D)))
        b1.append(nrm(next(keys), (1, D)))
        w2.append(nrm(next(keys), (kernel_size, D, D)))
        b2.append(nrm(next(keys), (1, D)))

    return {
        # Linear layers: random weights, bias = 0.1 (mirrors _init_weights)
        "win": nrm(next(keys), (feat_num, D)),
        "bin": jnp.full((1, D), 0.1, jnp.float32),
        "wout": nrm(next(keys), (D, D)),
        "bout": jnp.full((1, D), 0.1, jnp.float32),
        "w1": jnp.stack(w1), "b1": jnp.stack(b1),
        "g1": jnp.ones((nblk, 1, D), jnp.float32),
        "be1": jnp.zeros((nblk, 1, D), jnp.float32),
        "w2": jnp.stack(w2), "b2": jnp.stack(b2),
        "g2": jnp.ones((nblk, 1, D), jnp.float32),
        "be2": jnp.zeros((nblk, 1, D), jnp.float32),
        # PyTorch inits a = 1e-8; use a non-trivial value here so the residual
        # (conv/LN) path actually contributes and the reference check is real.
        "a": jnp.full((nblk,), 0.5, jnp.float32),
    }


def encoder_reference(x, params, *, kernel_size, dilations):
    """Pure-JAX reference mirroring the PyTorch padding/conv/LN semantics."""
    P = jax.lax.Precision.HIGHEST
    S = x.shape[1]

    def conv(h, w, b, dil):
        pad = (kernel_size - 1) * dil
        hp = jnp.pad(h, ((0, 0), (pad, 0), (0, 0)))
        acc = jnp.zeros(h.shape[:2] + (w.shape[-1],), jnp.float32) + b
        for j in range(kernel_size):
            acc = acc + jnp.einsum("bsd,de->bse",
                                   hp[:, j * dil:j * dil + S, :], w[j],
                                   precision=P)
        return acc

    def ln_relu(h, g, be):
        mu = jnp.mean(h, axis=-1, keepdims=True)
        var = jnp.mean((h - mu) ** 2, axis=-1, keepdims=True)
        hn = (h - mu) * jax.lax.rsqrt(var + 1e-8)
        return jnp.maximum(hn * g + be, 0.0)

    h = jnp.einsum("bsf,fd->bsd", x, params["win"], precision=P) + params["bin"]
    for i, dil in enumerate(dilations):
        out = ln_relu(conv(h, params["w1"][i], params["b1"][i], dil),
                      params["g1"][i], params["be1"][i])
        out2 = ln_relu(conv(out, params["w2"][i], params["b2"][i], 2 * dil),
                       params["g2"][i], params["be2"][i])
        h = params["a"][i] * out2 + h
    return jnp.einsum("bsd,de->bse", h, params["wout"], precision=P) + params["bout"]


# ----------------------------------- main ------------------------------------

if __name__ == "__main__":
    B, S, FEAT, D = 4, 32, 8, 32
    BLOCK_NUM = 1
    DILATIONS = [1, 4]            # Encoder default dilations
    KERNEL_SIZE = 3               # TCN kwargs-path default
    block_dilations = DILATIONS * BLOCK_NUM

    key = jax.random.PRNGKey(0)
    kx, kp = jax.random.split(key)
    x = jax.random.normal(kx, (B, S, FEAT), dtype=jnp.float32)
    params = init_params(kp, FEAT, D, block_dilations, KERNEL_SIZE)

    out = encoder_forward(x, params, kernel_size=KERNEL_SIZE,
                          dilations=block_dilations)
    out = jax.block_until_ready(out)
    assert out.shape == (B, S, D)
    assert bool(jnp.all(jnp.isfinite(out)))

    ref = encoder_reference(x, params, kernel_size=KERNEL_SIZE,
                            dilations=block_dilations)
    max_err = float(jnp.max(jnp.abs(out - ref)))
    mean_err = float(jnp.mean(jnp.abs(out - ref)))
    # bf16 MXU operands (f32 accumulate / LN / residual) vs the f32
    # HIGHEST-precision reference.
    assert max_err < 1e-1 and mean_err < 2e-2, (
        f"mismatch vs reference: max {max_err}, mean {mean_err}")

    print("KERNEL_OK")
</pallas_src>

<mosaic_0001>
module attributes {stable_mosaic.version = 11 : i64} {
  func.func @_encoder_kernel(%arg0: i32, %arg1: memref<64x8xf32, #tpu.memory_space<vmem>>, %arg2: memref<8x32xbf16, #tpu.memory_space<vmem>>, %arg3: memref<1x32xf32, #tpu.memory_space<vmem>>, %arg4: memref<2x96x32xbf16, #tpu.memory_space<vmem>>, %arg5: memref<2x1x32xf32, #tpu.memory_space<vmem>>, %arg6: memref<2x1x32xf32, #tpu.memory_space<vmem>>, %arg7: memref<2x1x32xf32, #tpu.memory_space<vmem>>, %arg8: memref<2x96x32xbf16, #tpu.memory_space<vmem>>, %arg9: memref<2x1x32xf32, #tpu.memory_space<vmem>>, %arg10: memref<2x1x32xf32, #tpu.memory_space<vmem>>, %arg11: memref<2x1x32xf32, #tpu.memory_space<vmem>>, %arg12: memref<2xf32, #tpu.memory_space<smem>>, %arg13: memref<32x32xbf16, #tpu.memory_space<vmem>>, %arg14: memref<1x32xf32, #tpu.memory_space<vmem>>, %arg15: memref<64x32xf32, #tpu.memory_space<vmem>>) attributes {dimension_semantics = [#tpu.dimension_semantics<parallel>], iteration_bounds = array<i64: 2>, scalar_prefetch = 0 : i64, scratch_operands = 0 : i64, tpu.core_type = #tpu.core_type<tc>, window_params = [{transform_indices = @transform_0, window_bounds = array<i64: 64, 8>}, {pipeline_mode = #tpu.pipeline_mode<synchronous>, transform_indices = @transform_1, window_bounds = array<i64: 8, 32>}, {pipeline_mode = #tpu.pipeline_mode<synchronous>, transform_indices = @transform_2, window_bounds = array<i64: 1, 32>}, {pipeline_mode = #tpu.pipeline_mode<synchronous>, transform_indices = @transform_3, window_bounds = array<i64: 2, 96, 32>}, {pipeline_mode = #tpu.pipeline_mode<synchronous>, transform_indices = @transform_4, window_bounds = array<i64: 2, 1, 32>}, {pipeline_mode = #tpu.pipeline_mode<synchronous>, transform_indices = @transform_5, window_bounds = array<i64: 2, 1, 32>}, {pipeline_mode = #tpu.pipeline_mode<synchronous>, transform_indices = @transform_6, window_bounds = array<i64: 2, 1, 32>}, {pipeline_mode = #tpu.pipeline_mode<synchronous>, transform_indices = @transform_7, window_bounds = array<i64: 2, 96, 32>}, {pipeline_mode = #tpu.pipeline_mode<synchronous>, transform_indices = @transform_8, window_bounds = array<i64: 2, 1, 32>}, {pipeline_mode = #tpu.pipeline_mode<synchronous>, transform_indices = @transform_9, window_bounds = array<i64: 2, 1, 32>}, {pipeline_mode = #tpu.pipeline_mode<synchronous>, transform_indices = @transform_10, window_bounds = array<i64: 2, 1, 32>}, {transform_indices = @transform_11, window_bounds = array<i64: 2>}, {pipeline_mode = #tpu.pipeline_mode<synchronous>, transform_indices = @transform_12, window_bounds = array<i64: 32, 32>}, {pipeline_mode = #tpu.pipeline_mode<synchronous>, transform_indices = @transform_13, window_bounds = array<i64: 1, 32>}, {transform_indices = @transform_14, window_bounds = array<i64: 64, 32>}]} {
    %c0 = arith.constant 0 : index
    %c0_0 = arith.constant 0 : index
    %0 = vector.load %arg1[%c0, %c0_0] : memref<64x8xf32, #tpu.memory_space<vmem>>, vector<64x8xf32>
    %1 = tpu.iota {dimensions = array<i32: 0>} : vector<64x1xi32>
    %c32_i32 = arith.constant 32 : i32
    %c0_i32 = arith.constant 0 : i32
    %2 = arith.cmpi eq, %c32_i32, %c0_i32 : i32
    %c1_i32 = arith.constant 1 : i32
    %3 = arith.select %2, %c1_i32, %c32_i32 : i32
    %4 = vector.broadcast %3 : i32 to vector<64x1xi32>
    %5 = arith.remsi %1, %4 : vector<64x1xi32>
    %c0_i32_1 = arith.constant 0 : i32
    %6 = vector.broadcast %c0_i32_1 : i32 to vector<64x1xi32>
    %7 = arith.cmpi ne, %5, %6 : vector<64x1xi32>
    %c0_i32_2 = arith.constant 0 : i32
    %8 = vector.broadcast %c0_i32_2 : i32 to vector<64x1xi32>
    %9 = arith.cmpi slt, %5, %8 : vector<64x1xi32>
    %c0_i32_3 = arith.constant 0 : i32
    %10 = arith.cmpi slt, %3, %c0_i32_3 : i32
    %11 = vector.broadcast %10 : i1 to vector<64x1xi1>
    %12 = vector.broadcast %11 : vector<64x1xi1> to vector<64x1xi1>
    %13 = arith.xori %9, %12 : vector<64x1xi1>
    %14 = arith.andi %13, %7 : vector<64x1xi1>
    %15 = vector.broadcast %3 : i32 to vector<64x1xi32>
    %16 = arith.addi %5, %15 : vector<64x1xi32>
    %17 = arith.select %14, %16, %5 : vector<64x1xi1>, vector<64x1xi32>
    %18 = arith.truncf %0 : vector<64x8xf32> to vector<64x8xbf16>
    %c0_4 = arith.constant 0 : index
    %c0_5 = arith.constant 0 : index
    %19 = vector.load %arg2[%c0_4, %c0_5] : memref<8x32xbf16, #tpu.memory_space<vmem>>, vector<8x32xbf16>
    %cst = arith.constant dense<0.000000e+00> : vector<64x32xf32>
    %20 = tpu.matmul %18, %19, %cst {dimension_numbers = #tpu.dot_dimension_numbers<[1], [0], [0], [1], [0, 0, 1, 1], [], []>} : vector<64x8xbf16>, vector<8x32xbf16>, vector<64x32xf32> -> vector<64x32xf32>
    %c0_6 = arith.constant 0 : index
    %c0_7 = arith.constant 0 : index
    %21 = vector.load %arg3[%c0_6, %c0_7] : memref<1x32xf32, #tpu.memory_space<vmem>>, vector<1x32xf32>
    %22 = vector.broadcast %21 : vector<1x32xf32> to vector<64x32xf32>
    %23 = arith.addf %20, %22 : vector<64x32xf32>
    %c0_8 = arith.constant 0 : index
    %c0_9 = arith.constant 0 : index
    %c0_10 = arith.constant 0 : index
    %24 = vector.load %arg4[%c0_8, %c0_9, %c0_10] : memref<2x96x32xbf16, #tpu.memory_space<vmem>>, vector<1x96x32xbf16>
    %25 = vector.shape_cast %24 : vector<1x96x32xbf16> to vector<96x32xbf16>
    %c0_11 = arith.constant 0 : index
    %c0_12 = arith.constant 0 : index
    %c0_13 = arith.constant 0 : index
    %26 = vector.load %arg5[%c0_11, %c0_12, %c0_13] : memref<2x1x32xf32, #tpu.memory_space<vmem>>, vector<1x1x32xf32>
    %27 = vector.shape_cast %26 : vector<1x1x32xf32> to vector<1x32xf32>
    %c2_i32 = arith.constant 2 : i32
    %28 = tpu.dynamic_rotate %23 by %c2_i32 dim 0 : vector<64x32xf32>, i32 -> vector<64x32xf32>
    %c2_i32_14 = arith.constant 2 : i32
    %29 = vector.broadcast %c2_i32_14 : i32 to vector<64x1xi32>
    %30 = arith.cmpi sge, %17, %29 : vector<64x1xi32>
    %cst_15 = arith.constant 0.000000e+00 : f32
    %31 = vector.shape_cast %30 : vector<64x1xi1> to vector<64x1xi1>
    %32 = vector.broadcast %31 : vector<64x1xi1> to vector<64x32xi1>
    %33 = vector.broadcast %cst_15 : f32 to vector<64x32xf32>
    %34 = arith.select %32, %28, %33 : vector<64x32xi1>, vector<64x32xf32>
    %c1_i32_16 = arith.constant 1 : i32
    %35 = tpu.dynamic_rotate %23 by %c1_i32_16 dim 0 : vector<64x32xf32>, i32 -> vector<64x32xf32>
    %c1_i32_17 = arith.constant 1 : i32
    %36 = vector.broadcast %c1_i32_17 : i32 to vector<64x1xi32>
    %37 = arith.cmpi sge, %17, %36 : vector<64x1xi32>
    %cst_18 = arith.constant 0.000000e+00 : f32
    %38 = vector.shape_cast %37 : vector<64x1xi1> to vector<64x1xi1>
    %39 = vector.broadcast %38 : vector<64x1xi1> to vector<64x32xi1>
    %40 = vector.broadcast %cst_18 : f32 to vector<64x32xf32>
    %41 = arith.select %39, %35, %40 : vector<64x32xi1>, vector<64x32xf32>
    %42 = tpu.concatenate %34, %41, %23 in 1 : vector<64x32xf32>, vector<64x32xf32>, vector<64x32xf32> -> vector<64x96xf32>
    %43 = arith.truncf %42 : vector<64x96xf32> to vector<64x96xbf16>
    %cst_19 = arith.constant dense<0.000000e+00> : vector<64x32xf32>
    %44 = tpu.matmul %43, %25, %cst_19 {dimension_numbers = #tpu.dot_dimension_numbers<[1], [0], [0], [1], [0, 0, 1, 1], [], []>} : vector<64x96xbf16>, vector<96x32xbf16>, vector<64x32xf32> -> vector<64x32xf32>
    %45 = vector.broadcast %27 : vector<1x32xf32> to vector<64x32xf32>
    %46 = arith.addf %44, %45 : vector<64x32xf32>
    %c0_20 = arith.constant 0 : index
    %c0_21 = arith.constant 0 : index
    %c0_22 = arith.constant 0 : index
    %47 = vector.load %arg6[%c0_20, %c0_21, %c0_22] : memref<2x1x32xf32, #tpu.memory_space<vmem>>, vector<1x1x32xf32>
    %48 = vector.shape_cast %47 : vector<1x1x32xf32> to vector<1x32xf32>
    %c0_23 = arith.constant 0 : index
    %c0_24 = arith.constant 0 : index
    %c0_25 = arith.constant 0 : index
    %49 = vector.load %arg7[%c0_23, %c0_24, %c0_25] : memref<2x1x32xf32, #tpu.memory_space<vmem>>, vector<1x1x32xf32>
    %50 = vector.shape_cast %49 : vector<1x1x32xf32> to vector<1x32xf32>
    %cst_26 = arith.constant dense<0.000000e+00> : vector<64xf32>
    %51 = vector.multi_reduction <add>, %46, %cst_26 [1] : vector<64x32xf32> to vector<64xf32>
    %52 = vector.shape_cast %51 : vector<64xf32> to vector<64x1xf32>
    %cst_27 = arith.constant 3.125000e-02 : f32
    %53 = vector.broadcast %cst_27 : f32 to vector<64x1xf32>
    %54 = arith.mulf %52, %53 : vector<64x1xf32>
    %55 = arith.mulf %46, %46 : vector<64x32xf32>
    %cst_28 = arith.constant dense<0.000000e+00> : vector<64xf32>
    %56 = vector.multi_reduction <add>, %55, %cst_28 [1] : vector<64x32xf32> to vector<64xf32>
    %57 = vector.shape_cast %56 : vector<64xf32> to vector<64x1xf32>
    %cst_29 = arith.constant 3.125000e-02 : f32
    %58 = vector.broadcast %cst_29 : f32 to vector<64x1xf32>
    %59 = arith.mulf %57, %58 : vector<64x1xf32>
    %60 = arith.mulf %54, %54 : vector<64x1xf32>
    %61 = arith.subf %59, %60 : vector<64x1xf32>
    %cst_30 = arith.constant 0.000000e+00 : f32
    %62 = vector.broadcast %cst_30 : f32 to vector<64x1xf32>
    %63 = arith.maximumf %61, %62 : vector<64x1xf32>
    %64 = vector.broadcast %54 : vector<64x1xf32> to vector<64x32xf32>
    %65 = arith.subf %46, %64 : vector<64x32xf32>
    %cst_31 = arith.constant 9.99999993E-9 : f32
    %66 = vector.broadcast %cst_31 : f32 to vector<64x1xf32>
    %67 = arith.addf %63, %66 : vector<64x1xf32>
    %68 = math.rsqrt %67 : vector<64x1xf32>
    %69 = vector.broadcast %68 : vector<64x1xf32> to vector<64x32xf32>
    %70 = arith.mulf %65, %69 : vector<64x32xf32>
    %71 = vector.broadcast %48 : vector<1x32xf32> to vector<64x32xf32>
    %72 = arith.mulf %70, %71 : vector<64x32xf32>
    %73 = vector.broadcast %50 : vector<1x32xf32> to vector<64x32xf32>
    %74 = arith.addf %72, %73 : vector<64x32xf32>
    %cst_32 = arith.constant 0.000000e+00 : f32
    %75 = vector.broadcast %cst_32 : f32 to vector<64x32xf32>
    %76 = arith.maximumf %74, %75 : vector<64x32xf32>
    %c0_33 = arith.constant 0 : index
    %c0_34 = arith.constant 0 : index
    %c0_35 = arith.constant 0 : index
    %77 = vector.load %arg8[%c0_33, %c0_34, %c0_35] : memref<2x96x32xbf16, #tpu.memory_space<vmem>>, vector<1x96x32xbf16>
    %78 = vector.shape_cast %77 : vector<1x96x32xbf16> to vector<96x32xbf16>
    %c0_36 = arith.constant 0 : index
    %c0_37 = arith.constant 0 : index
    %c0_38 = arith.constant 0 : index
    %79 = vector.load %arg9[%c0_36, %c0_37, %c0_38] : memref<2x1x32xf32, #tpu.memory_space<vmem>>, vector<1x1x32xf32>
    %80 = vector.shape_cast %79 : vector<1x1x32xf32> to vector<1x32xf32>
    %c4_i32 = arith.constant 4 : i32
    %81 = tpu.dynamic_rotate %76 by %c4_i32 dim 0 : vector<64x32xf32>, i32 -> vector<64x32xf32>
    %c4_i32_39 = arith.constant 4 : i32
    %82 = vector.broadcast %c4_i32_39 : i32 to vector<64x1xi32>
    %83 = arith.cmpi sge, %17, %82 : vector<64x1xi32>
    %cst_40 = arith.constant 0.000000e+00 : f32
    %84 = vector.shape_cast %83 : vector<64x1xi1> to vector<64x1xi1>
    %85 = vector.broadcast %84 : vector<64x1xi1> to vector<64x32xi1>
    %86 = vector.broadcast %cst_40 : f32 to vector<64x32xf32>
    %87 = arith.select %85, %81, %86 : vector<64x32xi1>, vector<64x32xf32>
    %c2_i32_41 = arith.constant 2 : i32
    %88 = tpu.dynamic_rotate %76 by %c2_i32_41 dim 0 : vector<64x32xf32>, i32 -> vector<64x32xf32>
    %c2_i32_42 = arith.constant 2 : i32
    %89 = vector.broadcast %c2_i32_42 : i32 to vector<64x1xi32>
    %90 = arith.cmpi sge, %17, %89 : vector<64x1xi32>
    %cst_43 = arith.constant 0.000000e+00 : f32
    %91 = vector.shape_cast %90 : vector<64x1xi1> to vector<64x1xi1>
    %92 = vector.broadcast %91 : vector<64x1xi1> to vector<64x32xi1>
    %93 = vector.broadcast %cst_43 : f32 to vector<64x32xf32>
    %94 = arith.select %92, %88, %93 : vector<64x32xi1>, vector<64x32xf32>
    %95 = tpu.concatenate %87, %94, %76 in 1 : vector<64x32xf32>, vector<64x32xf32>, vector<64x32xf32> -> vector<64x96xf32>
    %96 = arith.truncf %95 : vector<64x96xf32> to vector<64x96xbf16>
    %cst_44 = arith.constant dense<0.000000e+00> : vector<64x32xf32>
    %97 = tpu.matmul %96, %78, %cst_44 {dimension_numbers = #tpu.dot_dimension_numbers<[1], [0], [0], [1], [0, 0, 1, 1], [], []>} : vector<64x96xbf16>, vector<96x32xbf16>, vector<64x32xf32> -> vector<64x32xf32>
    %98 = vector.broadcast %80 : vector<1x32xf32> to vector<64x32xf32>
    %99 = arith.addf %97, %98 : vector<64x32xf32>
    %c0_45 = arith.constant 0 : index
    %c0_46 = arith.constant 0 : index
    %c0_47 = arith.constant 0 : index
    %100 = vector.load %arg10[%c0_45, %c0_46, %c0_47] : memref<2x1x32xf32, #tpu.memory_space<vmem>>, vector<1x1x32xf32>
    %101 = vector.shape_cast %100 : vector<1x1x32xf32> to vector<1x32xf32>
    %c0_48 = arith.constant 0 : index
    %c0_49 = arith.constant 0 : index
    %c0_50 = arith.constant 0 : index
    %102 = vector.load %arg11[%c0_48, %c0_49, %c0_50] : memref<2x1x32xf32, #tpu.memory_space<vmem>>, vector<1x1x32xf32>
    %103 = vector.shape_cast %102 : vector<1x1x32xf32> to vector<1x32xf32>
    %cst_51 = arith.constant dense<0.000000e+00> : vector<64xf32>
    %104 = vector.multi_reduction <add>, %99, %cst_51 [1] : vector<64x32xf32> to vector<64xf32>
    %105 = vector.shape_cast %104 : vector<64xf32> to vector<64x1xf32>
    %cst_52 = arith.constant 3.125000e-02 : f32
    %106 = vector.broadcast %cst_52 : f32 to vector<64x1xf32>
    %107 = arith.mulf %105, %106 : vector<64x1xf32>
    %108 = arith.mulf %99, %99 : vector<64x32xf32>
    %cst_53 = arith.constant dense<0.000000e+00> : vector<64xf32>
    %109 = vector.multi_reduction <add>, %108, %cst_53 [1] : vector<64x32xf32> to vector<64xf32>
    %110 = vector.shape_cast %109 : vector<64xf32> to vector<64x1xf32>
    %cst_54 = arith.constant 3.125000e-02 : f32
    %111 = vector.broadcast %cst_54 : f32 to vector<64x1xf32>
    %112 = arith.mulf %110, %111 : vector<64x1xf32>
    %113 = arith.mulf %107, %107 : vector<64x1xf32>
    %114 = arith.subf %112, %113 : vector<64x1xf32>
    %cst_55 = arith.constant 0.000000e+00 : f32
    %115 = vector.broadcast %cst_55 : f32 to vector<64x1xf32>
    %116 = arith.maximumf %114, %115 : vector<64x1xf32>
    %117 = vector.broadcast %107 : vector<64x1xf32> to vector<64x32xf32>
    %118 = arith.subf %99, %117 : vector<64x32xf32>
    %cst_56 = arith.constant 9.99999993E-9 : f32
    %119 = vector.broadcast %cst_56 : f32 to vector<64x1xf32>
    %120 = arith.addf %116, %119 : vector<64x1xf32>
    %121 = math.rsqrt %120 : vector<64x1xf32>
    %122 = vector.broadcast %121 : vector<64x1xf32> to vector<64x32xf32>
    %123 = arith.mulf %118, %122 : vector<64x32xf32>
    %124 = vector.broadcast %101 : vector<1x32xf32> to vector<64x32xf32>
    %125 = arith.mulf %123, %124 : vector<64x32xf32>
    %126 = vector.broadcast %103 : vector<1x32xf32> to vector<64x32xf32>
    %127 = arith.addf %125, %126 : vector<64x32xf32>
    %cst_57 = arith.constant 0.000000e+00 : f32
    %128 = vector.broadcast %cst_57 : f32 to vector<64x32xf32>
    %129 = arith.maximumf %127, %128 : vector<64x32xf32>
    %c0_58 = arith.constant 0 : index
    %130 = memref.load %arg12[%c0_58] : memref<2xf32, #tpu.memory_space<smem>>
    %131 = vector.broadcast %130 : f32 to vector<64x32xf32>
    %132 = arith.mulf %131, %129 : vector<64x32xf32>
    %133 = arith.addf %132, %23 : vector<64x32xf32>
    %c1 = arith.constant 1 : index
    %c0_59 = arith.constant 0 : index
    %c0_60 = arith.constant 0 : index
    %134 = vector.load %arg4[%c1, %c0_59, %c0_60] : memref<2x96x32xbf16, #tpu.memory_space<vmem>>, vector<1x96x32xbf16>
    %135 = vector.shape_cast %134 : vector<1x96x32xbf16> to vector<96x32xbf16>
    %c1_61 = arith.constant 1 : index
    %c0_62 = arith.constant 0 : index
    %c0_63 = arith.constant 0 : index
    %136 = vector.load %arg5[%c1_61, %c0_62, %c0_63] : memref<2x1x32xf32, #tpu.memory_space<vmem>>, vector<1x1x32xf32>
    %137 = vector.shape_cast %136 : vector<1x1x32xf32> to vector<1x32xf32>
    %c8_i32 = arith.constant 8 : i32
    %138 = tpu.dynamic_rotate %133 by %c8_i32 dim 0 : vector<64x32xf32>, i32 -> vector<64x32xf32>
    %c8_i32_64 = arith.constant 8 : i32
    %139 = vector.broadcast %c8_i32_64 : i32 to vector<64x1xi32>
    %140 = arith.cmpi sge, %17, %139 : vector<64x1xi32>
    %cst_65 = arith.constant 0.000000e+00 : f32
    %141 = vector.shape_cast %140 : vector<64x1xi1> to vector<64x1xi1>
    %142 = vector.broadcast %141 : vector<64x1xi1> to vector<64x32xi1>
    %143 = vector.broadcast %cst_65 : f32 to vector<64x32xf32>
    %144 = arith.select %142, %138, %143 : vector<64x32xi1>, vector<64x32xf32>
    %c4_i32_66 = arith.constant 4 : i32
    %145 = tpu.dynamic_rotate %133 by %c4_i32_66 dim 0 : vector<64x32xf32>, i32 -> vector<64x32xf32>
    %c4_i32_67 = arith.constant 4 : i32
    %146 = vector.broadcast %c4_i32_67 : i32 to vector<64x1xi32>
    %147 = arith.cmpi sge, %17, %146 : vector<64x1xi32>
    %cst_68 = arith.constant 0.000000e+00 : f32
    %148 = vector.shape_cast %147 : vector<64x1xi1> to vector<64x1xi1>
    %149 = vector.broadcast %148 : vector<64x1xi1> to vector<64x32xi1>
    %150 = vector.broadcast %cst_68 : f32 to vector<64x32xf32>
    %151 = arith.select %149, %145, %150 : vector<64x32xi1>, vector<64x32xf32>
    %152 = tpu.concatenate %144, %151, %133 in 1 : vector<64x32xf32>, vector<64x32xf32>, vector<64x32xf32> -> vector<64x96xf32>
    %153 = arith.truncf %152 : vector<64x96xf32> to vector<64x96xbf16>
    %cst_69 = arith.constant dense<0.000000e+00> : vector<64x32xf32>
    %154 = tpu.matmul %153, %135, %cst_69 {dimension_numbers = #tpu.dot_dimension_numbers<[1], [0], [0], [1], [0, 0, 1, 1], [], []>} : vector<64x96xbf16>, vector<96x32xbf16>, vector<64x32xf32> -> vector<64x32xf32>
    %155 = vector.broadcast %137 : vector<1x32xf32> to vector<64x32xf32>
    %156 = arith.addf %154, %155 : vector<64x32xf32>
    %c1_70 = arith.constant 1 : index
    %c0_71 = arith.constant 0 : index
    %c0_72 = arith.constant 0 : index
    %157 = vector.load %arg6[%c1_70, %c0_71, %c0_72] : memref<2x1x32xf32, #tpu.memory_space<vmem>>, vector<1x1x32xf32>
    %158 = vector.shape_cast %157 : vector<1x1x32xf32> to vector<1x32xf32>
    %c1_73 = arith.constant 1 : index
    %c0_74 = arith.constant 0 : index
    %c0_75 = arith.constant 0 : index
    %159 = vector.load %arg7[%c1_73, %c0_74, %c0_75] : memref<2x1x32xf32, #tpu.memory_space<vmem>>, vector<1x1x32xf32>
    %160 = vector.shape_cast %159 : vector<1x1x32xf32> to vector<1x32xf32>
    %cst_76 = arith.constant dense<0.000000e+00> : vector<64xf32>
    %161 = vector.multi_reduction <add>, %156, %cst_76 [1] : vector<64x32xf32> to vector<64xf32>
    %162 = vector.shape_cast %161 : vector<64xf32> to vector<64x1xf32>
    %cst_77 = arith.constant 3.125000e-02 : f32
    %163 = vector.broadcast %cst_77 : f32 to vector<64x1xf32>
    %164 = arith.mulf %162, %163 : vector<64x1xf32>
    %165 = arith.mulf %156, %156 : vector<64x32xf32>
    %cst_78 = arith.constant dense<0.000000e+00> : vector<64xf32>
    %166 = vector.multi_reduction <add>, %165, %cst_78 [1] : vector<64x32xf32> to vector<64xf32>
    %167 = vector.shape_cast %166 : vector<64xf32> to vector<64x1xf32>
    %cst_79 = arith.constant 3.125000e-02 : f32
    %168 = vector.broadcast %cst_79 : f32 to vector<64x1xf32>
    %169 = arith.mulf %167, %168 : vector<64x1xf32>
    %170 = arith.mulf %164, %164 : vector<64x1xf32>
    %171 = arith.subf %169, %170 : vector<64x1xf32>
    %cst_80 = arith.constant 0.000000e+00 : f32
    %172 = vector.broadcast %cst_80 : f32 to vector<64x1xf32>
    %173 = arith.maximumf %171, %172 : vector<64x1xf32>
    %174 = vector.broadcast %164 : vector<64x1xf32> to vector<64x32xf32>
    %175 = arith.subf %156, %174 : vector<64x32xf32>
    %cst_81 = arith.constant 9.99999993E-9 : f32
    %176 = vector.broadcast %cst_81 : f32 to vector<64x1xf32>
    %177 = arith.addf %173, %176 : vector<64x1xf32>
    %178 = math.rsqrt %177 : vector<64x1xf32>
    %179 = vector.broadcast %178 : vector<64x1xf32> to vector<64x32xf32>
    %180 = arith.mulf %175, %179 : vector<64x32xf32>
    %181 = vector.broadcast %158 : vector<1x32xf32> to vector<64x32xf32>
    %182 = arith.mulf %180, %181 : vector<64x32xf32>
    %183 = vector.broadcast %160 : vector<1x32xf32> to vector<64x32xf32>
    %184 = arith.addf %182, %183 : vector<64x32xf32>
    %cst_82 = arith.constant 0.000000e+00 : f32
    %185 = vector.broadcast %cst_82 : f32 to vector<64x32xf32>
    %186 = arith.maximumf %184, %185 : vector<64x32xf32>
    %c1_83 = arith.constant 1 : index
    %c0_84 = arith.constant 0 : index
    %c0_85 = arith.constant 0 : index
    %187 = vector.load %arg8[%c1_83, %c0_84, %c0_85] : memref<2x96x32xbf16, #tpu.memory_space<vmem>>, vector<1x96x32xbf16>
    %188 = vector.shape_cast %187 : vector<1x96x32xbf16> to vector<96x32xbf16>
    %c1_86 = arith.constant 1 : index
    %c0_87 = arith.constant 0 : index
    %c0_88 = arith.constant 0 : index
    %189 = vector.load %arg9[%c1_86, %c0_87, %c0_88] : memref<2x1x32xf32, #tpu.memory_space<vmem>>, vector<1x1x32xf32>
    %190 = vector.shape_cast %189 : vector<1x1x32xf32> to vector<1x32xf32>
    %c16_i32 = arith.constant 16 : i32
    %191 = tpu.dynamic_rotate %186 by %c16_i32 dim 0 : vector<64x32xf32>, i32 -> vector<64x32xf32>
    %c16_i32_89 = arith.constant 16 : i32
    %192 = vector.broadcast %c16_i32_89 : i32 to vector<64x1xi32>
    %193 = arith.cmpi sge, %17, %192 : vector<64x1xi32>
    %cst_90 = arith.constant 0.000000e+00 : f32
    %194 = vector.shape_cast %193 : vector<64x1xi1> to vector<64x1xi1>
    %195 = vector.broadcast %194 : vector<64x1xi1> to vector<64x32xi1>
    %196 = vector.broadcast %cst_90 : f32 to vector<64x32xf32>
    %197 = arith.select %195, %191, %196 : vector<64x32xi1>, vector<64x32xf32>
    %c8_i32_91 = arith.constant 8 : i32
    %198 = tpu.dynamic_rotate %186 by %c8_i32_91 dim 0 : vector<64x32xf32>, i32 -> vector<64x32xf32>
    %c8_i32_92 = arith.constant 8 : i32
    %199 = vector.broadcast %c8_i32_92 : i32 to vector<64x1xi32>
    %200 = arith.cmpi sge, %17, %199 : vector<64x1xi32>
    %cst_93 = arith.constant 0.000000e+00 : f32
    %201 = vector.shape_cast %200 : vector<64x1xi1> to vector<64x1xi1>
    %202 = vector.broadcast %201 : vector<64x1xi1> to vector<64x32xi1>
    %203 = vector.broadcast %cst_93 : f32 to vector<64x32xf32>
    %204 = arith.select %202, %198, %203 : vector<64x32xi1>, vector<64x32xf32>
    %205 = tpu.concatenate %197, %204, %186 in 1 : vector<64x32xf32>, vector<64x32xf32>, vector<64x32xf32> -> vector<64x96xf32>
    %206 = arith.truncf %205 : vector<64x96xf32> to vector<64x96xbf16>
    %cst_94 = arith.constant dense<0.000000e+00> : vector<64x32xf32>
    %207 = tpu.matmul %206, %188, %cst_94 {dimension_numbers = #tpu.dot_dimension_numbers<[1], [0], [0], [1], [0, 0, 1, 1], [], []>} : vector<64x96xbf16>, vector<96x32xbf16>, vector<64x32xf32> -> vector<64x32xf32>
    %208 = vector.broadcast %190 : vector<1x32xf32> to vector<64x32xf32>
    %209 = arith.addf %207, %208 : vector<64x32xf32>
    %c1_95 = arith.constant 1 : index
    %c0_96 = arith.constant 0 : index
    %c0_97 = arith.constant 0 : index
    %210 = vector.load %arg10[%c1_95, %c0_96, %c0_97] : memref<2x1x32xf32, #tpu.memory_space<vmem>>, vector<1x1x32xf32>
    %211 = vector.shape_cast %210 : vector<1x1x32xf32> to vector<1x32xf32>
    %c1_98 = arith.constant 1 : index
    %c0_99 = arith.constant 0 : index
    %c0_100 = arith.constant 0 : index
    %212 = vector.load %arg11[%c1_98, %c0_99, %c0_100] : memref<2x1x32xf32, #tpu.memory_space<vmem>>, vector<1x1x32xf32>
    %213 = vector.shape_cast %212 : vector<1x1x32xf32> to vector<1x32xf32>
    %cst_101 = arith.constant dense<0.000000e+00> : vector<64xf32>
    %214 = vector.multi_reduction <add>, %209, %cst_101 [1] : vector<64x32xf32> to vector<64xf32>
    %215 = vector.shape_cast %214 : vector<64xf32> to vector<64x1xf32>
    %cst_102 = arith.constant 3.125000e-02 : f32
    %216 = vector.broadcast %cst_102 : f32 to vector<64x1xf32>
    %217 = arith.mulf %215, %216 : vector<64x1xf32>
    %218 = arith.mulf %209, %209 : vector<64x32xf32>
    %cst_103 = arith.constant dense<0.000000e+00> : vector<64xf32>
    %219 = vector.multi_reduction <add>, %218, %cst_103 [1] : vector<64x32xf32> to vector<64xf32>
    %220 = vector.shape_cast %219 : vector<64xf32> to vector<64x1xf32>
    %cst_104 = arith.constant 3.125000e-02 : f32
    %221 = vector.broadcast %cst_104 : f32 to vector<64x1xf32>
    %222 = arith.mulf %220, %221 : vector<64x1xf32>
    %223 = arith.mulf %217, %217 : vector<64x1xf32>
    %224 = arith.subf %222, %223 : vector<64x1xf32>
    %cst_105 = arith.constant 0.000000e+00 : f32
    %225 = vector.broadcast %cst_105 : f32 to vector<64x1xf32>
    %226 = arith.maximumf %224, %225 : vector<64x1xf32>
    %227 = vector.broadcast %217 : vector<64x1xf32> to vector<64x32xf32>
    %228 = arith.subf %209, %227 : vector<64x32xf32>
    %cst_106 = arith.constant 9.99999993E-9 : f32
    %229 = vector.broadcast %cst_106 : f32 to vector<64x1xf32>
    %230 = arith.addf %226, %229 : vector<64x1xf32>
    %231 = math.rsqrt %230 : vector<64x1xf32>
    %232 = vector.broadcast %231 : vector<64x1xf32> to vector<64x32xf32>
    %233 = arith.mulf %228, %232 : vector<64x32xf32>
    %234 = vector.broadcast %211 : vector<1x32xf32> to vector<64x32xf32>
    %235 = arith.mulf %233, %234 : vector<64x32xf32>
    %236 = vector.broadcast %213 : vector<1x32xf32> to vector<64x32xf32>
    %237 = arith.addf %235, %236 : vector<64x32xf32>
    %cst_107 = arith.constant 0.000000e+00 : f32
    %238 = vector.broadcast %cst_107 : f32 to vector<64x32xf32>
    %239 = arith.maximumf %237, %238 : vector<64x32xf32>
    %c1_108 = arith.constant 1 : index
    %240 = memref.load %arg12[%c1_108] : memref<2xf32, #tpu.memory_space<smem>>
    %241 = vector.broadcast %240 : f32 to vector<64x32xf32>
    %242 = arith.mulf %241, %239 : vector<64x32xf32>
    %243 = arith.addf %242, %133 : vector<64x32xf32>
    %244 = arith.truncf %243 : vector<64x32xf32> to vector<64x32xbf16>
    %c0_109 = arith.constant 0 : index
    %c0_110 = arith.constant 0 : index
    %245 = vector.load %arg13[%c0_109, %c0_110] : memref<32x32xbf16, #tpu.memory_space<vmem>>, vector<32x32xbf16>
    %cst_111 = arith.constant dense<0.000000e+00> : vector<64x32xf32>
    %246 = tpu.matmul %244, %245, %cst_111 {dimension_numbers = #tpu.dot_dimension_numbers<[1], [0], [0], [1], [0, 0, 1, 1], [], []>} : vector<64x32xbf16>, vector<32x32xbf16>, vector<64x32xf32> -> vector<64x32xf32>
    %c0_112 = arith.constant 0 : index
    %c0_113 = arith.constant 0 : index
    %247 = vector.load %arg14[%c0_112, %c0_113] : memref<1x32xf32, #tpu.memory_space<vmem>>, vector<1x32xf32>
    %248 = vector.broadcast %247 : vector<1x32xf32> to vector<64x32xf32>
    %249 = arith.addf %246, %248 : vector<64x32xf32>
    %c0_114 = arith.constant 0 : index
    %c0_115 = arith.constant 0 : index
    %250 = vector.load %arg15[%c0_114, %c0_115] : memref<64x32xf32, #tpu.memory_space<vmem>>, vector<64x32xf32>
    tpu.vector_store %arg15[%c0_114, %c0_115], %249 {strides = array<i32>} : memref<64x32xf32, #tpu.memory_space<vmem>>, vector<64x32xf32>,
    return
  }
  func.func @transform_0(%arg0: i32) -> (i32, i32) {
    %c0_i32 = arith.constant 0 : i32
    %c0_i32_0 = arith.constant 0 : i32
    return %arg0, %c0_i32 : i32, i32
  }
  func.func @transform_1(%arg0: i32) -> (i32, i32) {
    %c0_i32 = arith.constant 0 : i32
    %c0_i32_0 = arith.constant 0 : i32
    %c0_i32_1 = arith.constant 0 : i32
    return %c0_i32, %c0_i32_0 : i32, i32
  }
  func.func @transform_2(%arg0: i32) -> (i32, i32) {
    %c0_i32 = arith.constant 0 : i32
    %c0_i32_0 = arith.constant 0 : i32
    %c0_i32_1 = arith.constant 0 : i32
    return %c0_i32, %c0_i32_0 : i32, i32
  }
  func.func @transform_3(%arg0: i32) -> (i32, i32, i32) {
    %c0_i32 = arith.constant 0 : i32
    %c0_i32_0 = arith.constant 0 : i32
    %c0_i32_1 = arith.constant 0 : i32
    %c0_i32_2 = arith.constant 0 : i32
    return %c0_i32, %c0_i32_0, %c0_i32_1 : i32, i32, i32
  }
  func.func @transform_4(%arg0: i32) -> (i32, i32, i32) {
    %c0_i32 = arith.constant 0 : i32
    %c0_i32_0 = arith.constant 0 : i32
    %c0_i32_1 = arith.constant 0 : i32
    %c0_i32_2 = arith.constant 0 : i32
    return %c0_i32, %c0_i32_0, %c0_i32_1 : i32, i32, i32
  }
  func.func @transform_5(%arg0: i32) -> (i32, i32, i32) {
    %c0_i32 = arith.constant 0 : i32
    %c0_i32_0 = arith.constant 0 : i32
    %c0_i32_1 = arith.constant 0 : i32
    %c0_i32_2 = arith.constant 0 : i32
    return %c0_i32, %c0_i32_0, %c0_i32_1 : i32, i32, i32
  }
  func.func @transform_6(%arg0: i32) -> (i32, i32, i32) {
    %c0_i32 = arith.constant 0 : i32
    %c0_i32_0 = arith.constant 0 : i32
    %c0_i32_1 = arith.constant 0 : i32
    %c0_i32_2 = arith.constant 0 : i32
    return %c0_i32, %c0_i32_0, %c0_i32_1 : i32, i32, i32
  }
  func.func @transform_7(%arg0: i32) -> (i32, i32, i32) {
    %c0_i32 = arith.constant 0 : i32
    %c0_i32_0 = arith.constant 0 : i32
    %c0_i32_1 = arith.constant 0 : i32
    %c0_i32_2 = arith.constant 0 : i32
    return %c0_i32, %c0_i32_0, %c0_i32_1 : i32, i32, i32
  }
  func.func @transform_8(%arg0: i32) -> (i32, i32, i32) {
    %c0_i32 = arith.constant 0 : i32
    %c0_i32_0 = arith.constant 0 : i32
    %c0_i32_1 = arith.constant 0 : i32
    %c0_i32_2 = arith.constant 0 : i32
    return %c0_i32, %c0_i32_0, %c0_i32_1 : i32, i32, i32
  }
  func.func @transform_9(%arg0: i32) -> (i32, i32, i32) {
    %c0_i32 = arith.constant 0 : i32
    %c0_i32_0 = arith.constant 0 : i32
    %c0_i32_1 = arith.constant 0 : i32
    %c0_i32_2 = arith.constant 0 : i32
    return %c0_i32, %c0_i32_0, %c0_i32_1 : i32, i32, i32
  }
  func.func @transform_10(%arg0: i32) -> (i32, i32, i32) {
    %c0_i32 = arith.constant 0 : i32
    %c0_i32_0 = arith.constant 0 : i32
    %c0_i32_1 = arith.constant 0 : i32
    %c0_i32_2 = arith.constant 0 : i32
    return %c0_i32, %c0_i32_0, %c0_i32_1 : i32, i32, i32
  }
  func.func @transform_11(%arg0: i32) -> i32 {
    %c0_i32 = arith.constant 0 : i32
    %c0_i32_0 = arith.constant 0 : i32
    return %c0_i32 : i32
  }
  func.func @transform_12(%arg0: i32) -> (i32, i32) {
    %c0_i32 = arith.constant 0 : i32
    %c0_i32_0 = arith.constant 0 : i32
    %c0_i32_1 = arith.constant 0 : i32
    return %c0_i32, %c0_i32_0 : i32, i32
  }
  func.func @transform_13(%arg0: i32) -> (i32, i32) {
    %c0_i32 = arith.constant 0 : i32
    %c0_i32_0 = arith.constant 0 : i32
    %c0_i32_1 = arith.constant 0 : i32
    return %c0_i32, %c0_i32_0 : i32, i32
  }
  func.func @transform_14(%arg0: i32) -> (i32, i32) {
    %c0_i32 = arith.constant 0 : i32
    %c0_i32_0 = arith.constant 0 : i32
    return %arg0, %c0_i32 : i32, i32
  }
}

module attributes {stable_mosaic.version = 11 : i64} {
  func.func @_encoder_kernel(%arg0: i32, %arg1: memref<64x8xf32, #tpu.memory_space<vmem>>, %arg2: memref<8x32xbf16, #tpu.memory_space<vmem>>, %arg3: memref<1x32xf32, #tpu.memory_space<vmem>>, %arg4: memref<2x96x32xbf16, #tpu.memory_space<vmem>>, %arg5: memref<2x1x32xf32, #tpu.memory_space<vmem>>, %arg6: memref<2x1x32xf32, #tpu.memory_space<vmem>>, %arg7: memref<2x1x32xf32, #tpu.memory_space<vmem>>, %arg8: memref<2x96x32xbf16, #tpu.memory_space<vmem>>, %arg9: memref<2x1x32xf32, #tpu.memory_space<vmem>>, %arg10: memref<2x1x32xf32, #tpu.memory_space<vmem>>, %arg11: memref<2x1x32xf32, #tpu.memory_space<vmem>>, %arg12: memref<2xf32, #tpu.memory_space<smem>>, %arg13: memref<32x32xbf16, #tpu.memory_space<vmem>>, %arg14: memref<1x32xf32, #tpu.memory_space<vmem>>, %arg15: memref<64x32xf32, #tpu.memory_space<vmem>>) attributes {dimension_semantics = [#tpu.dimension_semantics<parallel>], iteration_bounds = array<i64: 2>, scalar_prefetch = 0 : i64, scratch_operands = 0 : i64, tpu.core_type = #tpu.core_type<tc>, window_params = [{transform_indices = @transform_0, window_bounds = array<i64: 64, 8>}, {pipeline_mode = #tpu.pipeline_mode<synchronous>, transform_indices = @transform_1, window_bounds = array<i64: 8, 32>}, {pipeline_mode = #tpu.pipeline_mode<synchronous>, transform_indices = @transform_2, window_bounds = array<i64: 1, 32>}, {pipeline_mode = #tpu.pipeline_mode<synchronous>, transform_indices = @transform_3, window_bounds = array<i64: 2, 96, 32>}, {pipeline_mode = #tpu.pipeline_mode<synchronous>, transform_indices = @transform_4, window_bounds = array<i64: 2, 1, 32>}, {pipeline_mode = #tpu.pipeline_mode<synchronous>, transform_indices = @transform_5, window_bounds = array<i64: 2, 1, 32>}, {pipeline_mode = #tpu.pipeline_mode<synchronous>, transform_indices = @transform_6, window_bounds = array<i64: 2, 1, 32>}, {pipeline_mode = #tpu.pipeline_mode<synchronous>, transform_indices = @transform_7, window_bounds = array<i64: 2, 96, 32>}, {pipeline_mode = #tpu.pipeline_mode<synchronous>, transform_indices = @transform_8, window_bounds = array<i64: 2, 1, 32>}, {pipeline_mode = #tpu.pipeline_mode<synchronous>, transform_indices = @transform_9, window_bounds = array<i64: 2, 1, 32>}, {pipeline_mode = #tpu.pipeline_mode<synchronous>, transform_indices = @transform_10, window_bounds = array<i64: 2, 1, 32>}, {transform_indices = @transform_11, window_bounds = array<i64: 2>}, {pipeline_mode = #tpu.pipeline_mode<synchronous>, transform_indices = @transform_12, window_bounds = array<i64: 32, 32>}, {pipeline_mode = #tpu.pipeline_mode<synchronous>, transform_indices = @transform_13, window_bounds = array<i64: 1, 32>}, {transform_indices = @transform_14, window_bounds = array<i64: 64, 32>}]} {
    %c0 = arith.constant 0 : index
    %c0_0 = arith.constant 0 : index
    %0 = vector.load %arg1[%c0, %c0_0] : memref<64x8xf32, #tpu.memory_space<vmem>>, vector<64x8xf32>
    %1 = tpu.iota {dimensions = array<i32: 0>} : vector<64x1xi32>
    %c32_i32 = arith.constant 32 : i32
    %c0_i32 = arith.constant 0 : i32
    %2 = arith.cmpi eq, %c32_i32, %c0_i32 : i32
    %c1_i32 = arith.constant 1 : i32
    %3 = arith.select %2, %c1_i32, %c32_i32 : i32
    %4 = vector.broadcast %3 : i32 to vector<64x1xi32>
    %5 = arith.remsi %1, %4 : vector<64x1xi32>
    %c0_i32_1 = arith.constant 0 : i32
    %6 = vector.broadcast %c0_i32_1 : i32 to vector<64x1xi32>
    %7 = arith.cmpi ne, %5, %6 : vector<64x1xi32>
    %c0_i32_2 = arith.constant 0 : i32
    %8 = vector.broadcast %c0_i32_2 : i32 to vector<64x1xi32>
    %9 = arith.cmpi slt, %5, %8 : vector<64x1xi32>
    %c0_i32_3 = arith.constant 0 : i32
    %10 = arith.cmpi slt, %3, %c0_i32_3 : i32
    %11 = vector.broadcast %10 : i1 to vector<64x1xi1>
    %12 = vector.broadcast %11 : vector<64x1xi1> to vector<64x1xi1>
    %13 = arith.xori %9, %12 : vector<64x1xi1>
    %14 = arith.andi %13, %7 : vector<64x1xi1>
    %15 = vector.broadcast %3 : i32 to vector<64x1xi32>
    %16 = arith.addi %5, %15 : vector<64x1xi32>
    %17 = arith.select %14, %16, %5 : vector<64x1xi1>, vector<64x1xi32>
    %18 = arith.truncf %0 : vector<64x8xf32> to vector<64x8xbf16>
    %c0_4 = arith.constant 0 : index
    %c0_5 = arith.constant 0 : index
    %19 = vector.load %arg2[%c0_4, %c0_5] : memref<8x32xbf16, #tpu.memory_space<vmem>>, vector<8x32xbf16>
    %cst = arith.constant dense<0.000000e+00> : vector<64x32xf32>
    %20 = tpu.matmul %18, %19, %cst {dimension_numbers = #tpu.dot_dimension_numbers<[1], [0], [0], [1], [0, 0, 1, 1], [], []>} : vector<64x8xbf16>, vector<8x32xbf16>, vector<64x32xf32> -> vector<64x32xf32>
    %c0_6 = arith.constant 0 : index
    %c0_7 = arith.constant 0 : index
    %21 = vector.load %arg3[%c0_6, %c0_7] : memref<1x32xf32, #tpu.memory_space<vmem>>, vector<1x32xf32>
    %22 = vector.broadcast %21 : vector<1x32xf32> to vector<64x32xf32>
    %23 = arith.addf %20, %22 : vector<64x32xf32>
    %c0_8 = arith.constant 0 : index
    %c0_9 = arith.constant 0 : index
    %c0_10 = arith.constant 0 : index
    %24 = vector.load %arg4[%c0_8, %c0_9, %c0_10] : memref<2x96x32xbf16, #tpu.memory_space<vmem>>, vector<1x96x32xbf16>
    %25 = vector.shape_cast %24 : vector<1x96x32xbf16> to vector<96x32xbf16>
    %c0_11 = arith.constant 0 : index
    %c0_12 = arith.constant 0 : index
    %c0_13 = arith.constant 0 : index
    %26 = vector.load %arg5[%c0_11, %c0_12, %c0_13] : memref<2x1x32xf32, #tpu.memory_space<vmem>>, vector<1x1x32xf32>
    %27 = vector.shape_cast %26 : vector<1x1x32xf32> to vector<1x32xf32>
    %c2_i32 = arith.constant 2 : i32
    %28 = tpu.dynamic_rotate %23 by %c2_i32 dim 0 : vector<64x32xf32>, i32 -> vector<64x32xf32>
    %c2_i32_14 = arith.constant 2 : i32
    %29 = vector.broadcast %c2_i32_14 : i32 to vector<64x1xi32>
    %30 = arith.cmpi sge, %17, %29 : vector<64x1xi32>
    %cst_15 = arith.constant 0.000000e+00 : f32
    %31 = vector.shape_cast %30 : vector<64x1xi1> to vector<64x1xi1>
    %32 = vector.broadcast %31 : vector<64x1xi1> to vector<64x32xi1>
    %33 = vector.broadcast %cst_15 : f32 to vector<64x32xf32>
    %34 = arith.select %32, %28, %33 : vector<64x32xi1>, vector<64x32xf32>
    %c1_i32_16 = arith.constant 1 : i32
    %35 = tpu.dynamic_rotate %23 by %c1_i32_16 dim 0 : vector<64x32xf32>, i32 -> vector<64x32xf32>
    %c1_i32_17 = arith.constant 1 : i32
    %36 = vector.broadcast %c1_i32_17 : i32 to vector<64x1xi32>
    %37 = arith.cmpi sge, %17, %36 : vector<64x1xi32>
    %cst_18 = arith.constant 0.000000e+00 : f32
    %38 = vector.shape_cast %37 : vector<64x1xi1> to vector<64x1xi1>
    %39 = vector.broadcast %38 : vector<64x1xi1> to vector<64x32xi1>
    %40 = vector.broadcast %cst_18 : f32 to vector<64x32xf32>
    %41 = arith.select %39, %35, %40 : vector<64x32xi1>, vector<64x32xf32>
    %42 = tpu.concatenate %34, %41, %23 in 1 : vector<64x32xf32>, vector<64x32xf32>, vector<64x32xf32> -> vector<64x96xf32>
    %43 = arith.truncf %42 : vector<64x96xf32> to vector<64x96xbf16>
    %cst_19 = arith.constant dense<0.000000e+00> : vector<64x32xf32>
    %44 = tpu.matmul %43, %25, %cst_19 {dimension_numbers = #tpu.dot_dimension_numbers<[1], [0], [0], [1], [0, 0, 1, 1], [], []>} : vector<64x96xbf16>, vector<96x32xbf16>, vector<64x32xf32> -> vector<64x32xf32>
    %45 = vector.broadcast %27 : vector<1x32xf32> to vector<64x32xf32>
    %46 = arith.addf %44, %45 : vector<64x32xf32>
    %c0_20 = arith.constant 0 : index
    %c0_21 = arith.constant 0 : index
    %c0_22 = arith.constant 0 : index
    %47 = vector.load %arg6[%c0_20, %c0_21, %c0_22] : memref<2x1x32xf32, #tpu.memory_space<vmem>>, vector<1x1x32xf32>
    %48 = vector.shape_cast %47 : vector<1x1x32xf32> to vector<1x32xf32>
    %c0_23 = arith.constant 0 : index
    %c0_24 = arith.constant 0 : index
    %c0_25 = arith.constant 0 : index
    %49 = vector.load %arg7[%c0_23, %c0_24, %c0_25] : memref<2x1x32xf32, #tpu.memory_space<vmem>>, vector<1x1x32xf32>
    %50 = vector.shape_cast %49 : vector<1x1x32xf32> to vector<1x32xf32>
    %cst_26 = arith.constant dense<0.000000e+00> : vector<64xf32>
    %51 = vector.multi_reduction <add>, %46, %cst_26 [1] : vector<64x32xf32> to vector<64xf32>
    %52 = vector.shape_cast %51 : vector<64xf32> to vector<64x1xf32>
    %cst_27 = arith.constant 3.125000e-02 : f32
    %53 = vector.broadcast %cst_27 : f32 to vector<64x1xf32>
    %54 = arith.mulf %52, %53 : vector<64x1xf32>
    %55 = arith.mulf %46, %46 : vector<64x32xf32>
    %cst_28 = arith.constant dense<0.000000e+00> : vector<64xf32>
    %56 = vector.multi_reduction <add>, %55, %cst_28 [1] : vector<64x32xf32> to vector<64xf32>
    %57 = vector.shape_cast %56 : vector<64xf32> to vector<64x1xf32>
    %cst_29 = arith.constant 3.125000e-02 : f32
    %58 = vector.broadcast %cst_29 : f32 to vector<64x1xf32>
    %59 = arith.mulf %57, %58 : vector<64x1xf32>
    %60 = arith.mulf %54, %54 : vector<64x1xf32>
    %61 = arith.subf %59, %60 : vector<64x1xf32>
    %cst_30 = arith.constant 0.000000e+00 : f32
    %62 = vector.broadcast %cst_30 : f32 to vector<64x1xf32>
    %63 = arith.maximumf %61, %62 : vector<64x1xf32>
    %64 = vector.broadcast %54 : vector<64x1xf32> to vector<64x32xf32>
    %65 = arith.subf %46, %64 : vector<64x32xf32>
    %cst_31 = arith.constant 9.99999993E-9 : f32
    %66 = vector.broadcast %cst_31 : f32 to vector<64x1xf32>
    %67 = arith.addf %63, %66 : vector<64x1xf32>
    %68 = math.rsqrt %67 : vector<64x1xf32>
    %69 = vector.broadcast %68 : vector<64x1xf32> to vector<64x32xf32>
    %70 = arith.mulf %65, %69 : vector<64x32xf32>
    %71 = vector.broadcast %48 : vector<1x32xf32> to vector<64x32xf32>
    %72 = arith.mulf %70, %71 : vector<64x32xf32>
    %73 = vector.broadcast %50 : vector<1x32xf32> to vector<64x32xf32>
    %74 = arith.addf %72, %73 : vector<64x32xf32>
    %cst_32 = arith.constant 0.000000e+00 : f32
    %75 = vector.broadcast %cst_32 : f32 to vector<64x32xf32>
    %76 = arith.maximumf %74, %75 : vector<64x32xf32>
    %c0_33 = arith.constant 0 : index
    %c0_34 = arith.constant 0 : index
    %c0_35 = arith.constant 0 : index
    %77 = vector.load %arg8[%c0_33, %c0_34, %c0_35] : memref<2x96x32xbf16, #tpu.memory_space<vmem>>, vector<1x96x32xbf16>
    %78 = vector.shape_cast %77 : vector<1x96x32xbf16> to vector<96x32xbf16>
    %c0_36 = arith.constant 0 : index
    %c0_37 = arith.constant 0 : index
    %c0_38 = arith.constant 0 : index
    %79 = vector.load %arg9[%c0_36, %c0_37, %c0_38] : memref<2x1x32xf32, #tpu.memory_space<vmem>>, vector<1x1x32xf32>
    %80 = vector.shape_cast %79 : vector<1x1x32xf32> to vector<1x32xf32>
    %c4_i32 = arith.constant 4 : i32
    %81 = tpu.dynamic_rotate %76 by %c4_i32 dim 0 : vector<64x32xf32>, i32 -> vector<64x32xf32>
    %c4_i32_39 = arith.constant 4 : i32
    %82 = vector.broadcast %c4_i32_39 : i32 to vector<64x1xi32>
    %83 = arith.cmpi sge, %17, %82 : vector<64x1xi32>
    %cst_40 = arith.constant 0.000000e+00 : f32
    %84 = vector.shape_cast %83 : vector<64x1xi1> to vector<64x1xi1>
    %85 = vector.broadcast %84 : vector<64x1xi1> to vector<64x32xi1>
    %86 = vector.broadcast %cst_40 : f32 to vector<64x32xf32>
    %87 = arith.select %85, %81, %86 : vector<64x32xi1>, vector<64x32xf32>
    %c2_i32_41 = arith.constant 2 : i32
    %88 = tpu.dynamic_rotate %76 by %c2_i32_41 dim 0 : vector<64x32xf32>, i32 -> vector<64x32xf32>
    %c2_i32_42 = arith.constant 2 : i32
    %89 = vector.broadcast %c2_i32_42 : i32 to vector<64x1xi32>
    %90 = arith.cmpi sge, %17, %89 : vector<64x1xi32>
    %cst_43 = arith.constant 0.000000e+00 : f32
    %91 = vector.shape_cast %90 : vector<64x1xi1> to vector<64x1xi1>
    %92 = vector.broadcast %91 : vector<64x1xi1> to vector<64x32xi1>
    %93 = vector.broadcast %cst_43 : f32 to vector<64x32xf32>
    %94 = arith.select %92, %88, %93 : vector<64x32xi1>, vector<64x32xf32>
    %95 = tpu.concatenate %87, %94, %76 in 1 : vector<64x32xf32>, vector<64x32xf32>, vector<64x32xf32> -> vector<64x96xf32>
    %96 = arith.truncf %95 : vector<64x96xf32> to vector<64x96xbf16>
    %cst_44 = arith.constant dense<0.000000e+00> : vector<64x32xf32>
    %97 = tpu.matmul %96, %78, %cst_44 {dimension_numbers = #tpu.dot_dimension_numbers<[1], [0], [0], [1], [0, 0, 1, 1], [], []>} : vector<64x96xbf16>, vector<96x32xbf16>, vector<64x32xf32> -> vector<64x32xf32>
    %98 = vector.broadcast %80 : vector<1x32xf32> to vector<64x32xf32>
    %99 = arith.addf %97, %98 : vector<64x32xf32>
    %c0_45 = arith.constant 0 : index
    %c0_46 = arith.constant 0 : index
    %c0_47 = arith.constant 0 : index
    %100 = vector.load %arg10[%c0_45, %c0_46, %c0_47] : memref<2x1x32xf32, #tpu.memory_space<vmem>>, vector<1x1x32xf32>
    %101 = vector.shape_cast %100 : vector<1x1x32xf32> to vector<1x32xf32>
    %c0_48 = arith.constant 0 : index
    %c0_49 = arith.constant 0 : index
    %c0_50 = arith.constant 0 : index
    %102 = vector.load %arg11[%c0_48, %c0_49, %c0_50] : memref<2x1x32xf32, #tpu.memory_space<vmem>>, vector<1x1x32xf32>
    %103 = vector.shape_cast %102 : vector<1x1x32xf32> to vector<1x32xf32>
    %cst_51 = arith.constant dense<0.000000e+00> : vector<64xf32>
    %104 = vector.multi_reduction <add>, %99, %cst_51 [1] : vector<64x32xf32> to vector<64xf32>
    %105 = vector.shape_cast %104 : vector<64xf32> to vector<64x1xf32>
    %cst_52 = arith.constant 3.125000e-02 : f32
    %106 = vector.broadcast %cst_52 : f32 to vector<64x1xf32>
    %107 = arith.mulf %105, %106 : vector<64x1xf32>
    %108 = arith.mulf %99, %99 : vector<64x32xf32>
    %cst_53 = arith.constant dense<0.000000e+00> : vector<64xf32>
    %109 = vector.multi_reduction <add>, %108, %cst_53 [1] : vector<64x32xf32> to vector<64xf32>
    %110 = vector.shape_cast %109 : vector<64xf32> to vector<64x1xf32>
    %cst_54 = arith.constant 3.125000e-02 : f32
    %111 = vector.broadcast %cst_54 : f32 to vector<64x1xf32>
    %112 = arith.mulf %110, %111 : vector<64x1xf32>
    %113 = arith.mulf %107, %107 : vector<64x1xf32>
    %114 = arith.subf %112, %113 : vector<64x1xf32>
    %cst_55 = arith.constant 0.000000e+00 : f32
    %115 = vector.broadcast %cst_55 : f32 to vector<64x1xf32>
    %116 = arith.maximumf %114, %115 : vector<64x1xf32>
    %117 = vector.broadcast %107 : vector<64x1xf32> to vector<64x32xf32>
    %118 = arith.subf %99, %117 : vector<64x32xf32>
    %cst_56 = arith.constant 9.99999993E-9 : f32
    %119 = vector.broadcast %cst_56 : f32 to vector<64x1xf32>
    %120 = arith.addf %116, %119 : vector<64x1xf32>
    %121 = math.rsqrt %120 : vector<64x1xf32>
    %122 = vector.broadcast %121 : vector<64x1xf32> to vector<64x32xf32>
    %123 = arith.mulf %118, %122 : vector<64x32xf32>
    %124 = vector.broadcast %101 : vector<1x32xf32> to vector<64x32xf32>
    %125 = arith.mulf %123, %124 : vector<64x32xf32>
    %126 = vector.broadcast %103 : vector<1x32xf32> to vector<64x32xf32>
    %127 = arith.addf %125, %126 : vector<64x32xf32>
    %cst_57 = arith.constant 0.000000e+00 : f32
    %128 = vector.broadcast %cst_57 : f32 to vector<64x32xf32>
    %129 = arith.maximumf %127, %128 : vector<64x32xf32>
    %c0_58 = arith.constant 0 : index
    %130 = memref.load %arg12[%c0_58] : memref<2xf32, #tpu.memory_space<smem>>
    %131 = vector.broadcast %130 : f32 to vector<64x32xf32>
    %132 = arith.mulf %131, %129 : vector<64x32xf32>
    %133 = arith.addf %132, %23 : vector<64x32xf32>
    %c1 = arith.constant 1 : index
    %c0_59 = arith.constant 0 : index
    %c0_60 = arith.constant 0 : index
    %134 = vector.load %arg4[%c1, %c0_59, %c0_60] : memref<2x96x32xbf16, #tpu.memory_space<vmem>>, vector<1x96x32xbf16>
    %135 = vector.shape_cast %134 : vector<1x96x32xbf16> to vector<96x32xbf16>
    %c1_61 = arith.constant 1 : index
    %c0_62 = arith.constant 0 : index
    %c0_63 = arith.constant 0 : index
    %136 = vector.load %arg5[%c1_61, %c0_62, %c0_63] : memref<2x1x32xf32, #tpu.memory_space<vmem>>, vector<1x1x32xf32>
    %137 = vector.shape_cast %136 : vector<1x1x32xf32> to vector<1x32xf32>
    %c8_i32 = arith.constant 8 : i32
    %138 = tpu.dynamic_rotate %133 by %c8_i32 dim 0 : vector<64x32xf32>, i32 -> vector<64x32xf32>
    %c8_i32_64 = arith.constant 8 : i32
    %139 = vector.broadcast %c8_i32_64 : i32 to vector<64x1xi32>
    %140 = arith.cmpi sge, %17, %139 : vector<64x1xi32>
    %cst_65 = arith.constant 0.000000e+00 : f32
    %141 = vector.shape_cast %140 : vector<64x1xi1> to vector<64x1xi1>
    %142 = vector.broadcast %141 : vector<64x1xi1> to vector<64x32xi1>
    %143 = vector.broadcast %cst_65 : f32 to vector<64x32xf32>
    %144 = arith.select %142, %138, %143 : vector<64x32xi1>, vector<64x32xf32>
    %c4_i32_66 = arith.constant 4 : i32
    %145 = tpu.dynamic_rotate %133 by %c4_i32_66 dim 0 : vector<64x32xf32>, i32 -> vector<64x32xf32>
    %c4_i32_67 = arith.constant 4 : i32
    %146 = vector.broadcast %c4_i32_67 : i32 to vector<64x1xi32>
    %147 = arith.cmpi sge, %17, %146 : vector<64x1xi32>
    %cst_68 = arith.constant 0.000000e+00 : f32
    %148 = vector.shape_cast %147 : vector<64x1xi1> to vector<64x1xi1>
    %149 = vector.broadcast %148 : vector<64x1xi1> to vector<64x32xi1>
    %150 = vector.broadcast %cst_68 : f32 to vector<64x32xf32>
    %151 = arith.select %149, %145, %150 : vector<64x32xi1>, vector<64x32xf32>
    %152 = tpu.concatenate %144, %151, %133 in 1 : vector<64x32xf32>, vector<64x32xf32>, vector<64x32xf32> -> vector<64x96xf32>
    %153 = arith.truncf %152 : vector<64x96xf32> to vector<64x96xbf16>
    %cst_69 = arith.constant dense<0.000000e+00> : vector<64x32xf32>
    %154 = tpu.matmul %153, %135, %cst_69 {dimension_numbers = #tpu.dot_dimension_numbers<[1], [0], [0], [1], [0, 0, 1, 1], [], []>} : vector<64x96xbf16>, vector<96x32xbf16>, vector<64x32xf32> -> vector<64x32xf32>
    %155 = vector.broadcast %137 : vector<1x32xf32> to vector<64x32xf32>
    %156 = arith.addf %154, %155 : vector<64x32xf32>
    %c1_70 = arith.constant 1 : index
    %c0_71 = arith.constant 0 : index
    %c0_72 = arith.constant 0 : index
    %157 = vector.load %arg6[%c1_70, %c0_71, %c0_72] : memref<2x1x32xf32, #tpu.memory_space<vmem>>, vector<1x1x32xf32>
    %158 = vector.shape_cast %157 : vector<1x1x32xf32> to vector<1x32xf32>
    %c1_73 = arith.constant 1 : index
    %c0_74 = arith.constant 0 : index
    %c0_75 = arith.constant 0 : index
    %159 = vector.load %arg7[%c1_73, %c0_74, %c0_75] : memref<2x1x32xf32, #tpu.memory_space<vmem>>, vector<1x1x32xf32>
    %160 = vector.shape_cast %159 : vector<1x1x32xf32> to vector<1x32xf32>
    %cst_76 = arith.constant dense<0.000000e+00> : vector<64xf32>
    %161 = vector.multi_reduction <add>, %156, %cst_76 [1] : vector<64x32xf32> to vector<64xf32>
    %162 = vector.shape_cast %161 : vector<64xf32> to vector<64x1xf32>
    %cst_77 = arith.constant 3.125000e-02 : f32
    %163 = vector.broadcast %cst_77 : f32 to vector<64x1xf32>
    %164 = arith.mulf %162, %163 : vector<64x1xf32>
    %165 = arith.mulf %156, %156 : vector<64x32xf32>
    %cst_78 = arith.constant dense<0.000000e+00> : vector<64xf32>
    %166 = vector.multi_reduction <add>, %165, %cst_78 [1] : vector<64x32xf32> to vector<64xf32>
    %167 = vector.shape_cast %166 : vector<64xf32> to vector<64x1xf32>
    %cst_79 = arith.constant 3.125000e-02 : f32
    %168 = vector.broadcast %cst_79 : f32 to vector<64x1xf32>
    %169 = arith.mulf %167, %168 : vector<64x1xf32>
    %170 = arith.mulf %164, %164 : vector<64x1xf32>
    %171 = arith.subf %169, %170 : vector<64x1xf32>
    %cst_80 = arith.constant 0.000000e+00 : f32
    %172 = vector.broadcast %cst_80 : f32 to vector<64x1xf32>
    %173 = arith.maximumf %171, %172 : vector<64x1xf32>
    %174 = vector.broadcast %164 : vector<64x1xf32> to vector<64x32xf32>
    %175 = arith.subf %156, %174 : vector<64x32xf32>
    %cst_81 = arith.constant 9.99999993E-9 : f32
    %176 = vector.broadcast %cst_81 : f32 to vector<64x1xf32>
    %177 = arith.addf %173, %176 : vector<64x1xf32>
    %178 = math.rsqrt %177 : vector<64x1xf32>
    %179 = vector.broadcast %178 : vector<64x1xf32> to vector<64x32xf32>
    %180 = arith.mulf %175, %179 : vector<64x32xf32>
    %181 = vector.broadcast %158 : vector<1x32xf32> to vector<64x32xf32>
    %182 = arith.mulf %180, %181 : vector<64x32xf32>
    %183 = vector.broadcast %160 : vector<1x32xf32> to vector<64x32xf32>
    %184 = arith.addf %182, %183 : vector<64x32xf32>
    %cst_82 = arith.constant 0.000000e+00 : f32
    %185 = vector.broadcast %cst_82 : f32 to vector<64x32xf32>
    %186 = arith.maximumf %184, %185 : vector<64x32xf32>
    %c1_83 = arith.constant 1 : index
    %c0_84 = arith.constant 0 : index
    %c0_85 = arith.constant 0 : index
    %187 = vector.load %arg8[%c1_83, %c0_84, %c0_85] : memref<2x96x32xbf16, #tpu.memory_space<vmem>>, vector<1x96x32xbf16>
    %188 = vector.shape_cast %187 : vector<1x96x32xbf16> to vector<96x32xbf16>
    %c1_86 = arith.constant 1 : index
    %c0_87 = arith.constant 0 : index
    %c0_88 = arith.constant 0 : index
    %189 = vector.load %arg9[%c1_86, %c0_87, %c0_88] : memref<2x1x32xf32, #tpu.memory_space<vmem>>, vector<1x1x32xf32>
    %190 = vector.shape_cast %189 : vector<1x1x32xf32> to vector<1x32xf32>
    %c16_i32 = arith.constant 16 : i32
    %191 = tpu.dynamic_rotate %186 by %c16_i32 dim 0 : vector<64x32xf32>, i32 -> vector<64x32xf32>
    %c16_i32_89 = arith.constant 16 : i32
    %192 = vector.broadcast %c16_i32_89 : i32 to vector<64x1xi32>
    %193 = arith.cmpi sge, %17, %192 : vector<64x1xi32>
    %cst_90 = arith.constant 0.000000e+00 : f32
    %194 = vector.shape_cast %193 : vector<64x1xi1> to vector<64x1xi1>
    %195 = vector.broadcast %194 : vector<64x1xi1> to vector<64x32xi1>
    %196 = vector.broadcast %cst_90 : f32 to vector<64x32xf32>
    %197 = arith.select %195, %191, %196 : vector<64x32xi1>, vector<64x32xf32>
    %c8_i32_91 = arith.constant 8 : i32
    %198 = tpu.dynamic_rotate %186 by %c8_i32_91 dim 0 : vector<64x32xf32>, i32 -> vector<64x32xf32>
    %c8_i32_92 = arith.constant 8 : i32
    %199 = vector.broadcast %c8_i32_92 : i32 to vector<64x1xi32>
    %200 = arith.cmpi sge, %17, %199 : vector<64x1xi32>
    %cst_93 = arith.constant 0.000000e+00 : f32
    %201 = vector.shape_cast %200 : vector<64x1xi1> to vector<64x1xi1>
    %202 = vector.broadcast %201 : vector<64x1xi1> to vector<64x32xi1>
    %203 = vector.broadcast %cst_93 : f32 to vector<64x32xf32>
    %204 = arith.select %202, %198, %203 : vector<64x32xi1>, vector<64x32xf32>
    %205 = tpu.concatenate %197, %204, %186 in 1 : vector<64x32xf32>, vector<64x32xf32>, vector<64x32xf32> -> vector<64x96xf32>
    %206 = arith.truncf %205 : vector<64x96xf32> to vector<64x96xbf16>
    %cst_94 = arith.constant dense<0.000000e+00> : vector<64x32xf32>
    %207 = tpu.matmul %206, %188, %cst_94 {dimension_numbers = #tpu.dot_dimension_numbers<[1], [0], [0], [1], [0, 0, 1, 1], [], []>} : vector<64x96xbf16>, vector<96x32xbf16>, vector<64x32xf32> -> vector<64x32xf32>
    %208 = vector.broadcast %190 : vector<1x32xf32> to vector<64x32xf32>
    %209 = arith.addf %207, %208 : vector<64x32xf32>
    %c1_95 = arith.constant 1 : index
    %c0_96 = arith.constant 0 : index
    %c0_97 = arith.constant 0 : index
    %210 = vector.load %arg10[%c1_95, %c0_96, %c0_97] : memref<2x1x32xf32, #tpu.memory_space<vmem>>, vector<1x1x32xf32>
    %211 = vector.shape_cast %210 : vector<1x1x32xf32> to vector<1x32xf32>
    %c1_98 = arith.constant 1 : index
    %c0_99 = arith.constant 0 : index
    %c0_100 = arith.constant 0 : index
    %212 = vector.load %arg11[%c1_98, %c0_99, %c0_100] : memref<2x1x32xf32, #tpu.memory_space<vmem>>, vector<1x1x32xf32>
    %213 = vector.shape_cast %212 : vector<1x1x32xf32> to vector<1x32xf32>
    %cst_101 = arith.constant dense<0.000000e+00> : vector<64xf32>
    %214 = vector.multi_reduction <add>, %209, %cst_101 [1] : vector<64x32xf32> to vector<64xf32>
    %215 = vector.shape_cast %214 : vector<64xf32> to vector<64x1xf32>
    %cst_102 = arith.constant 3.125000e-02 : f32
    %216 = vector.broadcast %cst_102 : f32 to vector<64x1xf32>
    %217 = arith.mulf %215, %216 : vector<64x1xf32>
    %218 = arith.mulf %209, %209 : vector<64x32xf32>
    %cst_103 = arith.constant dense<0.000000e+00> : vector<64xf32>
    %219 = vector.multi_reduction <add>, %218, %cst_103 [1] : vector<64x32xf32> to vector<64xf32>
    %220 = vector.shape_cast %219 : vector<64xf32> to vector<64x1xf32>
    %cst_104 = arith.constant 3.125000e-02 : f32
    %221 = vector.broadcast %cst_104 : f32 to vector<64x1xf32>
    %222 = arith.mulf %220, %221 : vector<64x1xf32>
    %223 = arith.mulf %217, %217 : vector<64x1xf32>
    %224 = arith.subf %222, %223 : vector<64x1xf32>
    %cst_105 = arith.constant 0.000000e+00 : f32
    %225 = vector.broadcast %cst_105 : f32 to vector<64x1xf32>
    %226 = arith.maximumf %224, %225 : vector<64x1xf32>
    %227 = vector.broadcast %217 : vector<64x1xf32> to vector<64x32xf32>
    %228 = arith.subf %209, %227 : vector<64x32xf32>
    %cst_106 = arith.constant 9.99999993E-9 : f32
    %229 = vector.broadcast %cst_106 : f32 to vector<64x1xf32>
    %230 = arith.addf %226, %229 : vector<64x1xf32>
    %231 = math.rsqrt %230 : vector<64x1xf32>
    %232 = vector.broadcast %231 : vector<64x1xf32> to vector<64x32xf32>
    %233 = arith.mulf %228, %232 : vector<64x32xf32>
    %234 = vector.broadcast %211 : vector<1x32xf32> to vector<64x32xf32>
    %235 = arith.mulf %233, %234 : vector<64x32xf32>
    %236 = vector.broadcast %213 : vector<1x32xf32> to vector<64x32xf32>
    %237 = arith.addf %235, %236 : vector<64x32xf32>
    %cst_107 = arith.constant 0.000000e+00 : f32
    %238 = vector.broadcast %cst_107 : f32 to vector<64x32xf32>
    %239 = arith.maximumf %237, %238 : vector<64x32xf32>
    %c1_108 = arith.constant 1 : index
    %240 = memref.load %arg12[%c1_108] : memref<2xf32, #tpu.memory_space<smem>>
    %241 = vector.broadcast %240 : f32 to vector<64x32xf32>
    %242 = arith.mulf %241, %239 : vector<64x32xf32>
    %243 = arith.addf %242, %133 : vector<64x32xf32>
    %244 = arith.truncf %243 : vector<64x32xf32> to vector<64x32xbf16>
    %c0_109 = arith.constant 0 : index
    %c0_110 = arith.constant 0 : index
    %245 = vector.load %arg13[%c0_109, %c0_110] : memref<32x32xbf16, #tpu.memory_space<vmem>>, vector<32x32xbf16>
    %cst_111 = arith.constant dense<0.000000e+00> : vector<64x32xf32>
    %246 = tpu.matmul %244, %245, %cst_111 {dimension_numbers = #tpu.dot_dimension_numbers<[1], [0], [0], [1], [0, 0, 1, 1], [], []>} : vector<64x32xbf16>, vector<32x32xbf16>, vector<64x32xf32> -> vector<64x32xf32>
    %c0_112 = arith.constant 0 : index
    %c0_113 = arith.constant 0 : index
    %247 = vector.load %arg14[%c0_112, %c0_113] : memref<1x32xf32, #tpu.memory_space<vmem>>, vector<1x32xf32>
    %248 = vector.broadcast %247 : vector<1x32xf32> to vector<64x32xf32>
    %249 = arith.addf %246, %248 : vector<64x32xf32>
    %c0_114 = arith.constant 0 : index
    %c0_115 = arith.constant 0 : index
    %250 = vector.load %arg15[%c0_114, %c0_115] : memref<64x32xf32, #tpu.memory_space<vmem>>, vector<64x32xf32>
    tpu.vector_store %arg15[%c0_114, %c0_115], %249 {strides = array<i32>} : memref<64x32xf32, #tpu.memory_space<vmem>>, vector<64x32xf32>,
    return
  }
  func.func @transform_0(%arg0: i32) -> (i32, i32) {
    %c0_i32 = arith.constant 0 : i32
    %c0_i32_0 = arith.constant 0 : i32
    return %arg0, %c0_i32 : i32, i32
  }
  func.func @transform_1(%arg0: i32) -> (i32, i32) {
    %c0_i32 = arith.constant 0 : i32
    %c0_i32_0 = arith.constant 0 : i32
    %c0_i32_1 = arith.constant 0 : i32
    return %c0_i32, %c0_i32_0 : i32, i32
  }
  func.func @transform_2(%arg0: i32) -> (i32, i32) {
    %c0_i32 = arith.constant 0 : i32
    %c0_i32_0 = arith.constant 0 : i32
    %c0_i32_1 = arith.constant 0 : i32
    return %c0_i32, %c0_i32_0 : i32, i32
  }
  func.func @transform_3(%arg0: i32) -> (i32, i32, i32) {
    %c0_i32 = arith.constant 0 : i32
    %c0_i32_0 = arith.constant 0 : i32
    %c0_i32_1 = arith.constant 0 : i32
    %c0_i32_2 = arith.constant 0 : i32
    return %c0_i32, %c0_i32_0, %c0_i32_1 : i32, i32, i32
  }
  func.func @transform_4(%arg0: i32) -> (i32, i32, i32) {
    %c0_i32 = arith.constant 0 : i32
    %c0_i32_0 = arith.constant 0 : i32
    %c0_i32_1 = arith.constant 0 : i32
    %c0_i32_2 = arith.constant 0 : i32
    return %c0_i32, %c0_i32_0, %c0_i32_1 : i32, i32, i32
  }
  func.func @transform_5(%arg0: i32) -> (i32, i32, i32) {
    %c0_i32 = arith.constant 0 : i32
    %c0_i32_0 = arith.constant 0 : i32
    %c0_i32_1 = arith.constant 0 : i32
    %c0_i32_2 = arith.constant 0 : i32
    return %c0_i32, %c0_i32_0, %c0_i32_1 : i32, i32, i32
  }
  func.func @transform_6(%arg0: i32) -> (i32, i32, i32) {
    %c0_i32 = arith.constant 0 : i32
    %c0_i32_0 = arith.constant 0 : i32
    %c0_i32_1 = arith.constant 0 : i32
    %c0_i32_2 = arith.constant 0 : i32
    return %c0_i32, %c0_i32_0, %c0_i32_1 : i32, i32, i32
  }
  func.func @transform_7(%arg0: i32) -> (i32, i32, i32) {
    %c0_i32 = arith.constant 0 : i32
    %c0_i32_0 = arith.constant 0 : i32
    %c0_i32_1 = arith.constant 0 : i32
    %c0_i32_2 = arith.constant 0 : i32
    return %c0_i32, %c0_i32_0, %c0_i32_1 : i32, i32, i32
  }
  func.func @transform_8(%arg0: i32) -> (i32, i32, i32) {
    %c0_i32 = arith.constant 0 : i32
    %c0_i32_0 = arith.constant 0 : i32
    %c0_i32_1 = arith.constant 0 : i32
    %c0_i32_2 = arith.constant 0 : i32
    return %c0_i32, %c0_i32_0, %c0_i32_1 : i32, i32, i32
  }
  func.func @transform_9(%arg0: i32) -> (i32, i32, i32) {
    %c0_i32 = arith.constant 0 : i32
    %c0_i32_0 = arith.constant 0 : i32
    %c0_i32_1 = arith.constant 0 : i32
    %c0_i32_2 = arith.constant 0 : i32
    return %c0_i32, %c0_i32_0, %c0_i32_1 : i32, i32, i32
  }
  func.func @transform_10(%arg0: i32) -> (i32, i32, i32) {
    %c0_i32 = arith.constant 0 : i32
    %c0_i32_0 = arith.constant 0 : i32
    %c0_i32_1 = arith.constant 0 : i32
    %c0_i32_2 = arith.constant 0 : i32
    return %c0_i32, %c0_i32_0, %c0_i32_1 : i32, i32, i32
  }
  func.func @transform_11(%arg0: i32) -> i32 {
    %c0_i32 = arith.constant 0 : i32
    %c0_i32_0 = arith.constant 0 : i32
    return %c0_i32 : i32
  }
  func.func @transform_12(%arg0: i32) -> (i32, i32) {
    %c0_i32 = arith.constant 0 : i32
    %c0_i32_0 = arith.constant 0 : i32
    %c0_i32_1 = arith.constant 0 : i32
    return %c0_i32, %c0_i32_0 : i32, i32
  }
  func.func @transform_13(%arg0: i32) -> (i32, i32) {
    %c0_i32 = arith.constant 0 : i32
    %c0_i32_0 = arith.constant 0 : i32
    %c0_i32_1 = arith.constant 0 : i32
    return %c0_i32, %c0_i32_0 : i32, i32
  }
  func.func @transform_14(%arg0: i32) -> (i32, i32) {
    %c0_i32 = arith.constant 0 : i32
    %c0_i32_0 = arith.constant 0 : i32
    return %arg0, %c0_i32 : i32, i32
  }
}

</mosaic_0001>

<bundles_post_ra>
// kernel: tpu_custom_call.1
= control target key start
LH: loop header
LB: loop body
LE: loop exit
PB: predicated region body
PF: predicated region fallthrough
CT: control target
= control target key end

     0   :  { %19 = vsyncpa [#allocation3], 0  ;;  %s3316_s29 = smov 0   ;;  %s4394_s0 = inlined_call_operand.vmem [shape: f32[128,8], index: 0, kind: input, shape index: {}]   ;;  %s4395_s1 = inlined_call_operand.vmem [shape: bf16[8,32], index: 1, kind: input, shape index: {}]   ;;  %s4396_s2 = inlined_call_operand.vmem [shape: f32[1,32], index: 2, kind: input, shape index: {}]   ;;  %s4397_s3 = inlined_call_operand.vmem [shape: bf16[2,96,32], index: 3, kind: input, shape index: {}]   ;;  %s4398_s4 = inlined_call_operand.vmem [shape: f32[2,1,32], index: 4, kind: input, shape index: {}]   ;;  %s4399_s5 = inlined_call_operand.vmem [shape: f32[2,1,32], index: 5, kind: input, shape index: {}]   ;;  %s4400_s6 = inlined_call_operand.vmem [shape: f32[2,1,32], index: 6, kind: input, shape index: {}]   ;;  %s4401_s7 = inlined_call_operand.vmem [shape: bf16[2,96,32], index: 7, kind: input, shape index: {}]   ;;  %s4402_s8 = inlined_call_operand.vmem [shape: f32[2,1,32], index: 8, kind: input, shape index: {}]   ;;  %s4403_s9 = inlined_call_operand.vmem [shape: f32[2,1,32], index: 9, kind: input, shape index: {}]   ;;  %s4404_s10 = inlined_call_operand.vmem [shape: f32[2,1,32], index: 10, kind: input, shape index: {}]   ;;  %s4405_s11 = inlined_call_operand.vmem [shape: f32[2], index: 11, kind: input, shape index: {}]   ;;  %s4406_s12 = inlined_call_operand.vmem [shape: bf16[32,32], index: 12, kind: input, shape index: {}]   ;;  %s4407_s13 = inlined_call_operand.vmem [shape: f32[1,32], index: 13, kind: input, shape index: {}]   ;;  %s4408_s14 = inlined_call_operand.vmem [shape: f32[128,32], index: 14, kind: output, shape index: {}]  }
   0x1 LB: > { %s2745_s30 = sadd.s32 4294967295, %s3235_s29   ;;  %p2747_p0 = scmp.ge.s32.totalorder %s3235_s29, 1  ;;  %s3235_s29 = sphi %s3316_s29, %s25_s29  }
   0x2   : > { %p355_p1 = scmp.lt.s32.totalorder %s3235_s29, 3  ;;  %s397_s17 = sshll.u32 %s4405_s11, 4  ;;  %s398_s17 = int_to_ptr.vmem [resolvable:$true] %s397_s17 }
   0x3   : > { %p2958_p3 = scmp.eq.s32.totalorder %s2745_s30, 0  ;;  %s3237_s18 = smov [#allocation2]  }
   0x4   : > { %p356_p2 = pnand %p2747_p0, %p355_p1 }
   0x6   : > { %p2954_p4 = pneg %p356_p2  ;;  %425 = sbr.rel (%p356_p2) target bundleno = 2125 (0x84d), region = 76 }
   0x8   : > { %p2955_p5 = pnand %p2958_p3, %p2954_p4 }
   0xa   : > { %2957 = dma.vmem_to_smem (!%p2955_p5), %s398_s17, 16, %s3237_s18, [#allocation3]  }
   0xb   : > { %3230 = dma.done.wait (%p2958_p3), [#allocation3], 16  }
   0xc   : > { %3232 = vsyncadd (%p2958_p3), [#allocation3], 4294967280 }
   0xd   : > { %432 = sfence }
   0xe   : > { %v603_v0 = vld [vmem:[%s4395_s1] sm:$0xf]  ;;  %vm621_vm0 = vcmask 1043456   ;;  %s2752_s21 = sshll.u32 %s2745_s30, 3  ;;  %vm608_vm1 = vcmask 64512   ;;  %v494_v17 = vlaneseq  ;;  %v2922_v27 = vld [vmem:[%s4397_s3 + $0x28] sm:$0xff] }
   0xf   : > { %v623_v1 = vsel %vm621_vm0, %v603_v0, 0  ;;  %p474_p6 = scmp.lt.s32.totalorder %s2752_s21, 15  ;;  %v3132_v22 = vld [vmem:[%s4396_s2] ss:$0 sm:$0xff]  ;;  %905 = vmatpush.bf16.msra.mxu1 %v2922_v27  ;;  %2944 = vmatpush.bf16.msra.mxu2 %v2922_v27  ;;  %v2920_v37 = vld [vmem:[%s4397_s3 + $0x18] sm:$0xff]  ;;  %s3238_s19 = smov 32  }
  0x10   : > { %632 = vmatpush.bf16.msra.mxu0 %v623_v1  ;;  %2943 = vmatpush.bf16.msra.mxu3 %v623_v1  ;;  %v3338_v20 = vshrl.u32 %v494_v17, 7  ;;  %v2921_v30 = vld [vmem:[%s4397_s3 + $0x20] sm:$0xff]  ;;  %s3239_s20 = smov 64   ;;  %v2919_v1 = vld [vmem:[%s4397_s3 + $0x10] sm:$0xff]  ;;  %vm829_vm7 = vcmask 261120   ;;  %vm838_vm8 = vcmask 523264  }
  0x11   : > { %s4410_s21 = smov (!%p474_p6, %s2752_s21), 15  ;;  %vm890_vm9 = vcmask 785408   ;;  %s1646_s16 = sld [smem:[#allocation2]] }
  0x12   : > { %s2753_s22 = sshll.u32 %s4410_s21, 3  ;;  %v499_v21 = vadd.s32 32, %v3338_v20  ;;  %vm724_vm3 = vcmp.lt.s32.totalorder %v3338_v20, 1  ;;  %v3377_v41 = vand.u32 31, %v3338_v20  ;;  %vm675_vm5 = vcmp.lt.s32.totalorder %v3338_v20, 2 }
  0x13   : > { %s477_s25 = scalar_lea.vmem %s4394_s0, %s2753_s22  ;;  %906 = vmatpush.bf16.msra.mxu1 %v2921_v30  ;;  %2945 = vmatpush.bf16.msra.mxu2 %v2921_v30  ;;  %s483_s30 = scalar_lea.vmem %s4408_s14, %s2753_s22 }
  0x14   : > { %v486_v2 = vld [vmem:[%s477_s25] sm:$0xff]  ;;  %v487_v3 = vld [vmem:[%s477_s25 + $0x8] sm:$0xff]  ;;  %v488_v8 = vld [vmem:[%s477_s25 + $0x10] sm:$0xff]  ;;  %v3348_v26 = vand.u32 31, %v499_v21  ;;  %vm733_vm4 = vcmp.ge.s32.totalorder %v3377_v41, 1  ;;  %vm684_vm6 = vcmp.ge.s32.totalorder %v3377_v41, 2 }
  0x15   : > { %v490_v4 = vld [vmem:[%s477_s25 + $0x20] sm:$0xff]  ;;  %v599_v5 = vpack.c.bf16 %v487_v3, %v486_v2  ;;  %v491_v6 = vld [vmem:[%s477_s25 + $0x28] sm:$0xff]  ;;  %v489_v9 = vld [vmem:[%s477_s25 + $0x18] sm:$0xff] }
  0x16   : > { %v601_v7 = vpack.c.bf16 %v491_v6, %v490_v4  ;;  %v492_v10 = vld [vmem:[%s477_s25 + $0x30] sm:$0xff]  ;;  %v493_v11 = vld [vmem:[%s477_s25 + $0x38] sm:$0xff]  ;;  %v600_v12 = vpack.c.bf16 %v489_v9, %v488_v8  ;;  %vm737_vm2 = vcmp.ge.s32.totalorder %v3348_v26, 1  ;;  %v2918_v2 = vld [vmem:[%s4397_s3 + $0x8] sm:$0xff]  ;;  %vm688_vm10 = vcmp.ge.s32.totalorder %v3348_v26, 2  ;;  %s2902_s25 = sld [smem:[#allocation2 + $0x1]] }
  0x17   : > { %2756 = vmatmul.msk.bf16.vlgmr.msra.gmra.mxu0 %vm608_vm1, %v599_v5  ;;  %v602_v13 = vpack.c.bf16 %v493_v11, %v492_v10  ;;  %907 = vmatpush.bf16.msra.mxu1 %v2920_v37  ;;  %v2917_v3 = vld [vmem:[%s4397_s3] sm:$0xff] }
  0x18   : > { %2758 = vmatmul.msk.bf16.vlgmr.msra.gmra.mxu3 %vm608_vm1, %v601_v7  ;;  %2946 = vmatpush.bf16.msra.mxu2 %v2920_v37 }
  0x1b   : > { %908 = vmatpush.bf16.msra.mxu1 %v2919_v1 }
  0x1c   : > { %2947 = vmatpush.bf16.msra.mxu2 %v2919_v1 }
  0x1f   : > { %909 = vmatpush.bf16.msra.mxu1 %v2918_v2 }
  0x20   : > { %2948 = vmatpush.bf16.msra.mxu2 %v2918_v2 }
  0x23   : > { %910 = vmatpush.bf16.msra.mxu1 %v2917_v3 }
  0x24   : > { %2949 = vmatpush.bf16.msra.mxu2 %v2917_v3 }
  0x27   : > { %2757 = vmatmul.msk.bf16.gmra.mxu0 %vm608_vm1, %v600_v12 }
  0x28   : > { %2759 = vmatmul.msk.bf16.gmra.mxu3 %vm608_vm1, %v602_v13 }
  0x94   : > { %v634_v14 = vpop.f32.mrf.mxu0 }
  0x95   : > { %v3372_v38 = vadd.f32 %v3132_v22, %v634_v14 }
  0x97   : > { %v716_v48 = vrot.slane %v3372_v38, 7  ;;  %v667_v6 = vrot.slane %v3372_v38, 6 }
  0x9b   : > { %v644_v15 = vpop.f32.mrf.mxu3 }
  0x9c   : > { %v636_v16 = vpop.f32.mrf.mxu0  ;;  %v3344_v23 = vadd.f32 %v3132_v22, %v644_v15 }
  0x9d   : > { %v3365_v35 = vadd.f32 %v3132_v22, %v636_v16 }
  0x9e   : > { %v720_v31 = vrot.slane %v3344_v23, 7  ;;  %v671_v27 = vrot.slane %v3344_v23, 6 }
  0x9f   : > { %v717_v46 = vrot.slane %v3365_v35, 7  ;;  %v2997_v61 = vpack.i.bf16 %v3365_v35, %v3372_v38  ;;  %v668_v7 = vrot.slane %v3365_v35, 6 }
  0xa1   : > { %v731_v53 = vsel %vm724_vm3, %v716_v48, %v717_v46  ;;  %v682_v12 = vsel %vm675_vm5, %v667_v6, %v668_v7 }
  0xa3   : > { %v646_v18 = vpop.f32.mrf.mxu3 }
  0xa4   : > { %v639_v19 = vpop.f32.mrf.mxu0  ;;  %v3346_v24 = vadd.f32 %v3132_v22, %v646_v18 }
  0xa5   : > { %v3395_v55 = vadd.f32 %v3132_v22, %v639_v19 }
  0xa6   : > { %v721_v32 = vrot.slane %v3346_v24, 7  ;;  %v2977_v57 = vpack.i.bf16 %v3346_v24, %v3344_v23 }
  0xa7   : > { %v718_v58 = vrot.slane %v3395_v55, 7 }
  0xa8   : > { %v727_v39 = vsel %vm724_vm3, %v720_v31, %v721_v32 }
  0xa9   : > { %v730_v62 = vsel %vm724_vm3, %v717_v46, %v718_v58 }
  0xab   : > { %v649_v25 = vpop.f32.mrf.mxu3 }
  0xac   : > { %v641_v28 = vpop.f32.mrf.mxu0  ;;  %v3362_v34 = vadd.f32 %v3132_v22, %v649_v25 }
  0xad   : > { %v3353_v29 = vadd.f32 %v3132_v22, %v641_v28  ;;  %v672_v28 = vrot.slane %v3346_v24, 6 }
  0xae   : > { %v722_v45 = vrot.slane %v3362_v34, 7 }
  0xaf   : > { %v719_v33 = vrot.slane %v3353_v29, 7  ;;  %v3007_v0 = vpack.i.bf16 %v3353_v29, %v3395_v55  ;;  %v670_v25 = vrot.slane %v3353_v29, 6  ;;  %v678_v37 = vsel %vm675_vm5, %v671_v27, %v672_v28 }
  0xb0   : > { %v726_v50 = vsel %vm724_vm3, %v721_v32, %v722_v45 }
  0xb1   : > { %v728_v36 = vsel %vm724_vm3, %v719_v33, %v720_v31  ;;  %v729_v59 = vsel %vm724_vm3, %v718_v58, %v719_v33  ;;  %v679_v32 = vsel %vm675_vm5, %v670_v25, %v671_v27 }
  0xb2   : > { %v761_v40 = vsel %vm737_vm2, %v728_v36, 0.0  ;;  %v3002_v63 = vpack.i.bf16 %v729_v59, %v730_v62 }
  0xb3   : > { %v651_v42 = vpop.f32.mrf.mxu3  ;;  %v2972_v43 = vpack.i.bf16 %v727_v39, %v761_v40  ;;  %v712_v39 = vsel %vm688_vm10, %v679_v32, 0.0 }
  0xb4   : > { %v3379_v44 = vadd.f32 %v3132_v22, %v651_v42 }
  0xb5   : > { %2973 = vrot.lane.b32.xlu0 %v2972_v43, %s3238_s19 }
  0xb6   : > { %v723_v47 = vrot.slane %v3379_v44, 7  ;;  %v2987_v60 = vpack.i.bf16 %v3379_v44, %v3362_v34  ;;  %v674_v5 = vrot.slane %v3379_v44, 6 }
  0xb8   : > { %v725_v49 = vsel %vm724_vm3, %v722_v45, %v723_v47  ;;  %v732_v51 = vsel %vm724_vm3, %v723_v47, %v716_v48  ;;  %v683_v10 = vsel %vm675_vm5, %v674_v5, %v667_v6 }
  0xb9   : > { %v2982_v52 = vpack.i.bf16 %v725_v49, %v726_v50  ;;  %v757_v54 = vsel %vm733_vm4, %v732_v51, 0.0  ;;  %v708_v13 = vsel %vm684_vm6, %v683_v10, 0.0  ;;  %v669_v51 = vrot.slane %v3395_v55, 6 }
  0xba   : > { %v2992_v56 = vpack.i.bf16 %v731_v53, %v757_v54  ;;  %vm1185_vm4 = vcmp.lt.s32.totalorder %v3338_v20, 4  ;;  %v2929_v20 = vld [vmem:[%s4397_s3 + $0x30] sm:$0xff] }
  0xbb   : > { %2983 = vrot.lane.b32.xlu1 %v2982_v52, %s3238_s19  ;;  %v673_v52 = vrot.slane %v3362_v34, 6 }
  0xbc   : > { %2993 = vrot.lane.b32.xlu2 %v2992_v56, %s3238_s19 }
  0xbd   : > { %2978 = vrot.lane.b32.xlu0 %v2977_v57, %s3239_s20 }
  0xc3   : > { %2988 = vrot.lane.b32.xlu1 %v2987_v60, %s3239_s20  ;;  %v677_v60 = vsel %vm675_vm5, %v672_v28, %v673_v52 }
  0xc4   : > { %2998 = vrot.lane.b32.xlu2 %v2997_v61, %s3239_s20  ;;  %v681_v61 = vsel %vm675_vm5, %v668_v7, %v669_v51 }
  0xc5   : > { %3003 = vrot.lane.b32.xlu0 %v3002_v63, %s3238_s19  ;;  %v676_v63 = vsel %vm675_vm5, %v673_v52, %v674_v5 }
  0xcb   : > { %3008 = vrot.lane.b32.xlu1 %v3007_v0, %s3239_s20  ;;  %v680_v0 = vsel %vm675_vm5, %v669_v51, %v670_v25 }
 0x116   : > { %v2994_v4 = vpop.permute.xlu2 %2993 }
 0x117   : > { %v2996_v8 = vunpack.i.h.bf16 %v2994_v4  ;;  %v2995_v9 = vunpack.i.l.bf16 %v2994_v4 }
 0x119   : > { %v830_v16 = vsel %vm829_vm7, %v708_v13, %v2995_v9  ;;  %v831_v17 = vsel %vm829_vm7, %v682_v12, %v2996_v8  ;;  %v3133_v13 = vld [vmem:[%s4398_s4] ss:$0 sm:$0xff] }
 0x11e   : > { %v2999_v11 = vpop.permute.xlu2 %2998 }
 0x11f   : > { %v3001_v14 = vunpack.i.h.bf16 %v2999_v11  ;;  %v3000_v15 = vunpack.i.l.bf16 %v2999_v11 }
 0x121   : > { %v839_v18 = vsel %vm838_vm8, %v830_v16, %v3000_v15  ;;  %v840_v19 = vsel %vm838_vm8, %v831_v17, %v3001_v14 }
 0x122   : > { %v847_v21 = vpack.c.bf16 %v840_v19, %v839_v18 }
 0x124   : > { %2784 = vmatmul.msk.bf16.vlgmr.msra.gmra.mxu1 %vm890_vm9, %v847_v21 }
 0x127   : > { %v2974_v22 = vpop.permute.xlu0 %2973 }
 0x128   : > { %v2976_v30 = vunpack.i.h.bf16 %v2974_v22  ;;  %v2975_v31 = vunpack.i.l.bf16 %v2974_v22 }
 0x12a   : > { %v835_v43 = vsel %vm829_vm7, %v678_v37, %v2976_v30  ;;  %v834_v45 = vsel %vm829_vm7, %v712_v39, %v2975_v31 }
 0x12d   : > { %v2984_v33 = vpop.permute.xlu1 %2983 }
 0x12e   : > { %v2986_v53 = vunpack.i.h.bf16 %v2984_v33  ;;  %v2985_v54 = vunpack.i.l.bf16 %v2984_v33 }
 0x12f   : > { %v2979_v36 = vpop.permute.xlu0 %2978 }
 0x130   : > { %v2981_v40 = vunpack.i.h.bf16 %v2979_v36  ;;  %v2980_v42 = vunpack.i.l.bf16 %v2979_v36  ;;  %v837_v3 = vsel %vm829_vm7, %v676_v63, %v2986_v53  ;;  %v836_v4 = vsel %vm829_vm7, %v677_v60, %v2985_v54 }
 0x132   : > { %v843_v46 = vsel %vm838_vm8, %v834_v45, %v2980_v42  ;;  %v844_v47 = vsel %vm838_vm8, %v835_v43, %v2981_v40 }
 0x133   : > { %v849_v48 = vpack.c.bf16 %v844_v47, %v843_v46 }
 0x135   : > { %v2989_v49 = vpop.permute.xlu1 %2988  ;;  %2786 = vmatmul.msk.bf16.vlgmr.msra.gmra.mxu2 %vm890_vm9, %v849_v48 }
 0x136   : > { %v2991_v58 = vunpack.i.h.bf16 %v2989_v49  ;;  %v2990_v59 = vunpack.i.l.bf16 %v2989_v49 }
 0x137   : > { %v3004_v50 = vpop.permute.xlu0 %3003 }
 0x138   : > { %v3006_v56 = vunpack.i.h.bf16 %v3004_v50  ;;  %v3005_v57 = vunpack.i.l.bf16 %v3004_v50  ;;  %v845_v10 = vsel %vm838_vm8, %v836_v4, %v2990_v59  ;;  %v846_v5 = vsel %vm838_vm8, %v837_v3, %v2991_v58 }
 0x139   : > { %v850_v12 = vpack.c.bf16 %v846_v5, %v845_v10 }
 0x13a   : > { %v833_v6 = vsel %vm829_vm7, %v680_v0, %v3006_v56  ;;  %v832_v8 = vsel %vm829_vm7, %v681_v61, %v3005_v57 }
 0x13d   : > { %v3009_v62 = vpop.permute.xlu1 %3008 }
 0x13e   : > { %v3011_v1 = vunpack.i.h.bf16 %v3009_v62  ;;  %v3010_v2 = vunpack.i.l.bf16 %v3009_v62 }
 0x140   : > { %v841_v9 = vsel %vm838_vm8, %v832_v8, %v3010_v2  ;;  %v842_v7 = vsel %vm838_vm8, %v833_v6, %v3011_v1 }
 0x141   : > { %v848_v11 = vpack.c.bf16 %v842_v7, %v841_v9 }
 0x143   : > { %2785 = vmatmul.msk.bf16.gmra.mxu1 %vm890_vm9, %v848_v11 }
 0x145   : > { %2787 = vmatmul.msk.bf16.gmra.mxu2 %vm890_vm9, %v850_v12 }
 0x1a1   : > { %v912_v14 = vpop.f32.mrf.mxu1 }
 0x1a2   : > { %v3480_v15 = vadd.f32 %v3133_v13, %v912_v14 }
 0x1a4   : > { %v934_v16 = vsel %vm829_vm7, %v3480_v15, 0.0  ;;  %v966_v17 = vmul.f32 %v3480_v15, %v3480_v15 }
 0x1a5   : > { %935 = vadd.xlane.f32.xlu2 %v934_v16 }
 0x1a6   : > { %v974_v22 = vsel %vm829_vm7, %v966_v17, 0.0 }
 0x1a9   : > { %v914_v18 = vpop.f32.mrf.mxu1 }
 0x1aa   : > { %v3486_v19 = vadd.f32 %v3133_v13, %v914_v18 }
 0x1ac   : > { %v937_v21 = vsel %vm829_vm7, %v3486_v19, 0.0  ;;  %v967_v51 = vmul.f32 %v3486_v19, %v3486_v19 }
 0x1ad   : > { %938 = vadd.xlane.f32.xlu1 %v937_v21  ;;  %975 = vadd.xlane.f32.xlu2 %v974_v22 }
 0x1ae   : > { %v977_v53 = vsel %vm829_vm7, %v967_v51, 0.0 }
 0x1b8   : > { %v922_v25 = vpop.f32.mrf.mxu2 }
 0x1b9   : > { %v3499_v39 = vadd.f32 %v3133_v13, %v922_v25 }
 0x1bb   : > { %v970_v45 = vmul.f32 %v3499_v39, %v3499_v39  ;;  %v946_v60 = vsel %vm829_vm7, %v3499_v39, 0.0 }
 0x1bd   : > { %v986_v49 = vsel %vm829_vm7, %v970_v45, 0.0 }
 0x1c0   : > { %v917_v27 = vpop.f32.mrf.mxu1  ;;  %v924_v28 = vpop.f32.mrf.mxu2 }
 0x1c1   : > { %v3491_v30 = vadd.f32 %v3133_v13, %v917_v27  ;;  %v3525_v59 = vadd.f32 %v3133_v13, %v924_v28 }
 0x1c3   : > { %v940_v31 = vsel %vm829_vm7, %v3491_v30, 0.0  ;;  %v968_v57 = vmul.f32 %v3491_v30, %v3491_v30  ;;  %v971_v61 = vmul.f32 %v3525_v59, %v3525_v59  ;;  %v949_v62 = vsel %vm829_vm7, %v3525_v59, 0.0 }
 0x1c4   : > { %941 = vadd.xlane.f32.xlu1 %v940_v31 }
 0x1c5   : > { %v980_v58 = vsel %vm829_vm7, %v968_v57, 0.0  ;;  %v989_v63 = vsel %vm829_vm7, %v971_v61, 0.0  ;;  %v3552_v57 = vld [vmem:[%s4399_s5] ss:$0 sm:$0xff] }
 0x1c8   : > { %v919_v32 = vpop.f32.mrf.mxu1  ;;  %v927_v33 = vpop.f32.mrf.mxu2 }
 0x1c9   : > { %v3495_v36 = vadd.f32 %v3133_v13, %v919_v32  ;;  %v3510_v48 = vadd.f32 %v3133_v13, %v927_v33 }
 0x1cb   : > { %v969_v37 = vmul.f32 %v3495_v36, %v3495_v36  ;;  %v972_v52 = vmul.f32 %v3510_v48, %v3510_v48  ;;  %v943_v56 = vsel %vm829_vm7, %v3495_v36, 0.0  ;;  %v952_v0 = vsel %vm829_vm7, %v3510_v48, 0.0 }
 0x1cd   : > { %v983_v40 = vsel %vm829_vm7, %v969_v37, 0.0  ;;  %v992_v54 = vsel %vm829_vm7, %v972_v52, 0.0 }
 0x1ce   : > { %984 = vadd.xlane.f32.xlu1 %v983_v40 }
 0x1d0   : > { %v929_v42 = vpop.f32.mrf.mxu2 }
 0x1d1   : > { %v3502_v43 = vadd.f32 %v3133_v13, %v929_v42 }
 0x1d3   : > { %v955_v46 = vsel %vm829_vm7, %v3502_v43, 0.0  ;;  %v973_v47 = vmul.f32 %v3502_v43, %v3502_v43 }
 0x1d4   : > { %956 = vadd.xlane.f32.xlu0 %v955_v46 }
 0x1d5   : > { %v995_v50 = vsel %vm829_vm7, %v973_v47, 0.0 }
 0x1d6   : > { %987 = vadd.xlane.f32.xlu1 %v986_v49  ;;  %996 = vadd.xlane.f32.xlu2 %v995_v50 }
 0x1dc   : > { %978 = vadd.xlane.f32.xlu0 %v977_v53 }
 0x1de   : > { %993 = vadd.xlane.f32.xlu1 %v992_v54  ;;  %944 = vadd.xlane.f32.xlu2 %v943_v56 }
 0x1e4   : > { %981 = vadd.xlane.f32.xlu0 %v980_v58 }
 0x1e6   : > { %947 = vadd.xlane.f32.xlu2 %v946_v60 }
 0x1ec   : > { %950 = vadd.xlane.f32.xlu0 %v949_v62 }
 0x1ee   : > { %990 = vadd.xlane.f32.xlu2 %v989_v63 }
 0x1f4   : > { %953 = vadd.xlane.f32.xlu0 %v952_v0 }
 0x218   : > { %v936_v1 = vpop.xlane.xlu2 %935 }
 0x219   : > { %v958_v3 = vmul.f32 0.03125, %v936_v1 }
 0x21b   : > { %v1006_v6 = vmul.f32 %v958_v3, %v958_v3  ;;  %v1030_v50 = vsub.f32 %v3480_v15, %v958_v3  ;;  %v3564_v3 = vld [vmem:[%s4400_s6] ss:$0 sm:$0xff] }
 0x220   : > { %v976_v2 = vpop.xlane.xlu2 %975  ;;  %v939_v11 = vpop.xlane.xlu1 %938 }
 0x221   : > { %v998_v4 = vmul.f32 0.03125, %v976_v2  ;;  %v3540_v27 = vmul.f32 0.03125, %v939_v11 }
 0x223   : > { %v1014_v8 = vsub.f32 %v998_v4, %v1006_v6  ;;  %v1007_v40 = vmul.f32 %v3540_v27, %v3540_v27 }
 0x225   : > { %v1022_v9 = vmax.f32 %v1014_v8, 0.0 }
 0x227   : > { %v1038_v7 = vadd.f32 1e-08, %v1022_v9 }
 0x229   : > { %3146 = vrsqrt.f32 %v1038_v7  ;;  %vm1052_vm12 = vweird.f32 %v1038_v7 }
 0x22f   : > { %v3147_v10 = vpop.eup %3146 }
 0x230   : > { %v1047_v5 = vmul.f32 %v3147_v10, %v1038_v7  ;;  %vm1053_vm11 = vweird.f32 %v3147_v10 }
 0x231   : > { %vm1054_vm13 = vmor %vm1052_vm12, %vm1053_vm11 }
 0x232   : > { %v1048_v12 = vmul.f32 %v3147_v10, %v1047_v5 }
 0x234   : > { %v1049_v13 = vmul.f32 0.5, %v1048_v12 }
 0x236   : > { %v1050_v21 = vsub.f32 1.5, %v1049_v13 }
 0x237   : > { %v942_v14 = vpop.xlane.xlu1 %941 }
 0x238   : > { %v1051_v31 = vmul.f32 %v3147_v10, %v1050_v21  ;;  %v3547_v52 = vmul.f32 0.03125, %v942_v14 }
 0x23a   : > { %v1055_v47 = vsel %vm1054_vm13, %v3147_v10, %v1051_v31  ;;  %v1008_v63 = vmul.f32 %v3547_v52, %v3547_v52 }
 0x23b   : > { %v1126_v54 = vmul.f32 %v1055_v47, %v1030_v50 }
 0x23d   : > { %v1137_v8 = vmul.f32 %v3552_v57, %v1126_v54 }
 0x241   : > { %v985_v33 = vpop.xlane.xlu1 %984 }
 0x242   : > { %v1001_v56 = vmul.f32 0.03125, %v985_v33 }
 0x247   : > { %v957_v16 = vpop.xlane.xlu0 %956 }
 0x248   : > { %v3536_v17 = vmul.f32 0.03125, %v957_v16  ;;  %v1148_v16 = vadd.f32 %v3564_v3, %v1137_v8 }
 0x249   : > { %v997_v18 = vpop.xlane.xlu2 %996  ;;  %v988_v1 = vpop.xlane.xlu1 %987 }
 0x24a   : > { %v1013_v22 = vmul.f32 %v3536_v17, %v3536_v17  ;;  %v1005_v25 = vmul.f32 0.03125, %v997_v18  ;;  %v1002_v11 = vmul.f32 0.03125, %v988_v1  ;;  %v1037_v47 = vsub.f32 %v3502_v43, %v3536_v17 }
 0x24b   : > { %v1032_v1 = vsub.f32 %v3491_v30, %v3547_v52 }
 0x24c   : > { %v1021_v28 = vsub.f32 %v1005_v25, %v1013_v22 }
 0x24e   : > { %v1029_v32 = vmax.f32 %v1021_v28, 0.0 }
 0x24f   : > { %v979_v37 = vpop.xlane.xlu0 %978 }
 0x250   : > { %v1045_v42 = vadd.f32 1e-08, %v1029_v32  ;;  %v999_v45 = vmul.f32 0.03125, %v979_v37 }
 0x251   : > { %v945_v46 = vpop.xlane.xlu2 %944  ;;  %v994_v43 = vpop.xlane.xlu1 %993 }
 0x252   : > { %3148 = vrsqrt.f32 %v1045_v42  ;;  %v1015_v49 = vsub.f32 %v999_v45, %v1007_v40  ;;  %v3545_v51 = vmul.f32 0.03125, %v945_v46  ;;  %vm1122_vm15 = vweird.f32 %v1045_v42 }
 0x253   : > { %v3581_v46 = vmax.f32 %v1148_v16, 0.0 }
 0x254   : > { %v1023_v53 = vmax.f32 %v1015_v49, 0.0  ;;  %v1009_v58 = vmul.f32 %v3545_v51, %v3545_v51 }
 0x256   : > { %v3556_v60 = vadd.f32 1e-08, %v1023_v53  ;;  %v1017_v61 = vsub.f32 %v1001_v56, %v1009_v58 }
 0x257   : > { %v982_v62 = vpop.xlane.xlu0 %981 }
 0x258   : > { %v3149_v15 = vpop.eup %3148  ;;  %3150 = vrsqrt.f32 %v3556_v60  ;;  %v1000_v0 = vmul.f32 0.03125, %v982_v62  ;;  %v1025_v4 = vmax.f32 %v1017_v61, 0.0  ;;  %v1031_v62 = vsub.f32 %v3486_v19, %v3540_v27 }
 0x259   : > { %v1117_v2 = vmul.f32 %v3149_v15, %v1045_v42  ;;  %v948_v6 = vpop.xlane.xlu2 %947  ;;  %vm1123_vm14 = vweird.f32 %v3149_v15  ;;  %vm1062_vm2 = vweird.f32 %v3556_v60  ;;  %v1004_v27 = vmul.f32 0.03125, %v994_v43 }
 0x25a   : > { %v1016_v9 = vsub.f32 %v1000_v0, %v1008_v63  ;;  %v3567_v7 = vmul.f32 0.03125, %v948_v6  ;;  %v3569_v5 = vadd.f32 1e-08, %v1025_v4  ;;  %vm1124_vm0 = vmor %vm1122_vm15, %vm1123_vm14  ;;  %v1226_v4 = vrot.slane %v3581_v46, 6 }
 0x25b   : > { %v1118_v10 = vmul.f32 %v3149_v15, %v1117_v2 }
 0x25c   : > { %v1024_v12 = vmax.f32 %v1016_v9, 0.0  ;;  %v1010_v13 = vmul.f32 %v3567_v7, %v3567_v7  ;;  %3152 = vrsqrt.f32 %v3569_v5  ;;  %vm1082_vm12 = vweird.f32 %v3569_v5 }
 0x25d   : > { %v1119_v14 = vmul.f32 0.5, %v1118_v10 }
 0x25e   : > { %v3151_v18 = vpop.eup %3150  ;;  %v3575_v21 = vadd.f32 1e-08, %v1024_v12  ;;  %v1018_v22 = vsub.f32 %v1002_v11, %v1010_v13  ;;  %v1177_v12 = vrot.slane %v3581_v46, 4 }
 0x25f   : > { %v1120_v25 = vsub.f32 1.5, %v1119_v14  ;;  %v1057_v28 = vmul.f32 %v3151_v18, %v3556_v60  ;;  %v951_v31 = vpop.xlane.xlu0 %950  ;;  %vm1063_vm1 = vweird.f32 %v3151_v18 }
 0x260   : > { %3154 = vrsqrt.f32 %v3575_v21  ;;  %v1026_v32 = vmax.f32 %v1018_v22, 0.0  ;;  %v3579_v33 = vmul.f32 0.03125, %v951_v31  ;;  %vm1064_vm3 = vmor %vm1062_vm2, %vm1063_vm1  ;;  %vm1072_vm15 = vweird.f32 %v3575_v21 }
 0x261   : > { %v1121_v37 = vmul.f32 %v3149_v15, %v1120_v25  ;;  %v1058_v40 = vmul.f32 %v3151_v18, %v1057_v28  ;;  %v991_v45 = vpop.xlane.xlu2 %990  ;;  %v1033_v28 = vsub.f32 %v3495_v36, %v3545_v51 }
 0x262   : > { %v3585_v49 = vadd.f32 1e-08, %v1026_v32  ;;  %v1011_v50 = vmul.f32 %v3579_v33, %v3579_v33  ;;  %v1003_v53 = vmul.f32 0.03125, %v991_v45  ;;  %v3153_v54 = vpop.eup %3152 }
 0x263   : > { %v1125_v56 = vsel %vm1124_vm0, %v3149_v15, %v1121_v37  ;;  %v1059_v58 = vmul.f32 0.5, %v1058_v40  ;;  %v1077_v42 = vmul.f32 %v3153_v54, %v3569_v5  ;;  %vm1083_vm11 = vweird.f32 %v3153_v54 }
 0x264   : > { %v1133_v61 = vmul.f32 %v1125_v56, %v1037_v47  ;;  %3156 = vrsqrt.f32 %v3585_v49  ;;  %v1019_v17 = vsub.f32 %v1003_v53, %v1011_v50  ;;  %vm1084_vm13 = vmor %vm1082_vm12, %vm1083_vm11  ;;  %vm1092_vm2 = vweird.f32 %v3585_v49 }
 0x265   : > { %v1060_v63 = vsub.f32 1.5, %v1059_v58  ;;  %v1078_v15 = vmul.f32 %v3153_v54, %v1077_v42 }
 0x266   : > { %v3155_v0 = vpop.eup %3154  ;;  %v1144_v2 = vmul.f32 %v3552_v57, %v1133_v61  ;;  %v1027_v9 = vmax.f32 %v1019_v17, 0.0 }
 0x267   : > { %v1061_v6 = vmul.f32 %v3151_v18, %v1060_v63  ;;  %v1067_v8 = vmul.f32 %v3155_v0, %v3575_v21  ;;  %v954_v19 = vpop.xlane.xlu0 %953  ;;  %v1079_v10 = vmul.f32 0.5, %v1078_v15  ;;  %vm1073_vm14 = vweird.f32 %v3155_v0 }
 0x268   : > { %v3599_v11 = vmul.f32 0.03125, %v954_v19  ;;  %v3602_v13 = vadd.f32 1e-08, %v1027_v9  ;;  %v1155_v14 = vadd.f32 %v3564_v3, %v1144_v2  ;;  %vm1074_vm0 = vmor %vm1072_vm15, %vm1073_vm14 }
 0x269   : > { %v1065_v30 = vsel %vm1064_vm3, %v3151_v18, %v1061_v6  ;;  %v1068_v52 = vmul.f32 %v3155_v0, %v1067_v8  ;;  %v1080_v22 = vsub.f32 1.5, %v1079_v10  ;;  %v1034_v6 = vsub.f32 %v3499_v39, %v3567_v7 }
 0x26a   : > { %v3157_v16 = vpop.eup %3156  ;;  %v1127_v60 = vmul.f32 %v1065_v30, %v1031_v62  ;;  %v1012_v25 = vmul.f32 %v3599_v11, %v3599_v11  ;;  %3158 = vrsqrt.f32 %v3602_v13  ;;  %v3614_v50 = vmax.f32 %v1155_v14, 0.0 }
 0x26b   : > { %v1069_v31 = vmul.f32 0.5, %v1068_v52  ;;  %v1087_v18 = vmul.f32 %v3157_v16, %v3585_v49  ;;  %v1081_v32 = vmul.f32 %v3153_v54, %v1080_v22  ;;  %vm1093_vm1 = vweird.f32 %v3157_v16 }
 0x26c   : > { %v1020_v37 = vsub.f32 %v1004_v27, %v1012_v25  ;;  %v1138_v40 = vmul.f32 %v3552_v57, %v1127_v60  ;;  %v1233_v5 = vrot.slane %v3614_v50, 6  ;;  %v1184_v63 = vrot.slane %v3614_v50, 4  ;;  %vm1094_vm3 = vmor %vm1092_vm2, %vm1093_vm1 }
 0x26d   : > { %v1070_v45 = vsub.f32 1.5, %v1069_v31  ;;  %v1088_v47 = vmul.f32 %v3157_v16, %v1087_v18  ;;  %v1085_v53 = vsel %vm1084_vm13, %v3153_v54, %v1081_v32  ;;  %vm1102_vm11 = vweird.f32 %v3602_v13 }
 0x26e   : > { %v1028_v36 = vmax.f32 %v1020_v37, 0.0  ;;  %v1149_v51 = vadd.f32 %v3564_v3, %v1138_v40  ;;  %v1129_v56 = vmul.f32 %v1085_v53, %v1033_v28  ;;  %v1241_v2 = vsel %vm675_vm5, %v1233_v5, %v1226_v4 }
 0x26f   : > { %v1071_v58 = vmul.f32 %v3155_v0, %v1070_v45  ;;  %v1089_v61 = vmul.f32 0.5, %v1088_v47  ;;  %v1242_v39 = vsel %vm684_vm6, %v1241_v2, 0.0  ;;  %v3650_v49 = vsel %vm1185_vm4, %v1184_v63, %v1177_v12 }
 0x270   : > { %v3619_v42 = vadd.f32 1e-08, %v1028_v36  ;;  %v1157_v62 = vmax.f32 %v1149_v51, 0.0  ;;  %v3159_v43 = vpop.eup %3158  ;;  %v1140_v54 = vmul.f32 %v3552_v57, %v1129_v56 }
 0x271   : > { %v1075_v17 = vsel %vm1074_vm0, %v3155_v0, %v1071_v58  ;;  %v1090_v21 = vsub.f32 1.5, %v1089_v61  ;;  %v1097_v8 = vmul.f32 %v3159_v43, %v3602_v13  ;;  %v2928_v0 = vld [vmem:[%s4401_s7 + $0x28] sm:$0xff]  ;;  %vm1103_vm6 = vweird.f32 %v3159_v43 }
 0x272   : > { %v1128_v15 = vmul.f32 %v1075_v17, %v1032_v1  ;;  %3160 = vrsqrt.f32 %v3619_v42  ;;  %v1151_v9 = vadd.f32 %v3564_v3, %v1140_v54  ;;  %v3017_v27 = vpack.i.bf16 %v1157_v62, %v3581_v46  ;;  %1387 = vmatpush.bf16.msrb.mxu2 %v2928_v0  ;;  %vm1104_vm12 = vmor %vm1102_vm11, %vm1103_vm6 }
 0x273   : > { %v1091_v19 = vmul.f32 %v3157_v16, %v1090_v21  ;;  %v1098_v1 = vmul.f32 %v3159_v43, %v1097_v8  ;;  %v1227_v10 = vrot.slane %v1157_v62, 6  ;;  %v1178_v14 = vrot.slane %v1157_v62, 4 }
 0x274   : > { %v1139_v7 = vmul.f32 %v3552_v57, %v1128_v15  ;;  %3018 = vrot.lane.b32.xlu0 %v3017_v27, %s3239_s20  ;;  %v1159_v52 = vmax.f32 %v1151_v9, 0.0  ;;  %vm1112_vm14 = vweird.f32 %v3619_v42  ;;  %v1036_v27 = vsub.f32 %v3510_v48, %v3599_v11 }
 0x275   : > { %v1095_v30 = vsel %vm1094_vm3, %v3157_v16, %v1091_v19  ;;  %v1099_v22 = vmul.f32 0.5, %v1098_v1  ;;  %v1240_v25 = vsel %vm675_vm5, %v1226_v4, %v1227_v10  ;;  %v3661_v31 = vsel %vm1185_vm4, %v1177_v12, %v1178_v14 }
 0x276   : > { %v1130_v60 = vmul.f32 %v1095_v30, %v1034_v6  ;;  %v1150_v16 = vadd.f32 %v3564_v3, %v1139_v7  ;;  %v3012_v28 = vpack.i.bf16 %v1240_v25, %v1242_v39  ;;  %v1229_v4 = vrot.slane %v1159_v52, 6 }
 0x277   : > { %v1100_v37 = vsub.f32 1.5, %v1099_v22  ;;  %v1035_v12 = vsub.f32 %v3525_v59, %v3579_v33  ;;  %v1180_v56 = vrot.slane %v1159_v52, 4 }
 0x278   : > { %v3161_v18 = vpop.eup %3160  ;;  %v1141_v32 = vmul.f32 %v3552_v57, %v1130_v60  ;;  %v1158_v40 = vmax.f32 %v1150_v16, 0.0  ;;  %3013 = vrot.lane.b32.xlu2 %v3012_v28, %s3238_s19 }
 0x279   : > { %v1107_v45 = vmul.f32 %v3161_v18, %v3619_v42  ;;  %v1101_v46 = vmul.f32 %v3159_v43, %v1100_v37  ;;  %vm1113_vm13 = vweird.f32 %v3161_v18 }
 0x27a   : > { %v1152_v47 = vadd.f32 %v3564_v3, %v1141_v32  ;;  %v3027_v53 = vpack.i.bf16 %v1159_v52, %v1158_v40  ;;  %v1228_v36 = vrot.slane %v1158_v40, 6  ;;  %v1179_v58 = vrot.slane %v1158_v40, 4  ;;  %vm1114_vm15 = vmor %vm1112_vm14, %vm1113_vm13 }
 0x27b   : > { %v1108_v51 = vmul.f32 %v3161_v18, %v1107_v45  ;;  %v1105_v61 = vsel %vm1104_vm12, %v3159_v43, %v1101_v46 }
 0x27c   : > { %v1238_v13 = vsel %vm675_vm5, %v1228_v36, %v1229_v4  ;;  %v1239_v62 = vsel %vm675_vm5, %v1227_v10, %v1228_v36  ;;  %v1160_v54 = vmax.f32 %v1152_v47, 0.0  ;;  %v1131_v17 = vmul.f32 %v1105_v61, %v1035_v12  ;;  %3028 = vrot.lane.b32.xlu0 %v3027_v53, %s3239_s20  ;;  %v2923_v47 = vld [vmem:[%s4401_s7] sm:$0xff] }
 0x27d   : > { %v1109_v21 = vmul.f32 0.5, %v1108_v51  ;;  %v3022_v2 = vpack.i.bf16 %v1238_v13, %v1239_v62  ;;  %v3677_v59 = vsel %vm1185_vm4, %v1178_v14, %v1179_v58  ;;  %v3681_v43 = vsel %vm1185_vm4, %v1179_v58, %v1180_v56 }
 0x27e   : > { %v1181_v33 = vrot.slane %v1160_v54, 4  ;;  %v1142_v6 = vmul.f32 %v3552_v57, %v1131_v17  ;;  %v1230_v8 = vrot.slane %v1160_v54, 6 }
 0x27f   : > { %v1110_v15 = vsub.f32 1.5, %v1109_v21  ;;  %3023 = vrot.lane.b32.xlu1 %v3022_v2, %s3238_s19 }
 0x280   : > { %v3687_v0 = vsel %vm1185_vm4, %v1180_v56, %v1181_v33  ;;  %v1153_v19 = vadd.f32 %v3564_v3, %v1142_v6  ;;  %v1237_v7 = vsel %vm675_vm5, %v1229_v4, %v1230_v8  ;;  %v2926_v4 = vld [vmem:[%s4401_s7 + $0x18] sm:$0xff] }
 0x281   : > { %v1111_v9 = vmul.f32 %v3161_v18, %v1110_v15  ;;  %v1246_v48 = vsel %vm688_vm10, %v1237_v7, 0.0  ;;  %vm1198_vm10 = vcmp.ge.s32.totalorder %v3348_v26, 4 }
 0x282   : > { %v1161_v10 = vmax.f32 %v1153_v19, 0.0 }
 0x283   : > { %v1115_v1 = vsel %vm1114_vm15, %v3161_v18, %v1111_v9 }
 0x284   : > { %v1132_v39 = vmul.f32 %v1115_v1, %v1036_v27  ;;  %v3037_v30 = vpack.i.bf16 %v1161_v10, %v1160_v54  ;;  %v1231_v52 = vrot.slane %v1161_v10, 6  ;;  %v1182_v14 = vrot.slane %v1161_v10, 4 }
 0x286   : > { %v1143_v60 = vmul.f32 %v3552_v57, %v1132_v39  ;;  %v1236_v42 = vsel %vm675_vm5, %v1230_v8, %v1231_v52  ;;  %v1188_v11 = vsel %vm1185_vm4, %v1181_v33, %v1182_v14 }
 0x287   : > { %3038 = vrot.lane.b32.xlu1 %v3037_v30, %s3239_s20  ;;  %v3032_v25 = vpack.i.bf16 %v1236_v42, %v1246_v48  ;;  %v1222_v30 = vsel %vm1198_vm10, %v3687_v0, 0.0 }
 0x288   : > { %v1154_v22 = vadd.f32 %v3564_v3, %v1143_v60 }
 0x289   : > { %3033 = vrot.lane.b32.xlu2 %v3032_v25, %s3238_s19 }
 0x28a   : > { %v1162_v16 = vmax.f32 %v1154_v22, 0.0 }
 0x28c   : > { %v1232_v28 = vrot.slane %v1162_v16, 6  ;;  %v1183_v18 = vrot.slane %v1162_v16, 4  ;;  %v3047_v45 = vpack.i.bf16 %v3614_v50, %v1162_v16  ;;  %v2924_v50 = vld [vmem:[%s4401_s7 + $0x8] sm:$0xff] }
 0x28e   : > { %v1234_v57 = vsel %vm675_vm5, %v1232_v28, %v1233_v5  ;;  %v1235_v32 = vsel %vm675_vm5, %v1231_v52, %v1232_v28  ;;  %v1186_v37 = vsel %vm1185_vm4, %v1183_v18, %v1184_v63  ;;  %v1187_v3 = vsel %vm1185_vm4, %v1182_v14, %v1183_v18  ;;  %v2927_v5 = vld [vmem:[%s4401_s7 + $0x20] sm:$0xff]  ;;  %v2925_v63 = vld [vmem:[%s4401_s7 + $0x10] sm:$0xff] }
 0x28f   : > { %v3042_v40 = vpack.i.bf16 %v1234_v57, %v1235_v32  ;;  %1388 = vmatpush.bf16.msrb.mxu2 %v2927_v5  ;;  %vm1194_vm5 = vcmp.ge.s32.totalorder %v3377_v41, 4  ;;  %v3136_v5 = vld [vmem:[%s4402_s8] ss:$0 sm:$0xff] }
 0x290   : > { %v1218_v51 = vsel %vm1194_vm5, %v3650_v49, 0.0 }
 0x291   : > { %3043 = vrot.lane.b32.xlu0 %v3042_v40, %s3238_s19  ;;  %3048 = vrot.lane.b32.xlu2 %v3047_v45, %s3239_s20 }
 0x293   : > { %1389 = vmatpush.bf16.msrb.mxu2 %v2926_v4 }
 0x297   : > { %1390 = vmatpush.bf16.msrb.mxu2 %v2925_v63 }
 0x29b   : > { %1391 = vmatpush.bf16.msrb.mxu2 %v2924_v50 }
 0x29f   : > { %1392 = vmatpush.bf16.msrb.mxu2 %v2923_v47 }
 0x2d2   : > { %v3014_v46 = vpop.permute.xlu2 %3013 }
 0x2d3   : > { %v3016_v53 = vunpack.i.h.bf16 %v3014_v46  ;;  %v3015_v36 = vunpack.i.l.bf16 %v3014_v46 }
 0x2d5   : > { %v1315_v61 = vsel %vm829_vm7, %v3661_v31, %v3016_v53  ;;  %v1314_v13 = vsel %vm829_vm7, %v1218_v51, %v3015_v36 }
 0x2e3   : > { %v3034_v8 = vpop.permute.xlu2 %3033 }
 0x2e4   : > { %v3036_v10 = vunpack.i.h.bf16 %v3034_v8  ;;  %v3035_v39 = vunpack.i.l.bf16 %v3034_v8 }
 0x2e6   : > { %v3019_v12 = vpop.permute.xlu0 %3018 }
 0x2e7   : > { %v3021_v56 = vunpack.i.h.bf16 %v3019_v12  ;;  %v3020_v58 = vunpack.i.l.bf16 %v3019_v12 }
 0x2e9   : > { %v1322_v62 = vsel %vm838_vm8, %v1314_v13, %v3020_v58  ;;  %v1323_v54 = vsel %vm838_vm8, %v1315_v61, %v3021_v56 }
 0x2ea   : > { %v1330_v17 = vpack.c.bf16 %v1323_v54, %v1322_v62 }
 0x2eb   : > { %v3049_v22 = vpop.permute.xlu2 %3048 }
 0x2ec   : > { %2812 = vmatmul.msk.bf16.vlgmr.msrb.gmra.mxu2 %vm890_vm9, %v1330_v17  ;;  %v3051_v18 = vunpack.i.h.bf16 %v3049_v22  ;;  %v3050_v57 = vunpack.i.l.bf16 %v3049_v22 }
 0x2ee   : > { %v3029_v21 = vpop.permute.xlu0 %3028 }
 0x2ef   : > { %v3031_v6 = vunpack.i.h.bf16 %v3029_v21  ;;  %v3030_v49 = vunpack.i.l.bf16 %v3029_v21 }
 0x2f1   : > { %v3024_v2 = vpop.permute.xlu1 %3023 }
 0x2f2   : > { %v3026_v33 = vunpack.i.h.bf16 %v3024_v2  ;;  %v3025_v15 = vunpack.i.l.bf16 %v3024_v2 }
 0x2f4   : > { %v1316_v9 = vsel %vm829_vm7, %v3677_v59, %v3025_v15  ;;  %v1317_v31 = vsel %vm829_vm7, %v3681_v43, %v3026_v33  ;;  %v1319_v59 = vsel %vm829_vm7, %v1188_v11, %v3036_v10  ;;  %v1318_v43 = vsel %vm829_vm7, %v1222_v30, %v3035_v39 }
 0x2f5   : > { %v1324_v19 = vsel %vm838_vm8, %v1316_v9, %v3030_v49  ;;  %v1325_v27 = vsel %vm838_vm8, %v1317_v31, %v3031_v6 }
 0x2f6   : > { %v1331_v1 = vpack.c.bf16 %v1325_v27, %v1324_v19 }
 0x2f9   : > { %v3039_v7 = vpop.permute.xlu1 %3038 }
 0x2fa   : > { %v3041_v52 = vunpack.i.h.bf16 %v3039_v7  ;;  %v3040_v14 = vunpack.i.l.bf16 %v3039_v7 }
 0x2fc   : > { %v1326_v60 = vsel %vm838_vm8, %v1318_v43, %v3040_v14  ;;  %v1327_v42 = vsel %vm838_vm8, %v1319_v59, %v3041_v52  ;;  %2813 = vmatmul.msk.bf16.gmra.mxu2 %vm890_vm9, %v1331_v1 }
 0x2fd   : > { %v1332_v48 = vpack.c.bf16 %v1327_v42, %v1326_v60 }
 0x303   : > { %v3044_v25 = vpop.permute.xlu0 %3043 }
 0x304   : > { %v3046_v16 = vunpack.i.h.bf16 %v3044_v25  ;;  %v3045_v28 = vunpack.i.l.bf16 %v3044_v25 }
 0x306   : > { %v1321_v0 = vsel %vm829_vm7, %v1186_v37, %v3046_v16  ;;  %v1320_v32 = vsel %vm829_vm7, %v1187_v3, %v3045_v28 }
 0x307   : > { %v1328_v11 = vsel %vm838_vm8, %v1320_v32, %v3050_v57  ;;  %v1329_v40 = vsel %vm838_vm8, %v1321_v0, %v3051_v18 }
 0x308   : > { %v1333_v45 = vpack.c.bf16 %v1329_v40, %v1328_v11 }
 0x30c   : > { %2814 = vmatmul.msk.bf16.gmra.mxu2 %vm890_vm9, %v1332_v48 }
 0x31c   : > { %2815 = vmatmul.msk.bf16.gmra.mxu2 %vm890_vm9, %v1333_v45 }
 0x36f   : > { %v1394_v4 = vpop.f32.mrf.mxu2 }
 0x370   : > { %v3769_v63 = vadd.f32 %v3136_v5, %v1394_v4 }
 0x372   : > { %v1416_v37 = vsel %vm829_vm7, %v3769_v63, 0.0  ;;  %v1448_v3 = vmul.f32 %v3769_v63, %v3769_v63 }
 0x373   : > { %1417 = vadd.xlane.f32.xlu1 %v1416_v37 }
 0x374   : > { %v1456_v53 = vsel %vm829_vm7, %v1448_v3, 0.0 }
 0x377   : > { %v1396_v50 = vpop.f32.mrf.mxu2 }
 0x378   : > { %v3775_v47 = vadd.f32 %v3136_v5, %v1396_v50 }
 0x37a   : > { %v1419_v46 = vsel %vm829_vm7, %v3775_v47, 0.0  ;;  %v1449_v36 = vmul.f32 %v3775_v47, %v3775_v47 }
 0x37b   : > { %1420 = vadd.xlane.f32.xlu2 %v1419_v46  ;;  %1457 = vadd.xlane.f32.xlu1 %v1456_v53 }
 0x37c   : > { %v1459_v56 = vsel %vm829_vm7, %v1449_v36, 0.0 }
 0x37f   : > { %v1399_v12 = vpop.f32.mrf.mxu2 }
 0x380   : > { %v3782_v51 = vadd.f32 %v3136_v5, %v1399_v12 }
 0x382   : > { %v1422_v58 = vsel %vm829_vm7, %v3782_v51, 0.0  ;;  %v1450_v61 = vmul.f32 %v3782_v51, %v3782_v51 }
 0x383   : > { %1460 = vadd.xlane.f32.xlu2 %v1459_v56  ;;  %1423 = vadd.xlane.f32.xlu1 %v1422_v58 }
 0x384   : > { %v1462_v54 = vsel %vm829_vm7, %v1450_v61, 0.0 }
 0x387   : > { %v1401_v13 = vpop.f32.mrf.mxu2 }
 0x388   : > { %v3789_v62 = vadd.f32 %v3136_v5, %v1401_v13 }
 0x38a   : > { %v1451_v17 = vmul.f32 %v3789_v62, %v3789_v62  ;;  %v1425_v59 = vsel %vm829_vm7, %v3789_v62, 0.0 }
 0x38b   : > { %1463 = vadd.xlane.f32.xlu2 %v1462_v54 }
 0x38c   : > { %v1465_v21 = vsel %vm829_vm7, %v1451_v17, 0.0 }
 0x38d   : > { %1466 = vadd.xlane.f32.xlu1 %v1465_v21 }
 0x38f   : > { %v1404_v2 = vpop.f32.mrf.mxu2 }
 0x390   : > { %v3795_v33 = vadd.f32 %v3136_v5, %v1404_v2  ;;  %v3831_v2 = vld [vmem:[%s4403_s9] ss:$0 sm:$0xff] }
 0x392   : > { %v1452_v15 = vmul.f32 %v3795_v33, %v3795_v33  ;;  %v1428_v43 = vsel %vm829_vm7, %v3795_v33, 0.0 }
 0x394   : > { %v1468_v6 = vsel %vm829_vm7, %v1452_v15, 0.0 }
 0x395   : > { %1469 = vadd.xlane.f32.xlu1 %v1468_v6 }
 0x397   : > { %v1406_v49 = vpop.f32.mrf.mxu2 }
 0x398   : > { %v3800_v8 = vadd.f32 %v3136_v5, %v1406_v49 }
 0x39a   : > { %v1431_v9 = vsel %vm829_vm7, %v3800_v8, 0.0  ;;  %v1453_v60 = vmul.f32 %v3800_v8, %v3800_v8 }
 0x39b   : > { %1432 = vadd.xlane.f32.xlu2 %v1431_v9 }
 0x39c   : > { %v1471_v42 = vsel %vm829_vm7, %v1453_v60, 0.0 }
 0x39f   : > { %v1409_v31 = vpop.f32.mrf.mxu2 }
 0x3a0   : > { %v3804_v19 = vadd.f32 %v3136_v5, %v1409_v31 }
 0x3a2   : > { %v1434_v27 = vsel %vm829_vm7, %v3804_v19, 0.0  ;;  %v1454_v1 = vmul.f32 %v3804_v19, %v3804_v19 }
 0x3a3   : > { %1435 = vadd.xlane.f32.xlu2 %v1434_v27 }
 0x3a4   : > { %v1474_v10 = vsel %vm829_vm7, %v1454_v1, 0.0  ;;  %v3838_v1 = vld [vmem:[%s4404_s10] ss:$0 sm:$0xff] }
 0x3a5   : > { %1475 = vadd.xlane.f32.xlu1 %v1474_v10 }
 0x3a7   : > { %v1411_v39 = vpop.f32.mrf.mxu2 }
 0x3a8   : > { %v3811_v7 = vadd.f32 %v3136_v5, %v1411_v39 }
 0x3aa   : > { %v1437_v30 = vsel %vm829_vm7, %v3811_v7, 0.0  ;;  %v1455_v52 = vmul.f32 %v3811_v7, %v3811_v7 }
 0x3ab   : > { %1438 = vadd.xlane.f32.xlu0 %v1437_v30 }
 0x3ac   : > { %v1477_v14 = vsel %vm829_vm7, %v1455_v52, 0.0 }
 0x3b3   : > { %1478 = vadd.xlane.f32.xlu0 %v1477_v14 }
 0x3bb   : > { %1426 = vadd.xlane.f32.xlu0 %v1425_v59 }
 0x3c3   : > { %1429 = vadd.xlane.f32.xlu0 %v1428_v43 }
 0x3cb   : > { %1472 = vadd.xlane.f32.xlu0 %v1471_v42 }
 0x3e6   : > { %v1418_v48 = vpop.xlane.xlu1 %1417 }
 0x3e7   : > { %v1440_v22 = vmul.f32 0.03125, %v1418_v48 }
 0x3e9   : > { %v1488_v28 = vmul.f32 %v1440_v22, %v1440_v22  ;;  %v1512_v21 = vsub.f32 %v3769_v63, %v1440_v22 }
 0x3ee   : > { %v1421_v25 = vpop.xlane.xlu2 %1420  ;;  %v1458_v16 = vpop.xlane.xlu1 %1457 }
 0x3ef   : > { %v1480_v18 = vmul.f32 0.03125, %v1458_v16  ;;  %v1441_v0 = vmul.f32 0.03125, %v1421_v25 }
 0x3f1   : > { %v1496_v57 = vsub.f32 %v1480_v18, %v1488_v28  ;;  %v1489_v45 = vmul.f32 %v1441_v0, %v1441_v0  ;;  %v1513_v14 = vsub.f32 %v3775_v47, %v1441_v0  ;;  %v3849_v18 = vstv %s1646_s16 }
 0x3f3   : > { %v1504_v32 = vmax.f32 %v1496_v57, 0.0 }
 0x3f5   : > { %v1520_v11 = vadd.f32 1e-08, %v1504_v32 }
 0x3f6   : > { %v1461_v40 = vpop.xlane.xlu2 %1460  ;;  %v1424_v53 = vpop.xlane.xlu1 %1423 }
 0x3f7   : > { %3162 = vrsqrt.f32 %v1520_v11  ;;  %v1481_v5 = vmul.f32 0.03125, %v1461_v40  ;;  %vm1534_vm1 = vweird.f32 %v1520_v11  ;;  %v3833_v9 = vmul.f32 0.03125, %v1424_v53 }
 0x3f9   : > { %v1497_v4 = vsub.f32 %v1481_v5, %v1489_v45  ;;  %v1490_v39 = vmul.f32 %v3833_v9, %v3833_v9 }
 0x3fb   : > { %v1505_v37 = vmax.f32 %v1497_v4, 0.0 }
 0x3fd   : > { %v3163_v3 = vpop.eup %3162  ;;  %v1521_v50 = vadd.f32 1e-08, %v1505_v37 }
 0x3fe   : > { %v1529_v46 = vmul.f32 %v3163_v3, %v1520_v11  ;;  %vm1535_vm0 = vweird.f32 %v3163_v3  ;;  %v1464_v54 = vpop.xlane.xlu2 %1463 }
 0x3ff   : > { %3164 = vrsqrt.f32 %v1521_v50  ;;  %vm1536_vm2 = vmor %vm1534_vm1, %vm1535_vm0  ;;  %v1482_v27 = vmul.f32 0.03125, %v1464_v54  ;;  %vm1544_vm6 = vweird.f32 %v1521_v50 }
 0x400   : > { %v1530_v36 = vmul.f32 %v3163_v3, %v1529_v46  ;;  %v3825_v17 = vpop.xlane.xlu1 %1466 }
 0x401   : > { %v1498_v59 = vsub.f32 %v1482_v27, %v1490_v39  ;;  %v1483_v39 = vmul.f32 0.03125, %v3825_v17 }
 0x402   : > { %v1531_v12 = vmul.f32 0.5, %v1530_v36 }
 0x403   : > { %v1506_v25 = vmax.f32 %v1498_v59, 0.0 }
 0x404   : > { %v1532_v56 = vsub.f32 1.5, %v1531_v12 }
 0x405   : > { %v3165_v58 = vpop.eup %3164  ;;  %v1522_v32 = vadd.f32 1e-08, %v1506_v25 }
 0x406   : > { %v1533_v61 = vmul.f32 %v3163_v3, %v1532_v56  ;;  %v1539_v13 = vmul.f32 %v3165_v58, %v1521_v50  ;;  %vm1545_vm3 = vweird.f32 %v3165_v58 }
 0x407   : > { %vm1546_vm11 = vmor %vm1544_vm6, %vm1545_vm3  ;;  %3166 = vrsqrt.f32 %v1522_v32  ;;  %vm1554_vm13 = vweird.f32 %v1522_v32 }
 0x408   : > { %v1537_v15 = vsel %vm1536_vm2, %v3163_v3, %v1533_v61  ;;  %v1540_v6 = vmul.f32 %v3165_v58, %v1539_v13  ;;  %v1470_v42 = vpop.xlane.xlu1 %1469 }
 0x409   : > { %v1608_v49 = vmul.f32 %v1537_v15, %v1512_v21 }
 0x40a   : > { %v1541_v31 = vmul.f32 0.5, %v1540_v6 }
 0x40b   : > { %v1619_v63 = vmul.f32 %v3831_v2, %v1608_v49 }
 0x40c   : > { %v1542_v10 = vsub.f32 1.5, %v1541_v31 }
 0x40d   : > { %v1630_v43 = vadd.f32 %v3838_v1, %v1619_v63  ;;  %v3167_v36 = vpop.eup %3166 }
 0x40e   : > { %v1543_v30 = vmul.f32 %v3165_v58, %v1542_v10  ;;  %v3843_v52 = vpop.xlane.xlu2 %1432  ;;  %vm1555_vm12 = vweird.f32 %v3167_v36 }
 0x40f   : > { %v1638_v16 = vmax.f32 %v1630_v43, 0.0  ;;  %vm1556_vm14 = vmor %vm1554_vm13, %vm1555_vm12 }
 0x410   : > { %v1547_v60 = vsel %vm1546_vm11, %v3165_v58, %v1543_v30  ;;  %v1549_v58 = vmul.f32 %v3167_v36, %v1522_v32  ;;  %v3886_v32 = vmul.f32 0.03125, %v3843_v52 }
 0x411   : > { %v1609_v48 = vmul.f32 %v1547_v60, %v1513_v14  ;;  %v1648_v40 = vmul.f32 %v3849_v18, %v1638_v16 }
 0x412   : > { %v1550_v21 = vmul.f32 %v3167_v36, %v1549_v58 }
 0x413   : > { %v1620_v22 = vmul.f32 %v3831_v2, %v1609_v48  ;;  %v3858_v37 = vadd.f32 %v1648_v40, %v3372_v38  ;;  %v1484_v40 = vmul.f32 0.03125, %v1470_v42 }
 0x414   : > { %v1551_v6 = vmul.f32 0.5, %v1550_v21 }
 0x415   : > { %v1631_v28 = vadd.f32 %v3838_v1, %v1620_v22 }
 0x416   : > { %v1436_v57 = vpop.xlane.xlu2 %1435  ;;  %v1552_v63 = vsub.f32 1.5, %v1551_v6 }
 0x417   : > { %v3851_v11 = vmul.f32 0.03125, %v1436_v57  ;;  %v1639_v47 = vmax.f32 %v1631_v28, 0.0 }
 0x418   : > { %v1476_v0 = vpop.xlane.xlu1 %1475  ;;  %v1553_v59 = vmul.f32 %v3167_v36, %v1552_v63 }
 0x419   : > { %v1649_v45 = vmul.f32 %v3849_v18, %v1639_v47  ;;  %v1494_v5 = vmul.f32 %v3851_v11, %v3851_v11  ;;  %v1486_v4 = vmul.f32 0.03125, %v1476_v0  ;;  %v1514_v0 = vsub.f32 %v3782_v51, %v3833_v9 }
 0x41a   : > { %v1557_v57 = vsel %vm1556_vm14, %v3167_v36, %v1553_v59 }
 0x41b   : > { %v3861_v3 = vadd.f32 %v1649_v45, %v3365_v35  ;;  %v1502_v53 = vsub.f32 %v1486_v4, %v1494_v5  ;;  %v1610_v4 = vmul.f32 %v1557_v57, %v1514_v0 }
 0x41d   : > { %v3057_v46 = vpack.i.bf16 %v3861_v3, %v3858_v37  ;;  %v1510_v12 = vmax.f32 %v1502_v53, 0.0  ;;  %v1621_v42 = vmul.f32 %v3831_v2, %v1610_v4 }
 0x41e   : > { %v1439_v50 = vpop.xlane.xlu0 %1438 }
 0x41f   : > { %3058 = vrot.lane.b32.xlu2 %v3057_v46, %s3239_s20  ;;  %v1447_v56 = vmul.f32 0.03125, %v1439_v50  ;;  %v3866_v13 = vadd.f32 1e-08, %v1510_v12  ;;  %v1493_v12 = vmul.f32 %v3886_v32, %v3886_v32  ;;  %v1632_v63 = vadd.f32 %v3838_v1, %v1621_v42 }
 0x421   : > { %v1495_v54 = vmul.f32 %v1447_v56, %v1447_v56  ;;  %3168 = vrsqrt.f32 %v3866_v13  ;;  %vm1594_vm3 = vweird.f32 %v3866_v13 }
 0x426   : > { %v1479_v61 = vpop.xlane.xlu0 %1478 }
 0x427   : > { %v1487_v38 = vmul.f32 0.03125, %v1479_v61  ;;  %v3871_v10 = vpop.eup %3168  ;;  %v1519_v61 = vsub.f32 %v3811_v7, %v1447_v56 }
 0x428   : > { %v1589_v43 = vmul.f32 %v3871_v10, %v3866_v13  ;;  %vm1595_vm2 = vweird.f32 %v3871_v10 }
 0x429   : > { %v1503_v15 = vsub.f32 %v1487_v38, %v1495_v54  ;;  %vm1596_vm11 = vmor %vm1594_vm3, %vm1595_vm2 }
 0x42a   : > { %v1590_v17 = vmul.f32 %v3871_v10, %v1589_v43 }
 0x42b   : > { %v1511_v35 = vmax.f32 %v1503_v15, 0.0 }
 0x42c   : > { %v1591_v46 = vmul.f32 0.5, %v1590_v17  ;;  %v1518_v17 = vsub.f32 %v3804_v19, %v3851_v11  ;;  %v1711_v19 = vrot.slane %v3858_v37, 4 }
 0x42d   : > { %v1527_v49 = vadd.f32 1e-08, %v1511_v35 }
 0x42e   : > { %v1427_v31 = vpop.xlane.xlu0 %1426  ;;  %v1592_v38 = vsub.f32 1.5, %v1591_v46 }
 0x42f   : > { %3170 = vrsqrt.f32 %v1527_v49  ;;  %v3869_v27 = vmul.f32 0.03125, %v1427_v31  ;;  %vm1604_vm0 = vweird.f32 %v1527_v49 }
 0x431   : > { %v1491_v30 = vmul.f32 %v3869_v27, %v3869_v27 }
 0x433   : > { %v1499_v14 = vsub.f32 %v1483_v39, %v1491_v30  ;;  %v1593_v30 = vmul.f32 %v3871_v10, %v1592_v38 }
 0x435   : > { %v3171_v60 = vpop.eup %3170  ;;  %v1507_v48 = vmax.f32 %v1499_v14, 0.0 }
 0x436   : > { %v1599_v22 = vmul.f32 %v3171_v60, %v1527_v49  ;;  %v1430_v25 = vpop.xlane.xlu0 %1429  ;;  %vm1605_vm15 = vweird.f32 %v3171_v60 }
 0x437   : > { %v1523_v16 = vadd.f32 1e-08, %v1507_v48  ;;  %v3878_v28 = vmul.f32 0.03125, %v1430_v25  ;;  %vm1606_vm1 = vmor %vm1604_vm0, %vm1605_vm15  ;;  %v1640_v48 = vmax.f32 %v1632_v63, 0.0 }
 0x438   : > { %v1600_v47 = vmul.f32 %v3171_v60, %v1599_v22  ;;  %v1597_v22 = vsel %vm1596_vm11, %v3871_v10, %v1593_v30 }
 0x439   : > { %3172 = vrsqrt.f32 %v1523_v16  ;;  %v1492_v45 = vmul.f32 %v3878_v28, %v3878_v28  ;;  %vm1564_vm12 = vweird.f32 %v1523_v16  ;;  %v1516_v38 = vsub.f32 %v3795_v33, %v3878_v28 }
 0x43a   : > { %v1601_v5 = vmul.f32 0.5, %v1600_v47  ;;  %v1515_v47 = vsub.f32 %v3789_v62, %v3869_v27  ;;  %v1517_v28 = vsub.f32 %v3800_v8, %v3886_v32 }
 0x43b   : > { %v1500_v50 = vsub.f32 %v1484_v40, %v1492_v45  ;;  %v1712_v45 = vrot.slane %v3861_v3, 4 }
 0x43c   : > { %v1602_v53 = vsub.f32 1.5, %v1601_v5  ;;  %v1614_v5 = vmul.f32 %v1597_v22, %v1518_v17  ;;  %v2934_v22 = vld [vmem:[%s4397_s3 + $0x58] sm:$0xff] }
 0x43d   : > { %v1508_v36 = vmax.f32 %v1500_v50, 0.0  ;;  %1872 = vmatpush.bf16.msrb.mxu3 %v2934_v22 }
 0x43e   : > { %v1603_v58 = vmul.f32 %v3171_v60, %v1602_v53  ;;  %v1473_v51 = vpop.xlane.xlu0 %1472 }
 0x43f   : > { %v3173_v9 = vpop.eup %3172  ;;  %v1524_v52 = vadd.f32 1e-08, %v1508_v36  ;;  %v1485_v54 = vmul.f32 0.03125, %v1473_v51  ;;  %v1725_v36 = vsel %vm1185_vm4, %v1711_v19, %v1712_v45 }
 0x440   : > { %v1607_v21 = vsel %vm1606_vm1, %v3171_v60, %v1603_v58  ;;  %v1559_v15 = vmul.f32 %v3173_v9, %v1523_v16  ;;  %vm1565_vm6 = vweird.f32 %v3173_v9  ;;  %v1650_v16 = vmul.f32 %v3849_v18, %v1640_v48 }
 0x441   : > { %v1615_v35 = vmul.f32 %v1607_v21, %v1519_v61  ;;  %3174 = vrsqrt.f32 %v1524_v52  ;;  %v1501_v6 = vsub.f32 %v1485_v54, %v1493_v12  ;;  %vm1566_vm13 = vmor %vm1564_vm12, %vm1565_vm6  ;;  %v1625_v12 = vmul.f32 %v3831_v2, %v1614_v5 }
 0x442   : > { %v1560_v31 = vmul.f32 %v3173_v9, %v1559_v15  ;;  %v3921_v51 = vadd.f32 %v1650_v16, %v3395_v55  ;;  %vm1574_vm15 = vweird.f32 %v1524_v52 }
 0x443   : > { %v1626_v49 = vmul.f32 %v3831_v2, %v1615_v35  ;;  %v1509_v39 = vmax.f32 %v1501_v6, 0.0 }
 0x444   : > { %v1561_v7 = vmul.f32 0.5, %v1560_v31  ;;  %v1636_v31 = vadd.f32 %v3838_v1, %v1625_v12  ;;  %v1713_v41 = vrot.slane %v3921_v51, 4 }
 0x445   : > { %v1637_v56 = vadd.f32 %v3838_v1, %v1626_v49  ;;  %v1525_v14 = vadd.f32 1e-08, %v1509_v39 }
 0x446   : > { %v1562_v59 = vsub.f32 1.5, %v1561_v7  ;;  %v1644_v7 = vmax.f32 %v1636_v31, 0.0 }
 0x447   : > { %v3175_v43 = vpop.eup %3174  ;;  %v1645_v60 = vmax.f32 %v1637_v56, 0.0  ;;  %3176 = vrsqrt.f32 %v1525_v14 }
 0x448   : > { %v1563_v25 = vmul.f32 %v3173_v9, %v1562_v59  ;;  %v1569_v57 = vmul.f32 %v3175_v43, %v1524_v52  ;;  %vm1575_vm14 = vweird.f32 %v3175_v43  ;;  %v1724_v59 = vsel %vm1185_vm4, %v1712_v45, %v1713_v41 }
 0x449   : > { %v1655_v13 = vmul.f32 %v3849_v18, %v1645_v60  ;;  %vm1576_vm0 = vmor %vm1574_vm15, %vm1575_vm14 }
 0x44a   : > { %v1567_v0 = vsel %vm1566_vm13, %v3173_v9, %v1563_v25  ;;  %v1570_v40 = vmul.f32 %v3175_v43, %v1569_v57  ;;  %v1654_v25 = vmul.f32 %v3849_v18, %v1644_v7 }
 0x44b   : > { %v1611_v4 = vmul.f32 %v1567_v0, %v1515_v47  ;;  %v3906_v10 = vadd.f32 %v1655_v13, %v3379_v44 }
 0x44c   : > { %v1571_v50 = vmul.f32 0.5, %v1570_v40  ;;  %v3963_v40 = vadd.f32 %v1654_v25, %v3362_v34  ;;  %v2931_v34 = vld [vmem:[%s4397_s3 + $0x40] sm:$0xff] }
 0x44d   : > { %v3177_v11 = vpop.eup %3176  ;;  %v1622_v62 = vmul.f32 %v3831_v2, %v1611_v4  ;;  %v1718_v27 = vrot.slane %v3906_v10, 4 }
 0x44e   : > { %v1572_v46 = vsub.f32 1.5, %v1571_v50  ;;  %v1579_v53 = vmul.f32 %v3177_v11, %v1525_v14  ;;  %vm1585_vm1 = vweird.f32 %v3177_v11  ;;  %v3087_v26 = vpack.i.bf16 %v3906_v10, %v3963_v40 }
 0x44f   : > { %v1633_v44 = vadd.f32 %v3838_v1, %v1622_v62  ;;  %v1726_v58 = vsel %vm1185_vm4, %v1718_v27, %v1711_v19 }
 0x450   : > { %v1573_v9 = vmul.f32 %v3175_v43, %v1572_v46  ;;  %v1580_v42 = vmul.f32 %v3177_v11, %v1579_v53  ;;  %v1727_v61 = vsel %vm1194_vm5, %v1726_v58, 0.0  ;;  %vm1584_vm5 = vweird.f32 %v1525_v14  ;;  %v2930_v46 = vld [vmem:[%s4397_s3 + $0x38] sm:$0xff] }
 0x451   : > { %v1641_v54 = vmax.f32 %v1633_v44, 0.0  ;;  %v3052_v21 = vpack.i.bf16 %v1725_v36, %v1727_v61  ;;  %vm1586_vm2 = vmor %vm1584_vm5, %vm1585_vm1 }
 0x452   : > { %v1577_v15 = vsel %vm1576_vm0, %v3175_v43, %v1573_v9  ;;  %v1581_v35 = vmul.f32 0.5, %v1580_v42 }
 0x453   : > { %v1612_v6 = vmul.f32 %v1577_v15, %v1516_v38  ;;  %3053 = vrot.lane.b32.xlu0 %v3052_v21, %s3238_s19  ;;  %v1651_v55 = vmul.f32 %v3849_v18, %v1641_v54 }
 0x454   : > { %v1582_v52 = vsub.f32 1.5, %v1581_v35 }
 0x455   : > { %v1623_v63 = vmul.f32 %v3831_v2, %v1612_v6  ;;  %v3933_v49 = vadd.f32 %v1651_v55, %v3353_v29 }
 0x456   : > { %v1583_v33 = vmul.f32 %v3177_v11, %v1582_v52 }
 0x457   : > { %v1634_v39 = vadd.f32 %v3838_v1, %v1623_v63  ;;  %v1714_v30 = vrot.slane %v3933_v49, 4  ;;  %v3067_v29 = vpack.i.bf16 %v3933_v49, %v3921_v51 }
 0x458   : > { %v1587_v56 = vsel %vm1586_vm2, %v3177_v11, %v1583_v33 }
 0x459   : > { %v1642_v43 = vmax.f32 %v1634_v39, 0.0  ;;  %v1613_v60 = vmul.f32 %v1587_v56, %v1517_v28  ;;  %v1723_v14 = vsel %vm1185_vm4, %v1713_v41, %v1714_v30 }
 0x45a   : > { %v3062_v48 = vpack.i.bf16 %v1723_v14, %v1724_v59 }
 0x45b   : > { %v1652_v8 = vmul.f32 %v3849_v18, %v1642_v43  ;;  %v1624_v32 = vmul.f32 %v3831_v2, %v1613_v60  ;;  %3068 = vrot.lane.b32.xlu0 %v3067_v29, %s3239_s20  ;;  %v2933_v2 = vld [vmem:[%s4397_s3 + $0x50] sm:$0xff] }
 0x45c   : > { %3063 = vrot.lane.b32.xlu1 %v3062_v48, %s3238_s19  ;;  %1873 = vmatpush.bf16.msrb.mxu3 %v2933_v2 }
 0x45d   : > { %v1635_v57 = vadd.f32 %v3838_v1, %v1624_v32  ;;  %v3955_v17 = vadd.f32 %v1652_v8, %v3344_v23  ;;  %v2932_v1 = vld [vmem:[%s4397_s3 + $0x48] sm:$0xff] }
 0x45f   : > { %v1643_v47 = vmax.f32 %v1635_v57, 0.0  ;;  %v1715_v13 = vrot.slane %v3955_v17, 4 }
 0x460   : > { %1874 = vmatpush.bf16.msrb.mxu3 %v2932_v1 }
 0x461   : > { %v1653_v0 = vmul.f32 %v3849_v18, %v1643_v47  ;;  %v1722_v45 = vsel %vm1185_vm4, %v1714_v30, %v1715_v13  ;;  %v1717_v18 = vrot.slane %v3963_v40, 4 }
 0x462   : > { %v1731_v16 = vsel %vm1198_vm10, %v1722_v45, 0.0 }
 0x463   : > { %v3969_v23 = vadd.f32 %v1653_v0, %v3346_v24  ;;  %v1719_v50 = vsel %vm1185_vm4, %v1717_v18, %v1718_v27 }
 0x464   : > { %1875 = vmatpush.bf16.msrb.mxu3 %v2931_v34 }
 0x465   : > { %v3077_v5 = vpack.i.bf16 %v3969_v23, %v3955_v17  ;;  %v1716_v4 = vrot.slane %v3969_v23, 4 }
 0x467   : > { %3078 = vrot.lane.b32.xlu0 %v3077_v5, %s3239_s20  ;;  %v1721_v24 = vsel %vm1185_vm4, %v1715_v13, %v1716_v4  ;;  %v1720_v19 = vsel %vm1185_vm4, %v1716_v4, %v1717_v18  ;;  %v3139_v4 = vld [vmem:[%s4398_s4 + $0x1] ss:$0 sm:$0xff] }
 0x468   : > { %v3072_v11 = vpack.i.bf16 %v1721_v24, %v1731_v16  ;;  %v3082_v62 = vpack.i.bf16 %v1719_v50, %v1720_v19  ;;  %1876 = vmatpush.bf16.msrb.mxu3 %v2930_v46 }
 0x46a   : > { %3073 = vrot.lane.b32.xlu2 %v3072_v11, %s3238_s19  ;;  %3083 = vrot.lane.b32.xlu1 %v3082_v62, %s3238_s19 }
 0x46c   : > { %1877 = vmatpush.bf16.msrb.mxu3 %v2929_v20 }
 0x472   : > { %3088 = vrot.lane.b32.xlu2 %v3087_v26, %s3239_s20 }
 0x479   : > { %v3059_v27 = vpop.permute.xlu2 %3058 }
 0x47a   : > { %v3061_v44 = vunpack.i.h.bf16 %v3059_v27  ;;  %v3060_v58 = vunpack.i.l.bf16 %v3059_v27 }
 0x4c4   : > { %v3074_v39 = vpop.permute.xlu2 %3073 }
 0x4c5   : > { %v3054_v53 = vpop.permute.xlu0 %3053  ;;  %v3076_v7 = vunpack.i.h.bf16 %v3074_v39  ;;  %v3075_v56 = vunpack.i.l.bf16 %v3074_v39 }
 0x4c6   : > { %v3056_v36 = vunpack.i.h.bf16 %v3054_v53  ;;  %v3055_v12 = vunpack.i.l.bf16 %v3054_v53 }
 0x4c7   : > { %v1804_v60 = vsel %vm829_vm7, %v3955_v17, %v3076_v7  ;;  %v1803_v29 = vsel %vm829_vm7, 0.0, %v3075_v56 }
 0x4c8   : > { %v1800_v9 = vsel %vm829_vm7, %v3858_v37, %v3056_v36  ;;  %v1799_v42 = vsel %vm829_vm7, 0.0, %v3055_v12 }
 0x4c9   : > { %v1808_v61 = vsel %vm838_vm8, %v1800_v9, %v3061_v44  ;;  %v1807_v54 = vsel %vm838_vm8, %v1799_v42, %v3060_v58 }
 0x4ca   : > { %v1815_v38 = vpack.c.bf16 %v1808_v61, %v1807_v54 }
 0x4cc   : > { %2853 = vmatmul.msk.bf16.vlgmr.msrb.gmra.mxu3 %vm890_vm9, %v1815_v38  ;;  %v3089_v57 = vpop.permute.xlu2 %3088 }
 0x4cd   : > { %v3069_v6 = vpop.permute.xlu0 %3068  ;;  %v3091_v13 = vunpack.i.h.bf16 %v3089_v57  ;;  %v3090_v0 = vunpack.i.l.bf16 %v3089_v57 }
 0x4ce   : > { %v3064_v21 = vpop.permute.xlu1 %3063  ;;  %v3071_v52 = vunpack.i.h.bf16 %v3069_v6  ;;  %v3070_v41 = vunpack.i.l.bf16 %v3069_v6 }
 0x4cf   : > { %v3066_v15 = vunpack.i.h.bf16 %v3064_v21  ;;  %v3065_v35 = vunpack.i.l.bf16 %v3064_v21 }
 0x4d1   : > { %v1802_v55 = vsel %vm829_vm7, %v3921_v51, %v3066_v15  ;;  %v1801_v31 = vsel %vm829_vm7, %v3861_v3, %v3065_v35 }
 0x4d2   : > { %v1809_v63 = vsel %vm838_vm8, %v1801_v31, %v3070_v41  ;;  %v1810_v33 = vsel %vm838_vm8, %v1802_v55, %v3071_v52 }
 0x4d3   : > { %v1816_v28 = vpack.c.bf16 %v1810_v33, %v1809_v63 }
 0x4d9   : > { %v3079_v30 = vpop.permute.xlu0 %3078 }
 0x4da   : > { %v3081_v59 = vunpack.i.h.bf16 %v3079_v30  ;;  %v3080_v43 = vunpack.i.l.bf16 %v3079_v30 }
 0x4dc   : > { %2854 = vmatmul.msk.bf16.gmra.mxu3 %vm890_vm9, %v1816_v28  ;;  %v1811_v14 = vsel %vm838_vm8, %v1803_v29, %v3080_v43  ;;  %v1812_v48 = vsel %vm838_vm8, %v1804_v60, %v3081_v59  ;;  %v3084_v32 = vpop.permute.xlu1 %3083 }
 0x4dd   : > { %v1817_v8 = vpack.c.bf16 %v1812_v48, %v1811_v14  ;;  %v3086_v22 = vunpack.i.h.bf16 %v3084_v32  ;;  %v3085_v25 = vunpack.i.l.bf16 %v3084_v32 }
 0x4df   : > { %v1806_v2 = vsel %vm829_vm7, %v3963_v40, %v3086_v22  ;;  %v1805_v47 = vsel %vm829_vm7, %v3969_v23, %v3085_v25 }
 0x4e0   : > { %v1813_v1 = vsel %vm838_vm8, %v1805_v47, %v3090_v0  ;;  %v1814_v45 = vsel %vm838_vm8, %v1806_v2, %v3091_v13 }
 0x4e1   : > { %v1818_v5 = vpack.c.bf16 %v1814_v45, %v1813_v1 }
 0x4ec   : > { %2855 = vmatmul.msk.bf16.gmra.mxu3 %vm890_vm9, %v1817_v8 }
 0x4fc   : > { %2856 = vmatmul.msk.bf16.gmra.mxu3 %vm890_vm9, %v1818_v5 }
 0x54f   : > { %v1879_v18 = vpop.f32.mrf.mxu3 }
 0x550   : > { %v4031_v34 = vadd.f32 %v3139_v4, %v1879_v18 }
 0x552   : > { %v1903_v24 = vsel %vm829_vm7, %v4031_v34, 0.0  ;;  %v1935_v16 = vmul.f32 %v4031_v34, %v4031_v34 }
 0x553   : > { %1904 = vadd.xlane.f32.xlu0 %v1903_v24 }
 0x554   : > { %v1943_v50 = vsel %vm829_vm7, %v1935_v16, 0.0 }
 0x555   : > { %1944 = vadd.xlane.f32.xlu2 %v1943_v50 }
 0x557   : > { %v1881_v19 = vpop.f32.mrf.mxu3 }
 0x558   : > { %v4038_v11 = vadd.f32 %v3139_v4, %v1881_v19 }
 0x55a   : > { %v1906_v62 = vsel %vm829_vm7, %v4038_v11, 0.0  ;;  %v1936_v46 = vmul.f32 %v4038_v11, %v4038_v11 }
 0x55b   : > { %1907 = vadd.xlane.f32.xlu1 %v1906_v62 }
 0x55c   : > { %v1946_v26 = vsel %vm829_vm7, %v1936_v46, 0.0 }
 0x55d   : > { %1947 = vadd.xlane.f32.xlu0 %v1946_v26 }
 0x55f   : > { %v1884_v20 = vpop.f32.mrf.mxu3 }
 0x560   : > { %v4045_v27 = vadd.f32 %v3139_v4, %v1884_v20 }
 0x562   : > { %v1909_v53 = vsel %vm829_vm7, %v4045_v27, 0.0  ;;  %v1937_v36 = vmul.f32 %v4045_v27, %v4045_v27 }
 0x563   : > { %1910 = vadd.xlane.f32.xlu1 %v1909_v53 }
 0x564   : > { %v1949_v12 = vsel %vm829_vm7, %v1937_v36, 0.0 }
 0x565   : > { %1950 = vadd.xlane.f32.xlu0 %v1949_v12 }
 0x567   : > { %v1886_v44 = vpop.f32.mrf.mxu3 }
 0x568   : > { %v4052_v58 = vadd.f32 %v3139_v4, %v1886_v44 }
 0x56a   : > { %v1912_v9 = vsel %vm829_vm7, %v4052_v58, 0.0  ;;  %v1938_v42 = vmul.f32 %v4052_v58, %v4052_v58 }
 0x56b   : > { %1913 = vadd.xlane.f32.xlu2 %v1912_v9 }
 0x56c   : > { %v1952_v61 = vsel %vm829_vm7, %v1938_v42, 0.0 }
 0x56d   : > { %1953 = vadd.xlane.f32.xlu1 %v1952_v61 }
 0x56f   : > { %v1889_v54 = vpop.f32.mrf.mxu3 }
 0x570   : > { %v4059_v38 = vadd.f32 %v3139_v4, %v1889_v54 }
 0x572   : > { %v1915_v21 = vsel %vm829_vm7, %v4059_v38, 0.0  ;;  %v1939_v15 = vmul.f32 %v4059_v38, %v4059_v38 }
 0x573   : > { %1916 = vadd.xlane.f32.xlu2 %v1915_v21 }
 0x574   : > { %v1955_v35 = vsel %vm829_vm7, %v1939_v15, 0.0 }
 0x575   : > { %1956 = vadd.xlane.f32.xlu1 %v1955_v35 }
 0x577   : > { %v1891_v6 = vpop.f32.mrf.mxu3 }
 0x578   : > { %v4066_v55 = vadd.f32 %v3139_v4, %v1891_v6  ;;  %v4101_v6 = vld [vmem:[%s4399_s5 + $0x1] ss:$0 sm:$0xff] }
 0x57a   : > { %v1918_v31 = vsel %vm829_vm7, %v4066_v55, 0.0  ;;  %v1940_v52 = vmul.f32 %v4066_v55, %v4066_v55 }
 0x57b   : > { %1919 = vadd.xlane.f32.xlu0 %v1918_v31 }
 0x57c   : > { %v1958_v41 = vsel %vm829_vm7, %v1940_v52, 0.0 }
 0x57d   : > { %1959 = vadd.xlane.f32.xlu2 %v1958_v41 }
 0x57f   : > { %v1894_v63 = vpop.f32.mrf.mxu3 }
 0x580   : > { %v4073_v33 = vadd.f32 %v3139_v4, %v1894_v63 }
 0x582   : > { %v1921_v28 = vsel %vm829_vm7, %v4073_v33, 0.0  ;;  %v1941_v39 = vmul.f32 %v4073_v33, %v4073_v33 }
 0x583   : > { %1922 = vadd.xlane.f32.xlu0 %v1921_v28 }
 0x584   : > { %v1961_v30 = vsel %vm829_vm7, %v1941_v39, 0.0  ;;  %v4108_v39 = vld [vmem:[%s4400_s6 + $0x1] ss:$0 sm:$0xff] }
 0x585   : > { %1962 = vadd.xlane.f32.xlu2 %v1961_v30 }
 0x587   : > { %v1896_v7 = vpop.f32.mrf.mxu3 }
 0x588   : > { %v4080_v56 = vadd.f32 %v3139_v4, %v1896_v7 }
 0x58a   : > { %v1924_v59 = vsel %vm829_vm7, %v4080_v56, 0.0  ;;  %v1942_v43 = vmul.f32 %v4080_v56, %v4080_v56 }
 0x58b   : > { %1925 = vadd.xlane.f32.xlu1 %v1924_v59 }
 0x58c   : > { %v1964_v60 = vsel %vm829_vm7, %v1942_v43, 0.0 }
 0x58d   : > { %1965 = vadd.xlane.f32.xlu0 %v1964_v60 }
 0x5c6   : > { %v1905_v29 = vpop.xlane.xlu0 %1904 }
 0x5c7   : > { %v1927_v14 = vmul.f32 0.03125, %v1905_v29 }
 0x5c8   : > { %v1945_v48 = vpop.xlane.xlu2 %1944 }
 0x5c9   : > { %v1975_v8 = vmul.f32 %v1927_v14, %v1927_v14  ;;  %v1967_v32 = vmul.f32 0.03125, %v1945_v48  ;;  %v1999_v15 = vsub.f32 %v4031_v34, %v1927_v14 }
 0x5cb   : > { %v1983_v22 = vsub.f32 %v1967_v32, %v1975_v8 }
 0x5cd   : > { %v1991_v25 = vmax.f32 %v1983_v22, 0.0 }
 0x5ce   : > { %v1908_v57 = vpop.xlane.xlu1 %1907 }
 0x5cf   : > { %v2007_v2 = vadd.f32 1e-08, %v1991_v25  ;;  %v4087_v47 = vmul.f32 0.03125, %v1908_v57 }
 0x5d0   : > { %v1948_v13 = vpop.xlane.xlu0 %1947 }
 0x5d1   : > { %3178 = vrsqrt.f32 %v2007_v2  ;;  %v1976_v0 = vmul.f32 %v4087_v47, %v4087_v47  ;;  %v1968_v1 = vmul.f32 0.03125, %v1948_v13  ;;  %vm2021_vm10 = vweird.f32 %v2007_v2 }
 0x5d2   : > { %v2000_v13 = vsub.f32 %v4038_v11, %v4087_v47 }
 0x5d3   : > { %v1984_v45 = vsub.f32 %v1968_v1, %v1976_v0 }
 0x5d5   : > { %v1992_v5 = vmax.f32 %v1984_v45, 0.0 }
 0x5d6   : > { %v1911_v4 = vpop.xlane.xlu1 %1910 }
 0x5d7   : > { %v3179_v18 = vpop.eup %3178  ;;  %v4091_v24 = vmul.f32 0.03125, %v1911_v4  ;;  %v2008_v50 = vadd.f32 1e-08, %v1992_v5 }
 0x5d8   : > { %v2016_v16 = vmul.f32 %v3179_v18, %v2007_v2  ;;  %v1951_v19 = vpop.xlane.xlu0 %1950  ;;  %vm2022_vm4 = vweird.f32 %v3179_v18 }
 0x5d9   : > { %v1977_v62 = vmul.f32 %v4091_v24, %v4091_v24  ;;  %v1969_v46 = vmul.f32 0.03125, %v1951_v19  ;;  %3180 = vrsqrt.f32 %v2008_v50  ;;  %vm2023_vm3 = vmor %vm2021_vm10, %vm2022_vm4  ;;  %vm2031_vm11 = vweird.f32 %v2008_v50 }
 0x5da   : > { %v2017_v26 = vmul.f32 %v3179_v18, %v2016_v16  ;;  %v3240_v16 = vmov 0.0  }
 0x5db   : > { %v1985_v20 = vsub.f32 %v1969_v46, %v1977_v62 }
 0x5dc   : > { %v2018_v53 = vmul.f32 0.5, %v2017_v26 }
 0x5dd   : > { %v1993_v36 = vmax.f32 %v1985_v20, 0.0 }
 0x5de   : > { %v2019_v12 = vsub.f32 1.5, %v2018_v53  ;;  %v1914_v44 = vpop.xlane.xlu2 %1913 }
 0x5df   : > { %v2009_v9 = vadd.f32 1e-08, %v1993_v36  ;;  %v4095_v42 = vmul.f32 0.03125, %v1914_v44  ;;  %v3181_v61 = vpop.eup %3180  ;;  %v2001_v44 = vsub.f32 %v4045_v27, %v4091_v24 }
 0x5e0   : > { %v2020_v54 = vmul.f32 %v3179_v18, %v2019_v12  ;;  %v1954_v21 = vpop.xlane.xlu1 %1953  ;;  %v2026_v35 = vmul.f32 %v3181_v61, %v2008_v50  ;;  %vm2032_vm6 = vweird.f32 %v3181_v61 }
 0x5e1   : > { %3182 = vrsqrt.f32 %v2009_v9  ;;  %v1978_v52 = vmul.f32 %v4095_v42, %v4095_v42  ;;  %v1970_v41 = vmul.f32 0.03125, %v1954_v21  ;;  %vm2033_vm12 = vmor %vm2031_vm11, %vm2032_vm6  ;;  %vm2041_vm14 = vweird.f32 %v2009_v9 }
 0x5e2   : > { %v2024_v31 = vsel %vm2023_vm3, %v3179_v18, %v2020_v54  ;;  %v2027_v28 = vmul.f32 %v3181_v61, %v2026_v35 }
 0x5e3   : > { %v2095_v63 = vmul.f32 %v2024_v31, %v1999_v15  ;;  %v1986_v34 = vsub.f32 %v1970_v41, %v1978_v52 }
 0x5e4   : > { %v2028_v30 = vmul.f32 0.5, %v2027_v28 }
 0x5e5   : > { %v2106_v7 = vmul.f32 %v4101_v6, %v2095_v63  ;;  %v1994_v59 = vmax.f32 %v1986_v34, 0.0 }
 0x5e6   : > { %v1917_v43 = vpop.xlane.xlu2 %1916  ;;  %v2029_v29 = vsub.f32 1.5, %v2028_v30 }
 0x5e7   : > { %v3183_v60 = vpop.eup %3182  ;;  %v4111_v14 = vmul.f32 0.03125, %v1917_v43  ;;  %v2117_v48 = vadd.f32 %v4108_v39, %v2106_v7  ;;  %v2010_v32 = vadd.f32 1e-08, %v1994_v59 }
 0x5e8   : > { %v2036_v8 = vmul.f32 %v3183_v60, %v2009_v9  ;;  %v1957_v22 = vpop.xlane.xlu1 %1956  ;;  %v2030_v25 = vmul.f32 %v3181_v61, %v2029_v29  ;;  %vm2042_vm13 = vweird.f32 %v3183_v60 }
 0x5e9   : > { %v1979_v57 = vmul.f32 %v4111_v14, %v4111_v14  ;;  %v1971_v2 = vmul.f32 0.03125, %v1957_v22  ;;  %3184 = vrsqrt.f32 %v2010_v32  ;;  %v4118_v1 = vmax.f32 %v2117_v48, 0.0  ;;  %vm2043_vm15 = vmor %vm2041_vm14, %vm2042_vm13 }
 0x5ea   : > { %v2037_v0 = vmul.f32 %v3183_v60, %v2036_v8  ;;  %v2034_v45 = vsel %vm2033_vm12, %v3181_v61, %v2030_v25  ;;  %vm2051_vm1 = vweird.f32 %v2010_v32  ;;  %v2002_v25 = vsub.f32 %v4052_v58, %v4095_v42 }
 0x5eb   : > { %v1987_v5 = vsub.f32 %v1971_v2, %v1979_v57  ;;  %v2096_v4 = vmul.f32 %v2034_v45, %v2000_v13  ;;  %v3092_v50 = vpack.i.bf16 %v4118_v1, %v3240_v16 }
 0x5ec   : > { %v2038_v18 = vmul.f32 0.5, %v2037_v0 }
 0x5ed   : > { %v1995_v19 = vmax.f32 %v1987_v5, 0.0  ;;  %3093 = vrot.lane.b32.xlu1 %v3092_v50, %s3238_s19  ;;  %v2107_v11 = vmul.f32 %v4101_v6, %v2096_v4 }
 0x5ee   : > { %v2039_v62 = vsub.f32 1.5, %v2038_v18  ;;  %v1920_v46 = vpop.xlane.xlu0 %1919 }
 0x5ef   : > { %v2011_v47 = vadd.f32 1e-08, %v1995_v19  ;;  %v4124_v26 = vmul.f32 0.03125, %v1920_v46  ;;  %v3185_v20 = vpop.eup %3184  ;;  %v2118_v12 = vadd.f32 %v4108_v39, %v2107_v11 }
 0x5f0   : > { %v2040_v53 = vmul.f32 %v3183_v60, %v2039_v62  ;;  %v1960_v36 = vpop.xlane.xlu2 %1959  ;;  %v2046_v61 = vmul.f32 %v3185_v20, %v2010_v32  ;;  %vm2052_vm0 = vweird.f32 %v3185_v20 }
 0x5f1   : > { %3186 = vrsqrt.f32 %v2011_v47  ;;  %v1980_v21 = vmul.f32 %v4124_v26, %v4124_v26  ;;  %v1972_v15 = vmul.f32 0.03125, %v1960_v36  ;;  %v4131_v31 = vmax.f32 %v2118_v12, 0.0  ;;  %vm2053_vm5 = vmor %vm2051_vm1, %vm2052_vm0 }
 0x5f2   : > { %v2044_v54 = vsel %vm2043_vm15, %v3183_v60, %v2040_v53  ;;  %v2047_v35 = vmul.f32 %v3185_v20, %v2046_v61  ;;  %vm2061_vm4 = vweird.f32 %v2011_v47  ;;  %v2003_v53 = vsub.f32 %v4059_v38, %v4111_v14  ;;  %v2940_v38 = vld [vmem:[%s4401_s7 + $0x58] sm:$0xff] }
 0x5f3   : > { %v2097_v52 = vmul.f32 %v2044_v54, %v2001_v44  ;;  %v1988_v41 = vsub.f32 %v1972_v15, %v1980_v21  ;;  %v3097_v63 = vpack.i.bf16 %v4131_v31, %v4118_v1  ;;  %2325 = vmatpush.bf16.msrb.mxu0 %v2940_v38 }
 0x5f4   : > { %v2048_v9 = vmul.f32 0.5, %v2047_v35 }
 0x5f5   : > { %v2108_v28 = vmul.f32 %v4101_v6, %v2097_v52  ;;  %v1996_v27 = vmax.f32 %v1988_v41, 0.0  ;;  %3098 = vrot.lane.b32.xlu2 %v3097_v63, %s3239_s20 }
 0x5f6   : > { %v1923_v24 = vpop.xlane.xlu0 %1922  ;;  %v2049_v30 = vsub.f32 1.5, %v2048_v9 }
 0x5f7   : > { %v3187_v34 = vpop.eup %3186  ;;  %v4137_v7 = vmul.f32 0.03125, %v1923_v24  ;;  %v2119_v59 = vadd.f32 %v4108_v39, %v2108_v28  ;;  %v2012_v60 = vadd.f32 1e-08, %v1996_v27 }
 0x5f8   : > { %v2056_v43 = vmul.f32 %v3187_v34, %v2011_v47  ;;  %v1963_v29 = vpop.xlane.xlu2 %1962  ;;  %v2050_v48 = vmul.f32 %v3185_v20, %v2049_v30  ;;  %vm2062_vm2 = vweird.f32 %v3187_v34 }
 0x5f9   : > { %v1981_v8 = vmul.f32 %v4137_v7, %v4137_v7  ;;  %v1973_v22 = vmul.f32 0.03125, %v1963_v29  ;;  %3188 = vrsqrt.f32 %v2012_v60  ;;  %v2127_v2 = vmax.f32 %v2119_v59, 0.0  ;;  %vm2063_vm10 = vmor %vm2061_vm4, %vm2062_vm2 }
 0x5fa   : > { %v2057_v57 = vmul.f32 %v3187_v34, %v2056_v43  ;;  %v2054_v13 = vsel %vm2053_vm5, %v3185_v20, %v2050_v48  ;;  %vm2071_vm6 = vweird.f32 %v2012_v60  ;;  %v2004_v59 = vsub.f32 %v4066_v55, %v4124_v26 }
 0x5fb   : > { %v1989_v0 = vsub.f32 %v1973_v22, %v1981_v8  ;;  %v3102_v5 = vpack.i.bf16 %v2127_v2, %v4131_v31  ;;  %v2098_v4 = vmul.f32 %v2054_v13, %v2002_v25  ;;  %v2005_v26 = vsub.f32 %v4073_v33, %v4137_v7 }
 0x5fc   : > { %v2058_v45 = vmul.f32 0.5, %v2057_v57 }
 0x5fd   : > { %v1997_v18 = vmax.f32 %v1989_v0, 0.0  ;;  %3103 = vrot.lane.b32.xlu0 %v3102_v5, %s3238_s19  ;;  %v2109_v19 = vmul.f32 %v4101_v6, %v2098_v4 }
 0x5fe   : > { %v2059_v50 = vsub.f32 1.5, %v2058_v45  ;;  %v1926_v32 = vpop.xlane.xlu1 %1925 }
 0x5ff   : > { %v2013_v62 = vadd.f32 1e-08, %v1997_v18  ;;  %v4147_v58 = vmul.f32 0.03125, %v1926_v32  ;;  %v3189_v42 = vpop.eup %3188  ;;  %v2120_v20 = vadd.f32 %v4108_v39, %v2109_v19 }
 0x600   : > { %v2060_v46 = vmul.f32 %v3187_v34, %v2059_v50  ;;  %v1966_v11 = vpop.xlane.xlu0 %1965  ;;  %v2066_v36 = vmul.f32 %v3189_v42, %v2012_v60  ;;  %vm2072_vm3 = vweird.f32 %v3189_v42 }
 0x601   : > { %3190 = vrsqrt.f32 %v2013_v62  ;;  %v1982_v44 = vmul.f32 %v4147_v58, %v4147_v58  ;;  %v1974_v61 = vmul.f32 0.03125, %v1966_v11  ;;  %v2128_v15 = vmax.f32 %v2120_v20, 0.0  ;;  %vm2073_vm11 = vmor %vm2071_vm6, %vm2072_vm3 }
 0x602   : > { %v2064_v12 = vsel %vm2063_vm10, %v3187_v34, %v2060_v46  ;;  %v2067_v21 = vmul.f32 %v3189_v42, %v2066_v36  ;;  %vm2081_vm13 = vweird.f32 %v2013_v62 }
 0x603   : > { %v2099_v54 = vmul.f32 %v2064_v12, %v2003_v53  ;;  %v1990_v35 = vsub.f32 %v1974_v61, %v1982_v44  ;;  %v3107_v47 = vpack.i.bf16 %v2128_v15, %v2127_v2  ;;  %v2939_v44 = vld [vmem:[%s4401_s7 + $0x50] sm:$0xff] }
 0x604   : > { %v2068_v52 = vmul.f32 0.5, %v2067_v21  ;;  %2326 = vmatpush.bf16.msrb.mxu0 %v2939_v44 }
 0x605   : > { %v2110_v41 = vmul.f32 %v4101_v6, %v2099_v54  ;;  %v1998_v9 = vmax.f32 %v1990_v35, 0.0  ;;  %3108 = vrot.lane.b32.xlu1 %v3107_v47, %s3239_s20 }
 0x606   : > { %v2069_v63 = vsub.f32 1.5, %v2068_v52 }
 0x607   : > { %v3191_v14 = vpop.eup %3190  ;;  %v2121_v28 = vadd.f32 %v4108_v39, %v2110_v41  ;;  %v2014_v24 = vadd.f32 1e-08, %v1998_v9 }
 0x608   : > { %v2076_v27 = vmul.f32 %v3191_v14, %v2013_v62  ;;  %v2070_v34 = vmul.f32 %v3189_v42, %v2069_v63  ;;  %vm2082_vm12 = vweird.f32 %v3191_v14  ;;  %v2006_v62 = vsub.f32 %v4080_v56, %v4147_v58  ;;  %v2938_v56 = vld [vmem:[%s4401_s7 + $0x48] sm:$0xff]  ;;  %v2935_v58 = vld [vmem:[%s4401_s7 + $0x30] sm:$0xff] }
 0x609   : > { %v4160_v30 = vmax.f32 %v2121_v28, 0.0  ;;  %3192 = vrsqrt.f32 %v2014_v24  ;;  %vm2083_vm14 = vmor %vm2081_vm13, %vm2082_vm12  ;;  %vm2091_vm0 = vweird.f32 %v2014_v24  ;;  %2327 = vmatpush.bf16.msrb.mxu0 %v2938_v56 }
 0x60a   : > { %v2077_v43 = vmul.f32 %v3191_v14, %v2076_v27  ;;  %v2074_v29 = vsel %vm2073_vm11, %v3189_v42, %v2070_v34 }
 0x60b   : > { %v3112_v48 = vpack.i.bf16 %v4160_v30, %v3240_v16  ;;  %v2100_v8 = vmul.f32 %v2074_v29, %v2004_v59 }
 0x60c   : > { %v2078_v22 = vmul.f32 0.5, %v2077_v43 }
 0x60d   : > { %3113 = vrot.lane.b32.xlu0 %v3112_v48, %s3238_s19  ;;  %v2111_v60 = vmul.f32 %v4101_v6, %v2100_v8 }
 0x60e   : > { %v2079_v25 = vsub.f32 1.5, %v2078_v22 }
 0x60f   : > { %v3193_v57 = vpop.eup %3192  ;;  %v2122_v55 = vadd.f32 %v4108_v39, %v2111_v60 }
 0x610   : > { %v2080_v2 = vmul.f32 %v3191_v14, %v2079_v25  ;;  %v2086_v13 = vmul.f32 %v3193_v57, %v2014_v24  ;;  %vm2092_vm15 = vweird.f32 %v3193_v57 }
 0x611   : > { %v4171_v16 = vmax.f32 %v2122_v55, 0.0  ;;  %vm2093_vm1 = vmor %vm2091_vm0, %vm2092_vm15 }
 0x612   : > { %v2084_v0 = vsel %vm2083_vm14, %v3191_v14, %v2080_v2  ;;  %v2087_v45 = vmul.f32 %v3193_v57, %v2086_v13 }
 0x613   : > { %v2101_v5 = vmul.f32 %v2084_v0, %v2005_v26  ;;  %v3117_v4 = vpack.i.bf16 %v4171_v16, %v4160_v30 }
 0x614   : > { %v2088_v18 = vmul.f32 0.5, %v2087_v45 }
 0x615   : > { %v2112_v50 = vmul.f32 %v4101_v6, %v2101_v5  ;;  %3118 = vrot.lane.b32.xlu2 %v3117_v4, %s3239_s20 }
 0x616   : > { %v2089_v32 = vsub.f32 1.5, %v2088_v18 }
 0x617   : > { %v2123_v19 = vadd.f32 %v4108_v39, %v2112_v50 }
 0x618   : > { %v2090_v33 = vmul.f32 %v3193_v57, %v2089_v32 }
 0x619   : > { %v2131_v7 = vmax.f32 %v2123_v19, 0.0 }
 0x61a   : > { %v2094_v42 = vsel %vm2093_vm1, %v3193_v57, %v2090_v33 }
 0x61b   : > { %v3122_v46 = vpack.i.bf16 %v2131_v7, %v4171_v16  ;;  %v2102_v11 = vmul.f32 %v2094_v42, %v2006_v62 }
 0x61d   : > { %3123 = vrot.lane.b32.xlu1 %v3122_v46, %s3238_s19  ;;  %v2113_v20 = vmul.f32 %v4101_v6, %v2102_v11  ;;  %v2937_v6 = vld [vmem:[%s4401_s7 + $0x40] sm:$0xff] }
 0x61e   : > { %2328 = vmatpush.bf16.msrb.mxu0 %v2937_v6  ;;  %v3142_v11 = vld [vmem:[%s4402_s8 + $0x1] ss:$0 sm:$0xff] }
 0x61f   : > { %v2124_v53 = vadd.f32 %v4108_v39, %v2113_v20  ;;  %v2936_v39 = vld [vmem:[%s4401_s7 + $0x38] sm:$0xff] }
 0x621   : > { %v2132_v36 = vmax.f32 %v2124_v53, 0.0 }
 0x622   : > { %2329 = vmatpush.bf16.msrb.mxu0 %v2936_v39 }
 0x623   : > { %v3127_v12 = vpack.i.bf16 %v2132_v36, %v2131_v7 }
 0x625   : > { %3128 = vrot.lane.b32.xlu0 %v3127_v12, %s3239_s20 }
 0x626   : > { %2330 = vmatpush.bf16.msrb.mxu0 %v2935_v58 }
 0x64f   : > { %v3099_v61 = vpop.permute.xlu2 %3098 }
 0x650   : > { %v3101_v35 = vunpack.i.h.bf16 %v3099_v61  ;;  %v3100_v52 = vunpack.i.l.bf16 %v3099_v61 }
 0x65f   : > { %v3094_v54 = vpop.permute.xlu1 %3093 }
 0x660   : > { %v3096_v21 = vunpack.i.h.bf16 %v3094_v54  ;;  %v3095_v15 = vunpack.i.l.bf16 %v3094_v54 }
 0x662   : > { %v2253_v47 = vsel %vm829_vm7, 0.0, %v3096_v21  ;;  %v2252_v41 = vsel %vm829_vm7, 0.0, %v3095_v15 }
 0x663   : > { %v2261_v9 = vsel %vm838_vm8, %v2253_v47, %v3101_v35  ;;  %v2260_v38 = vsel %vm838_vm8, %v2252_v41, %v3100_v52 }
 0x664   : > { %v2268_v14 = vpack.c.bf16 %v2261_v9, %v2260_v38 }
 0x666   : > { %2896 = vmatmul.msk.bf16.vlgmr.msrb.gmra.mxu0 %vm890_vm9, %v2268_v14 }
 0x66f   : > { %v3104_v63 = vpop.permute.xlu0 %3103  ;;  %v3119_v2 = vpop.permute.xlu2 %3118 }
 0x670   : > { %v3106_v28 = vunpack.i.h.bf16 %v3104_v63  ;;  %v3105_v27 = vunpack.i.l.bf16 %v3104_v63  ;;  %v3121_v13 = vunpack.i.h.bf16 %v3119_v2 }
 0x672   : > { %v2255_v43 = vsel %vm829_vm7, %v4131_v31, %v3106_v28  ;;  %v2254_v29 = vsel %vm829_vm7, %v4118_v1, %v3105_v27  ;;  %v3120_v31 = vunpack.i.l.bf16 %v3119_v2 }
 0x677   : > { %v3109_v24 = vpop.permute.xlu1 %3108 }
 0x678   : > { %v3111_v34 = vunpack.i.h.bf16 %v3109_v24  ;;  %v3110_v59 = vunpack.i.l.bf16 %v3109_v24 }
 0x67a   : > { %v2262_v48 = vsel %vm838_vm8, %v2254_v29, %v3110_v59  ;;  %v2263_v8 = vsel %vm838_vm8, %v2255_v43, %v3111_v34 }
 0x67b   : > { %v2269_v22 = vpack.c.bf16 %v2263_v8, %v2262_v48 }
 0x67d   : > { %2897 = vmatmul.msk.bf16.gmra.mxu0 %vm890_vm9, %v2269_v22 }
 0x67f   : > { %v3114_v25 = vpop.permute.xlu0 %3113 }
 0x680   : > { %v3116_v60 = vunpack.i.h.bf16 %v3114_v25  ;;  %v3115_v57 = vunpack.i.l.bf16 %v3114_v25 }
 0x682   : > { %v2257_v55 = vsel %vm829_vm7, 0.0, %v3116_v60  ;;  %v2256_v26 = vsel %vm829_vm7, 0.0, %v3115_v57 }
 0x683   : > { %v2264_v0 = vsel %vm838_vm8, %v2256_v26, %v3120_v31  ;;  %v2265_v1 = vsel %vm838_vm8, %v2257_v55, %v3121_v13 }
 0x684   : > { %v2270_v45 = vpack.c.bf16 %v2265_v1, %v2264_v0 }
 0x68d   : > { %2898 = vmatmul.msk.bf16.gmra.mxu0 %vm890_vm9, %v2270_v45 }
 0x68f   : > { %v3124_v5 = vpop.permute.xlu1 %3123 }
 0x690   : > { %v3126_v4 = vunpack.i.h.bf16 %v3124_v5  ;;  %v3125_v18 = vunpack.i.l.bf16 %v3124_v5 }
 0x692   : > { %v2259_v33 = vsel %vm829_vm7, %v4171_v16, %v3126_v4  ;;  %v2258_v7 = vsel %vm829_vm7, %v4160_v30, %v3125_v18 }
 0x697   : > { %v3129_v50 = vpop.permute.xlu0 %3128 }
 0x698   : > { %v3131_v32 = vunpack.i.h.bf16 %v3129_v50  ;;  %v3130_v19 = vunpack.i.l.bf16 %v3129_v50 }
 0x69a   : > { %v2266_v62 = vsel %vm838_vm8, %v2258_v7, %v3130_v19  ;;  %v2267_v42 = vsel %vm838_vm8, %v2259_v33, %v3131_v32 }
 0x69b   : > { %v2271_v46 = vpack.c.bf16 %v2267_v42, %v2266_v62 }
 0x69d   : > { %2899 = vmatmul.msk.bf16.gmra.mxu0 %vm890_vm9, %v2271_v46 }
 0x6e3   : > { %v2332_v20 = vpop.f32.mrf.mxu0 }
 0x6e4   : > { %v4227_v53 = vadd.f32 %v3142_v11, %v2332_v20  ;;  %v2942_v20 = vld [vmem:[%s4406_s12 + $0x8] sm:$0xff] }
 0x6e5   : > { %2646 = vmatpush.bf16.msrb.mxu1 %v2942_v20 }
 0x6e6   : > { %v2356_v16 = vsel %vm829_vm7, %v4227_v53, 0.0  ;;  %v2388_v30 = vmul.f32 %v4227_v53, %v4227_v53 }
 0x6e7   : > { %2357 = vadd.xlane.f32.xlu2 %v2356_v16 }
 0x6e8   : > { %v2396_v36 = vsel %vm829_vm7, %v2388_v30, 0.0 }
 0x6e9   : > { %2397 = vadd.xlane.f32.xlu0 %v2396_v36 }
 0x6eb   : > { %v2334_v12 = vpop.f32.mrf.mxu0 }
 0x6ec   : > { %v4234_v44 = vadd.f32 %v3142_v11, %v2334_v12  ;;  %v2941_v12 = vld [vmem:[%s4406_s12] sm:$0xff] }
 0x6ed   : > { %2647 = vmatpush.bf16.msrb.mxu1 %v2941_v12 }
 0x6ee   : > { %v2359_v56 = vsel %vm829_vm7, %v4234_v44, 0.0  ;;  %v2389_v6 = vmul.f32 %v4234_v44, %v4234_v44 }
 0x6ef   : > { %2360 = vadd.xlane.f32.xlu1 %v2359_v56 }
 0x6f0   : > { %v2399_v39 = vsel %vm829_vm7, %v2389_v6, 0.0 }
 0x6f1   : > { %2400 = vadd.xlane.f32.xlu2 %v2399_v39 }
 0x6fa   : > { %v2337_v58 = vpop.f32.mrf.mxu0 }
 0x6fb   : > { %v4241_v61 = vadd.f32 %v3142_v11, %v2337_v58 }
 0x6fd   : > { %v2362_v54 = vsel %vm829_vm7, %v4241_v61, 0.0  ;;  %v2390_v21 = vmul.f32 %v4241_v61, %v4241_v61 }
 0x6fe   : > { %2363 = vadd.xlane.f32.xlu1 %v2362_v54 }
 0x6ff   : > { %v2402_v15 = vsel %vm829_vm7, %v2390_v21, 0.0 }
 0x700   : > { %2403 = vadd.xlane.f32.xlu2 %v2402_v15 }
 0x702   : > { %v2339_v35 = vpop.f32.mrf.mxu0 }
 0x703   : > { %v4248_v52 = vadd.f32 %v3142_v11, %v2339_v35 }
 0x705   : > { %v2365_v47 = vsel %vm829_vm7, %v4248_v52, 0.0  ;;  %v2391_v41 = vmul.f32 %v4248_v52, %v4248_v52 }
 0x706   : > { %2366 = vadd.xlane.f32.xlu0 %v2365_v47 }
 0x707   : > { %v2405_v9 = vsel %vm829_vm7, %v2391_v41, 0.0 }
 0x708   : > { %2406 = vadd.xlane.f32.xlu1 %v2405_v9  ;;  %v4297_v9 = vld [vmem:[%s4403_s9 + $0x1] ss:$0 sm:$0xff] }
 0x70a   : > { %v2342_v38 = vpop.f32.mrf.mxu0 }
 0x70b   : > { %v4255_v14 = vadd.f32 %v3142_v11, %v2342_v38 }
 0x70d   : > { %v2368_v63 = vsel %vm829_vm7, %v4255_v14, 0.0  ;;  %v2392_v28 = vmul.f32 %v4255_v14, %v4255_v14 }
 0x70e   : > { %2369 = vadd.xlane.f32.xlu0 %v2368_v63 }
 0x70f   : > { %v2408_v27 = vsel %vm829_vm7, %v2392_v28, 0.0 }
 0x710   : > { %2409 = vadd.xlane.f32.xlu1 %v2408_v27 }
 0x712   : > { %v2344_v24 = vpop.f32.mrf.mxu0 }
 0x713   : > { %v4262_v34 = vadd.f32 %v3142_v11, %v2344_v24 }
 0x715   : > { %v2371_v59 = vsel %vm829_vm7, %v4262_v34, 0.0  ;;  %v2393_v43 = vmul.f32 %v4262_v34, %v4262_v34 }
 0x716   : > { %2372 = vadd.xlane.f32.xlu2 %v2371_v59 }
 0x717   : > { %v2411_v29 = vsel %vm829_vm7, %v2393_v43, 0.0 }
 0x718   : > { %2412 = vadd.xlane.f32.xlu0 %v2411_v29 }
 0x71a   : > { %v2347_v48 = vpop.f32.mrf.mxu0 }
 0x71b   : > { %v4269_v8 = vadd.f32 %v3142_v11, %v2347_v48  ;;  %v4303_v48 = vld [vmem:[%s4404_s10 + $0x1] ss:$0 sm:$0xff] }
 0x71d   : > { %v2374_v22 = vsel %vm829_vm7, %v4269_v8, 0.0  ;;  %v2394_v25 = vmul.f32 %v4269_v8, %v4269_v8 }
 0x71e   : > { %2375 = vadd.xlane.f32.xlu2 %v2374_v22 }
 0x71f   : > { %v2414_v60 = vsel %vm829_vm7, %v2394_v25, 0.0 }
 0x720   : > { %2415 = vadd.xlane.f32.xlu0 %v2414_v60 }
 0x722   : > { %v2349_v57 = vpop.f32.mrf.mxu0 }
 0x723   : > { %v4276_v2 = vadd.f32 %v3142_v11, %v2349_v57 }
 0x725   : > { %v2377_v55 = vsel %vm829_vm7, %v4276_v2, 0.0  ;;  %v2395_v26 = vmul.f32 %v4276_v2, %v4276_v2 }
 0x726   : > { %2378 = vadd.xlane.f32.xlu1 %v2377_v55 }
 0x727   : > { %v2417_v13 = vsel %vm829_vm7, %v2395_v26, 0.0 }
 0x728   : > { %2418 = vadd.xlane.f32.xlu2 %v2417_v13 }
 0x75a   : > { %v2358_v31 = vpop.xlane.xlu2 %2357 }
 0x75b   : > { %v2380_v0 = vmul.f32 0.03125, %v2358_v31 }
 0x75c   : > { %v2398_v1 = vpop.xlane.xlu0 %2397 }
 0x75d   : > { %v2428_v45 = vmul.f32 %v2380_v0, %v2380_v0  ;;  %v2420_v5 = vmul.f32 0.03125, %v2398_v1  ;;  %v2452_v35 = vsub.f32 %v4227_v53, %v2380_v0 }
 0x75f   : > { %v2436_v4 = vsub.f32 %v2420_v5, %v2428_v45 }
 0x761   : > { %v2444_v18 = vmax.f32 %v2436_v4, 0.0 }
 0x762   : > { %v2361_v50 = vpop.xlane.xlu1 %2360 }
 0x763   : > { %v2460_v32 = vadd.f32 1e-08, %v2444_v18  ;;  %v2381_v19 = vmul.f32 0.03125, %v2361_v50 }
 0x764   : > { %v2401_v33 = vpop.xlane.xlu2 %2400 }
 0x765   : > { %3194 = vrsqrt.f32 %v2460_v32  ;;  %v2429_v7 = vmul.f32 %v2381_v19, %v2381_v19  ;;  %v2421_v62 = vmul.f32 0.03125, %v2401_v33  ;;  %vm2474_vm9 = vweird.f32 %v2460_v32 }
 0x766   : > { %v2453_v31 = vsub.f32 %v4234_v44, %v2381_v19 }
 0x767   : > { %v2437_v42 = vsub.f32 %v2421_v62, %v2429_v7  ;;  %v4314_v62 = vstv %s2902_s25 }
 0x769   : > { %v2445_v46 = vmax.f32 %v2437_v42, 0.0 }
 0x76b   : > { %v3195_v11 = vpop.eup %3194  ;;  %v2461_v30 = vadd.f32 1e-08, %v2445_v46 }
 0x76c   : > { %v2469_v16 = vmul.f32 %v3195_v11, %v2460_v32  ;;  %vm2475_vm8 = vweird.f32 %v3195_v11 }
 0x76d   : > { %3196 = vrsqrt.f32 %v2461_v30  ;;  %vm2476_vm5 = vmor %vm2474_vm9, %vm2475_vm8  ;;  %vm2484_vm4 = vweird.f32 %v2461_v30 }
 0x76e   : > { %v2470_v36 = vmul.f32 %v3195_v11, %v2469_v16 }
 0x770   : > { %v2471_v56 = vmul.f32 0.5, %v2470_v36 }
 0x771   : > { %v2364_v39 = vpop.xlane.xlu1 %2363 }
 0x772   : > { %v2472_v6 = vsub.f32 1.5, %v2471_v56  ;;  %v4289_v58 = vmul.f32 0.03125, %v2364_v39 }
 0x773   : > { %v3197_v54 = vpop.eup %3196  ;;  %v2404_v15 = vpop.xlane.xlu2 %2403 }
 0x774   : > { %v2473_v21 = vmul.f32 %v3195_v11, %v2472_v6  ;;  %v2479_v47 = vmul.f32 %v3197_v54, %v2461_v30  ;;  %v2430_v41 = vmul.f32 %v4289_v58, %v4289_v58  ;;  %v2422_v63 = vmul.f32 0.03125, %v2404_v15 }
 0x775   : > { %vm2485_vm2 = vweird.f32 %v3197_v54 }
 0x776   : > { %v2477_v38 = vsel %vm2476_vm5, %v3195_v11, %v2473_v21  ;;  %v2480_v27 = vmul.f32 %v3197_v54, %v2479_v47  ;;  %v2438_v24 = vsub.f32 %v2422_v63, %v2430_v41  ;;  %vm2486_vm10 = vmor %vm2484_vm4, %vm2485_vm2 }
 0x777   : > { %v2548_v28 = vmul.f32 %v2477_v38, %v2452_v35 }
 0x778   : > { %v2481_v59 = vmul.f32 0.5, %v2480_v27  ;;  %v2446_v29 = vmax.f32 %v2438_v24, 0.0 }
 0x779   : > { %v2559_v43 = vmul.f32 %v4297_v9, %v2548_v28  ;;  %v2367_v53 = vpop.xlane.xlu0 %2366 }
 0x77a   : > { %v2482_v22 = vsub.f32 1.5, %v2481_v59  ;;  %v4305_v25 = vmul.f32 0.03125, %v2367_v53  ;;  %v2462_v60 = vadd.f32 1e-08, %v2446_v29 }
 0x77b   : > { %v2407_v57 = vpop.xlane.xlu1 %2406  ;;  %v2570_v0 = vadd.f32 %v4303_v48, %v2559_v43 }
 0x77c   : > { %v2483_v55 = vmul.f32 %v3197_v54, %v2482_v22  ;;  %v2431_v26 = vmul.f32 %v4305_v25, %v4305_v25  ;;  %v2423_v13 = vmul.f32 0.03125, %v2407_v57  ;;  %3198 = vrsqrt.f32 %v2462_v60 }
 0x77d   : > { %v2578_v32 = vmax.f32 %v2570_v0, 0.0  ;;  %vm2494_vm6 = vweird.f32 %v2462_v60 }
 0x77e   : > { %v2487_v1 = vsel %vm2486_vm10, %v3197_v54, %v2483_v55  ;;  %v2439_v45 = vsub.f32 %v2423_v13, %v2431_v26 }
 0x77f   : > { %v2549_v5 = vmul.f32 %v2487_v1, %v2453_v31  ;;  %v2588_v30 = vmul.f32 %v4314_v62, %v2578_v32 }
 0x780   : > { %v2447_v4 = vmax.f32 %v2439_v45, 0.0  ;;  %v2455_v45 = vsub.f32 %v4248_v52, %v4305_v25 }
 0x781   : > { %v2560_v18 = vmul.f32 %v4297_v9, %v2549_v5  ;;  %v2370_v50 = vpop.xlane.xlu0 %2369  ;;  %v2596_v21 = vadd.f32 %v2588_v30, %v3858_v37  ;;  %v2454_v37 = vsub.f32 %v4241_v61, %v4289_v58 }
 0x782   : > { %v2463_v33 = vadd.f32 1e-08, %v2447_v4  ;;  %v4312_v7 = vmul.f32 0.03125, %v2370_v50  ;;  %v3199_v42 = vpop.eup %3198 }
 0x783   : > { %v2410_v46 = vpop.xlane.xlu1 %2409  ;;  %v2571_v44 = vadd.f32 %v4303_v48, %v2560_v18  ;;  %v2489_v19 = vmul.f32 %v3199_v42, %v2462_v60  ;;  %vm2495_vm3 = vweird.f32 %v3199_v42 }
 0x784   : > { %3200 = vrsqrt.f32 %v2463_v33  ;;  %v2432_v11 = vmul.f32 %v4312_v7, %v4312_v7  ;;  %v2424_v20 = vmul.f32 0.03125, %v2410_v46  ;;  %vm2496_vm11 = vmor %vm2494_vm6, %vm2495_vm3  ;;  %vm2504_vm13 = vweird.f32 %v2463_v33 }
 0x785   : > { %v2579_v16 = vmax.f32 %v2571_v44, 0.0  ;;  %v2490_v36 = vmul.f32 %v3199_v42, %v2489_v19 }
 0x786   : > { %v2440_v12 = vsub.f32 %v2424_v20, %v2432_v11 }
 0x787   : > { %v2589_v56 = vmul.f32 %v4314_v62, %v2579_v16  ;;  %v2491_v6 = vmul.f32 0.5, %v2490_v36 }
 0x788   : > { %v2448_v39 = vmax.f32 %v2440_v12, 0.0 }
 0x789   : > { %v2373_v54 = vpop.xlane.xlu2 %2372  ;;  %v2597_v15 = vadd.f32 %v2589_v56, %v3861_v3  ;;  %v2492_v47 = vsub.f32 1.5, %v2491_v6 }
 0x78a   : > { %v3201_v35 = vpop.eup %3200  ;;  %v4323_v41 = vmul.f32 0.03125, %v2373_v54  ;;  %v2464_v63 = vadd.f32 1e-08, %v2448_v39 }
 0x78b   : > { %v2499_v38 = vmul.f32 %v3201_v35, %v2463_v33  ;;  %v2413_v28 = vpop.xlane.xlu0 %2412  ;;  %v2604_v27 = vpack.c.bf16 %v2597_v15, %v2596_v21  ;;  %v2493_v24 = vmul.f32 %v3199_v42, %v2492_v47  ;;  %vm2505_vm12 = vweird.f32 %v3201_v35 }
 0x78c   : > { %v2433_v59 = vmul.f32 %v4323_v41, %v4323_v41  ;;  %v2425_v43 = vmul.f32 0.03125, %v2413_v28  ;;  %3202 = vrsqrt.f32 %v2464_v63  ;;  %vm2506_vm14 = vmor %vm2504_vm13, %vm2505_vm12  ;;  %vm2514_vm0 = vweird.f32 %v2464_v63 }
 0x78d   : > { %v2500_v3 = vmul.f32 %v3201_v35, %v2499_v38  ;;  %2911 = vmatmul.msk.bf16.vlgmr.msrb.gmra.mxu1 %vm829_vm7, %v2604_v27  ;;  %v2497_v29 = vsel %vm2496_vm11, %v3199_v42, %v2493_v24 }
 0x78e   : > { %v2441_v53 = vsub.f32 %v2425_v43, %v2433_v59  ;;  %v2550_v22 = vmul.f32 %v2497_v29, %v2454_v37 }
 0x78f   : > { %v2501_v57 = vmul.f32 0.5, %v2500_v3 }
 0x790   : > { %v2449_v55 = vmax.f32 %v2441_v53, 0.0  ;;  %v2561_v13 = vmul.f32 %v4297_v9, %v2550_v22 }
 0x791   : > { %v2502_v26 = vsub.f32 1.5, %v2501_v57  ;;  %v2376_v60 = vpop.xlane.xlu2 %2375 }
 0x792   : > { %v2465_v31 = vadd.f32 1e-08, %v2449_v55  ;;  %v4331_v0 = vmul.f32 0.03125, %v2376_v60  ;;  %v3203_v1 = vpop.eup %3202  ;;  %v2572_v4 = vadd.f32 %v4303_v48, %v2561_v13  ;;  %v2457_v55 = vsub.f32 %v4262_v34, %v4323_v41 }
 0x793   : > { %v2503_v61 = vmul.f32 %v3201_v35, %v2502_v26  ;;  %v2416_v58 = vpop.xlane.xlu0 %2415  ;;  %v2509_v5 = vmul.f32 %v3203_v1, %v2464_v63  ;;  %vm2515_vm15 = vweird.f32 %v3203_v1 }
 0x794   : > { %3204 = vrsqrt.f32 %v2465_v31  ;;  %v2434_v50 = vmul.f32 %v4331_v0, %v4331_v0  ;;  %v2426_v32 = vmul.f32 0.03125, %v2416_v58  ;;  %v2580_v11 = vmax.f32 %v2572_v4, 0.0  ;;  %vm2516_vm1 = vmor %vm2514_vm0, %vm2515_vm15 }
 0x795   : > { %v2507_v18 = vsel %vm2506_vm14, %v3201_v35, %v2503_v61  ;;  %v2510_v46 = vmul.f32 %v3203_v1, %v2509_v5  ;;  %v2456_v35 = vsub.f32 %v4255_v14, %v4312_v7  ;;  %vm2524_vm9 = vweird.f32 %v2465_v31 }
 0x796   : > { %v2551_v42 = vmul.f32 %v2507_v18, %v2455_v45  ;;  %v2442_v44 = vsub.f32 %v2426_v32, %v2434_v50  ;;  %v2590_v15 = vmul.f32 %v4314_v62, %v2580_v11  ;;  %v2458_v50 = vsub.f32 %v4269_v8, %v4331_v0 }
 0x797   : > { %v2511_v19 = vmul.f32 0.5, %v2510_v46 }
 0x798   : > { %v2562_v33 = vmul.f32 %v4297_v9, %v2551_v42  ;;  %v2450_v20 = vmax.f32 %v2442_v44, 0.0  ;;  %v2598_v37 = vadd.f32 %v2590_v15, %v3921_v51  ;;  %v3145_v15 = vld [vmem:[%s4407_s13] ss:$0 sm:$0xff] }
 0x799   : > { %v2379_v16 = vpop.xlane.xlu1 %2378  ;;  %v2512_v25 = vsub.f32 1.5, %v2511_v19 }
 0x79a   : > { %v3205_v52 = vpop.eup %3204  ;;  %v4339_v30 = vmul.f32 0.03125, %v2379_v16  ;;  %v2573_v36 = vadd.f32 %v4303_v48, %v2562_v33  ;;  %v2466_v56 = vadd.f32 1e-08, %v2450_v20 }
 0x79b   : > { %v2519_v12 = vmul.f32 %v3205_v52, %v2465_v31  ;;  %v2419_v6 = vpop.xlane.xlu2 %2418  ;;  %v2513_v39 = vmul.f32 %v3203_v1, %v2512_v25  ;;  %vm2525_vm8 = vweird.f32 %v3205_v52 }
 0x79c   : > { %v2435_v54 = vmul.f32 %v4339_v30, %v4339_v30  ;;  %v2427_v21 = vmul.f32 0.03125, %v2419_v6  ;;  %3206 = vrsqrt.f32 %v2466_v56  ;;  %v2581_v38 = vmax.f32 %v2573_v36, 0.0  ;;  %vm2526_vm5 = vmor %vm2524_vm9, %vm2525_vm8 }
 0x79d   : > { %v2520_v47 = vmul.f32 %v3205_v52, %v2519_v12  ;;  %v2517_v28 = vsel %vm2516_vm1, %v3203_v1, %v2513_v39  ;;  %vm2534_vm4 = vweird.f32 %v2466_v56  ;;  %v2459_v8 = vsub.f32 %v4276_v2, %v4339_v30 }
 0x79e   : > { %v2443_v27 = vsub.f32 %v2427_v21, %v2435_v54  ;;  %v2552_v63 = vmul.f32 %v2517_v28, %v2456_v35  ;;  %v2591_v59 = vmul.f32 %v4314_v62, %v2581_v38 }
 0x79f   : > { %v2521_v24 = vmul.f32 0.5, %v2520_v47 }
 0x7a0   : > { %v2451_v43 = vmax.f32 %v2443_v27, 0.0  ;;  %v2599_v29 = vadd.f32 %v2591_v59, %v3933_v49  ;;  %v2563_v53 = vmul.f32 %v4297_v9, %v2552_v63 }
 0x7a1   : > { %v2522_v3 = vsub.f32 1.5, %v2521_v24 }
 0x7a2   : > { %v2467_v14 = vadd.f32 1e-08, %v2451_v43  ;;  %v3207_v7 = vpop.eup %3206  ;;  %v2605_v57 = vpack.c.bf16 %v2599_v29, %v2598_v37  ;;  %v2574_v60 = vadd.f32 %v4303_v48, %v2563_v53 }
 0x7a3   : > { %v2523_v22 = vmul.f32 %v3205_v52, %v2522_v3  ;;  %v2529_v26 = vmul.f32 %v3207_v7, %v2466_v56  ;;  %vm2535_vm2 = vweird.f32 %v3207_v7 }
 0x7a4   : > { %3208 = vrsqrt.f32 %v2467_v14  ;;  %2912 = vmatmul.msk.bf16.gmra.mxu1 %vm829_vm7, %v2605_v57  ;;  %v2582_v58 = vmax.f32 %v2574_v60, 0.0  ;;  %vm2536_vm10 = vmor %vm2534_vm4, %vm2535_vm2  ;;  %vm2544_vm6 = vweird.f32 %v2467_v14 }
 0x7a5   : > { %v2527_v51 = vsel %vm2526_vm5, %v3205_v52, %v2523_v22  ;;  %v2530_v49 = vmul.f32 %v3207_v7, %v2529_v26 }
 0x7a6   : > { %v2553_v13 = vmul.f32 %v2527_v51, %v2457_v55  ;;  %v2592_v18 = vmul.f32 %v4314_v62, %v2582_v58 }
 0x7a7   : > { %v2531_v1 = vmul.f32 0.5, %v2530_v49 }
 0x7a8   : > { %v2564_v61 = vmul.f32 %v4297_v9, %v2553_v13  ;;  %v2600_v33 = vadd.f32 %v2592_v18, %v3955_v17 }
 0x7a9   : > { %v2532_v31 = vsub.f32 1.5, %v2531_v1 }
 0x7aa   : > { %v3209_v45 = vpop.eup %3208  ;;  %v2575_v5 = vadd.f32 %v4303_v48, %v2564_v61 }
 0x7ab   : > { %v2539_v34 = vmul.f32 %v3209_v45, %v2467_v14  ;;  %v2533_v41 = vmul.f32 %v3207_v7, %v2532_v31  ;;  %vm2545_vm3 = vweird.f32 %v3209_v45 }
 0x7ac   : > { %v2583_v4 = vmax.f32 %v2575_v5, 0.0  ;;  %vm2546_vm11 = vmor %vm2544_vm6, %vm2545_vm3 }
 0x7ad   : > { %v2540_v32 = vmul.f32 %v3209_v45, %v2539_v34  ;;  %v2537_v42 = vsel %vm2536_vm10, %v3207_v7, %v2533_v41 }
 0x7ae   : > { %v2593_v46 = vmul.f32 %v4314_v62, %v2583_v4  ;;  %v2554_v44 = vmul.f32 %v2537_v42, %v2458_v50 }
 0x7af   : > { %v2541_v19 = vmul.f32 0.5, %v2540_v32 }
 0x7b0   : > { %v2601_v11 = vadd.f32 %v2593_v46, %v3969_v23  ;;  %v2565_v16 = vmul.f32 %v4297_v9, %v2554_v44 }
 0x7b1   : > { %v2542_v20 = vsub.f32 1.5, %v2541_v19 }
 0x7b2   : > { %v2606_v52 = vpack.c.bf16 %v2601_v11, %v2600_v33  ;;  %v2576_v0 = vadd.f32 %v4303_v48, %v2565_v16 }
 0x7b3   : > { %v2543_v25 = vmul.f32 %v3209_v45, %v2542_v20 }
 0x7b4   : > { %2913 = vmatmul.msk.bf16.gmra.mxu1 %vm829_vm7, %v2606_v52  ;;  %v2584_v12 = vmax.f32 %v2576_v0, 0.0 }
 0x7b5   : > { %v2547_v36 = vsel %vm2546_vm11, %v3209_v45, %v2543_v25 }
 0x7b6   : > { %v2555_v17 = vmul.f32 %v2547_v36, %v2459_v8  ;;  %v2594_v39 = vmul.f32 %v4314_v62, %v2584_v12 }
 0x7b8   : > { %v2566_v23 = vmul.f32 %v4297_v9, %v2555_v17  ;;  %v2602_v2 = vadd.f32 %v2594_v39, %v3963_v40 }
 0x7ba   : > { %v2577_v56 = vadd.f32 %v4303_v48, %v2566_v23 }
 0x7bc   : > { %v2585_v6 = vmax.f32 %v2577_v56, 0.0 }
 0x7be   : > { %v2595_v54 = vmul.f32 %v4314_v62, %v2585_v6 }
 0x7c0   : > { %v2603_v30 = vadd.f32 %v2595_v54, %v3906_v10 }
 0x7c2   : > { %v2607_v21 = vpack.c.bf16 %v2603_v30, %v2602_v2 }
 0x7c4   : > { %2914 = vmatmul.msk.bf16.gmra.mxu1 %vm829_vm7, %v2607_v21 }
 0x80a   : > { %v2649_v9 = vpop.f32.mrf.mxu1 }
 0x80b   : > { %v2650_v48 = vadd.f32 %v3145_v15, %v2649_v9 }
 0x80d   : > { %2669 = vst.msk [vmem:[%s483_s30] sm:$0xff] %vm829_vm7, %v2650_v48 }
 0x812   : > { %v2651_v62 = vpop.f32.mrf.mxu1 }
 0x813   : > { %v2652_v40 = vadd.f32 %v3145_v15, %v2651_v62 }
 0x815   : > { %2670 = vst.msk [vmem:[%s483_s30 + $0x8] sm:$0xff] %vm829_vm7, %v2652_v40 }
 0x821   : > { %v2654_v10 = vpop.f32.mrf.mxu1 }
 0x822   : > { %v2655_v35 = vadd.f32 %v3145_v15, %v2654_v10 }
 0x824   : > { %2671 = vst.msk [vmem:[%s483_s30 + $0x10] sm:$0xff] %vm829_vm7, %v2655_v35 }
 0x829   : > { %v2656_v47 = vpop.f32.mrf.mxu1 }
 0x82a   : > { %v2657_v38 = vadd.f32 %v3145_v15, %v2656_v47 }
 0x82c   : > { %2672 = vst.msk [vmem:[%s483_s30 + $0x18] sm:$0xff] %vm829_vm7, %v2657_v38 }
 0x831   : > { %v2659_v28 = vpop.f32.mrf.mxu1 }
 0x832   : > { %v2660_v27 = vadd.f32 %v3145_v15, %v2659_v28 }
 0x834   : > { %2673 = vst.msk [vmem:[%s483_s30 + $0x20] sm:$0xff] %vm829_vm7, %v2660_v27 }
 0x839   : > { %v2661_v63 = vpop.f32.mrf.mxu1 }
 0x83a   : > { %v2662_v24 = vadd.f32 %v3145_v15, %v2661_v63 }
 0x83c   : > { %2674 = vst.msk [vmem:[%s483_s30 + $0x28] sm:$0xff] %vm829_vm7, %v2662_v24 }
 0x841   : > { %v2664_v59 = vpop.f32.mrf.mxu1 }
 0x842   : > { %v2665_v43 = vadd.f32 %v3145_v15, %v2664_v59 }
 0x844   : > { %2675 = vst.msk [vmem:[%s483_s30 + $0x30] sm:$0xff] %vm829_vm7, %v2665_v43 }
 0x849   : > { %v2666_v37 = vpop.f32.mrf.mxu1 }
 0x84a   : > { %v2667_v3 = vadd.f32 %v3145_v15, %v2666_v37 }
 0x84c   : > { %2676 = vst.msk [vmem:[%s483_s30 + $0x38] sm:$0xff] %vm829_vm7, %v2667_v3 }
 0x84d PF: > { %s25_s29 = sadd.s32 1, %s3235_s29  }
 0x84e   : > { %p22_p7 = scmp.ge.s32.totalorder %s25_s29, 4  }
 0x850   :  { %24 = sbr.rel (!%p22_p7) target bundleno = 1 (0x1), region = 119 }
 0x855   :  { %2699 = vsyncpa [#allocation3], 1 }
 0x856   :  { %2701 = vsyncpa [#allocation3 + $0x1], 1 }

// kernel: tpu_custom_call.1
= control target key start
LH: loop header
LB: loop body
LE: loop exit
PB: predicated region body
PF: predicated region fallthrough
CT: control target
= control target key end

     0   :  { %19 = vsyncpa [#allocation3], 0  ;;  %s3316_s29 = smov 0   ;;  %s4394_s0 = inlined_call_operand.vmem [shape: f32[128,8], index: 0, kind: input, shape index: {}]   ;;  %s4395_s1 = inlined_call_operand.vmem [shape: bf16[8,32], index: 1, kind: input, shape index: {}]   ;;  %s4396_s2 = inlined_call_operand.vmem [shape: f32[1,32], index: 2, kind: input, shape index: {}]   ;;  %s4397_s3 = inlined_call_operand.vmem [shape: bf16[2,96,32], index: 3, kind: input, shape index: {}]   ;;  %s4398_s4 = inlined_call_operand.vmem [shape: f32[2,1,32], index: 4, kind: input, shape index: {}]   ;;  %s4399_s5 = inlined_call_operand.vmem [shape: f32[2,1,32], index: 5, kind: input, shape index: {}]   ;;  %s4400_s6 = inlined_call_operand.vmem [shape: f32[2,1,32], index: 6, kind: input, shape index: {}]   ;;  %s4401_s7 = inlined_call_operand.vmem [shape: bf16[2,96,32], index: 7, kind: input, shape index: {}]   ;;  %s4402_s8 = inlined_call_operand.vmem [shape: f32[2,1,32], index: 8, kind: input, shape index: {}]   ;;  %s4403_s9 = inlined_call_operand.vmem [shape: f32[2,1,32], index: 9, kind: input, shape index: {}]   ;;  %s4404_s10 = inlined_call_operand.vmem [shape: f32[2,1,32], index: 10, kind: input, shape index: {}]   ;;  %s4405_s11 = inlined_call_operand.vmem [shape: f32[2], index: 11, kind: input, shape index: {}]   ;;  %s4406_s12 = inlined_call_operand.vmem [shape: bf16[32,32], index: 12, kind: input, shape index: {}]   ;;  %s4407_s13 = inlined_call_operand.vmem [shape: f32[1,32], index: 13, kind: input, shape index: {}]   ;;  %s4408_s14 = inlined_call_operand.vmem [shape: f32[128,32], index: 14, kind: output, shape index: {}]  }
   0x1 LB: > { %s2745_s30 = sadd.s32 4294967295, %s3235_s29   ;;  %p2747_p0 = scmp.ge.s32.totalorder %s3235_s29, 1  ;;  %s3235_s29 = sphi %s3316_s29, %s25_s29  }
   0x2   : > { %p355_p1 = scmp.lt.s32.totalorder %s3235_s29, 3  ;;  %s397_s17 = sshll.u32 %s4405_s11, 4  ;;  %s398_s17 = int_to_ptr.vmem [resolvable:$true] %s397_s17 }
   0x3   : > { %p2958_p3 = scmp.eq.s32.totalorder %s2745_s30, 0  ;;  %s3237_s18 = smov [#allocation2]  }
   0x4   : > { %p356_p2 = pnand %p2747_p0, %p355_p1 }
   0x6   : > { %p2954_p4 = pneg %p356_p2  ;;  %425 = sbr.rel (%p356_p2) target bundleno = 2125 (0x84d), region = 76 }
   0x8   : > { %p2955_p5 = pnand %p2958_p3, %p2954_p4 }
   0xa   : > { %2957 = dma.vmem_to_smem (!%p2955_p5), %s398_s17, 16, %s3237_s18, [#allocation3]  }
   0xb   : > { %3230 = dma.done.wait (%p2958_p3), [#allocation3], 16  }
   0xc   : > { %3232 = vsyncadd (%p2958_p3), [#allocation3], 4294967280 }
   0xd   : > { %432 = sfence }
   0xe   : > { %v603_v0 = vld [vmem:[%s4395_s1] sm:$0xf]  ;;  %vm621_vm0 = vcmask 1043456   ;;  %s2752_s21 = sshll.u32 %s2745_s30, 3  ;;  %vm608_vm1 = vcmask 64512   ;;  %v494_v17 = vlaneseq  ;;  %v2922_v27 = vld [vmem:[%s4397_s3 + $0x28] sm:$0xff] }
   0xf   : > { %v623_v1 = vsel %vm621_vm0, %v603_v0, 0  ;;  %p474_p6 = scmp.lt.s32.totalorder %s2752_s21, 15  ;;  %v3132_v22 = vld [vmem:[%s4396_s2] ss:$0 sm:$0xff]  ;;  %905 = vmatpush.bf16.msra.mxu1 %v2922_v27  ;;  %2944 = vmatpush.bf16.msra.mxu2 %v2922_v27  ;;  %v2920_v37 = vld [vmem:[%s4397_s3 + $0x18] sm:$0xff]  ;;  %s3238_s19 = smov 32  }
  0x10   : > { %632 = vmatpush.bf16.msra.mxu0 %v623_v1  ;;  %2943 = vmatpush.bf16.msra.mxu3 %v623_v1  ;;  %v3338_v20 = vshrl.u32 %v494_v17, 7  ;;  %v2921_v30 = vld [vmem:[%s4397_s3 + $0x20] sm:$0xff]  ;;  %s3239_s20 = smov 64   ;;  %v2919_v1 = vld [vmem:[%s4397_s3 + $0x10] sm:$0xff]  ;;  %vm829_vm7 = vcmask 261120   ;;  %vm838_vm8 = vcmask 523264  }
  0x11   : > { %s4410_s21 = smov (!%p474_p6, %s2752_s21), 15  ;;  %vm890_vm9 = vcmask 785408   ;;  %s1646_s16 = sld [smem:[#allocation2]] }
  0x12   : > { %s2753_s22 = sshll.u32 %s4410_s21, 3  ;;  %v499_v21 = vadd.s32 32, %v3338_v20  ;;  %vm724_vm3 = vcmp.lt.s32.totalorder %v3338_v20, 1  ;;  %v3377_v41 = vand.u32 31, %v3338_v20  ;;  %vm675_vm5 = vcmp.lt.s32.totalorder %v3338_v20, 2 }
  0x13   : > { %s477_s25 = scalar_lea.vmem %s4394_s0, %s2753_s22  ;;  %906 = vmatpush.bf16.msra.mxu1 %v2921_v30  ;;  %2945 = vmatpush.bf16.msra.mxu2 %v2921_v30  ;;  %s483_s30 = scalar_lea.vmem %s4408_s14, %s2753_s22 }
  0x14   : > { %v486_v2 = vld [vmem:[%s477_s25] sm:$0xff]  ;;  %v487_v3 = vld [vmem:[%s477_s25 + $0x8] sm:$0xff]  ;;  %v488_v8 = vld [vmem:[%s477_s25 + $0x10] sm:$0xff]  ;;  %v3348_v26 = vand.u32 31, %v499_v21  ;;  %vm733_vm4 = vcmp.ge.s32.totalorder %v3377_v41, 1  ;;  %vm684_vm6 = vcmp.ge.s32.totalorder %v3377_v41, 2 }
  0x15   : > { %v490_v4 = vld [vmem:[%s477_s25 + $0x20] sm:$0xff]  ;;  %v599_v5 = vpack.c.bf16 %v487_v3, %v486_v2  ;;  %v491_v6 = vld [vmem:[%s477_s25 + $0x28] sm:$0xff]  ;;  %v489_v9 = vld [vmem:[%s477_s25 + $0x18] sm:$0xff] }
  0x16   : > { %v601_v7 = vpack.c.bf16 %v491_v6, %v490_v4  ;;  %v492_v10 = vld [vmem:[%s477_s25 + $0x30] sm:$0xff]  ;;  %v493_v11 = vld [vmem:[%s477_s25 + $0x38] sm:$0xff]  ;;  %v600_v12 = vpack.c.bf16 %v489_v9, %v488_v8  ;;  %vm737_vm2 = vcmp.ge.s32.totalorder %v3348_v26, 1  ;;  %v2918_v2 = vld [vmem:[%s4397_s3 + $0x8] sm:$0xff]  ;;  %vm688_vm10 = vcmp.ge.s32.totalorder %v3348_v26, 2  ;;  %s2902_s25 = sld [smem:[#allocation2 + $0x1]] }
  0x17   : > { %2756 = vmatmul.msk.bf16.vlgmr.msra.gmra.mxu0 %vm608_vm1, %v599_v5  ;;  %v602_v13 = vpack.c.bf16 %v493_v11, %v492_v10  ;;  %907 = vmatpush.bf16.msra.mxu1 %v2920_v37  ;;  %v2917_v3 = vld [vmem:[%s4397_s3] sm:$0xff] }
  0x18   : > { %2758 = vmatmul.msk.bf16.vlgmr.msra.gmra.mxu3 %vm608_vm1, %v601_v7  ;;  %2946 = vmatpush.bf16.msra.mxu2 %v2920_v37 }
  0x1b   : > { %908 = vmatpush.bf16.msra.mxu1 %v2919_v1 }
  0x1c   : > { %2947 = vmatpush.bf16.msra.mxu2 %v2919_v1 }
  0x1f   : > { %909 = vmatpush.bf16.msra.mxu1 %v2918_v2 }
  0x20   : > { %2948 = vmatpush.bf16.msra.mxu2 %v2918_v2 }
  0x23   : > { %910 = vmatpush.bf16.msra.mxu1 %v2917_v3 }
  0x24   : > { %2949 = vmatpush.bf16.msra.mxu2 %v2917_v3 }
  0x27   : > { %2757 = vmatmul.msk.bf16.gmra.mxu0 %vm608_vm1, %v600_v12 }
  0x28   : > { %2759 = vmatmul.msk.bf16.gmra.mxu3 %vm608_vm1, %v602_v13 }
  0x94   : > { %v634_v14 = vpop.f32.mrf.mxu0 }
  0x95   : > { %v3372_v38 = vadd.f32 %v3132_v22, %v634_v14 }
  0x97   : > { %v716_v48 = vrot.slane %v3372_v38, 7  ;;  %v667_v6 = vrot.slane %v3372_v38, 6 }
  0x9b   : > { %v644_v15 = vpop.f32.mrf.mxu3 }
  0x9c   : > { %v636_v16 = vpop.f32.mrf.mxu0  ;;  %v3344_v23 = vadd.f32 %v3132_v22, %v644_v15 }
  0x9d   : > { %v3365_v35 = vadd.f32 %v3132_v22, %v636_v16 }
  0x9e   : > { %v720_v31 = vrot.slane %v3344_v23, 7  ;;  %v671_v27 = vrot.slane %v3344_v23, 6 }
  0x9f   : > { %v717_v46 = vrot.slane %v3365_v35, 7  ;;  %v2997_v61 = vpack.i.bf16 %v3365_v35, %v3372_v38  ;;  %v668_v7 = vrot.slane %v3365_v35, 6 }
  0xa1   : > { %v731_v53 = vsel %vm724_vm3, %v716_v48, %v717_v46  ;;  %v682_v12 = vsel %vm675_vm5, %v667_v6, %v668_v7 }
  0xa3   : > { %v646_v18 = vpop.f32.mrf.mxu3 }
  0xa4   : > { %v639_v19 = vpop.f32.mrf.mxu0  ;;  %v3346_v24 = vadd.f32 %v3132_v22, %v646_v18 }
  0xa5   : > { %v3395_v55 = vadd.f32 %v3132_v22, %v639_v19 }
  0xa6   : > { %v721_v32 = vrot.slane %v3346_v24, 7  ;;  %v2977_v57 = vpack.i.bf16 %v3346_v24, %v3344_v23 }
  0xa7   : > { %v718_v58 = vrot.slane %v3395_v55, 7 }
  0xa8   : > { %v727_v39 = vsel %vm724_vm3, %v720_v31, %v721_v32 }
  0xa9   : > { %v730_v62 = vsel %vm724_vm3, %v717_v46, %v718_v58 }
  0xab   : > { %v649_v25 = vpop.f32.mrf.mxu3 }
  0xac   : > { %v641_v28 = vpop.f32.mrf.mxu0  ;;  %v3362_v34 = vadd.f32 %v3132_v22, %v649_v25 }
  0xad   : > { %v3353_v29 = vadd.f32 %v3132_v22, %v641_v28  ;;  %v672_v28 = vrot.slane %v3346_v24, 6 }
  0xae   : > { %v722_v45 = vrot.slane %v3362_v34, 7 }
  0xaf   : > { %v719_v33 = vrot.slane %v3353_v29, 7  ;;  %v3007_v0 = vpack.i.bf16 %v3353_v29, %v3395_v55  ;;  %v670_v25 = vrot.slane %v3353_v29, 6  ;;  %v678_v37 = vsel %vm675_vm5, %v671_v27, %v672_v28 }
  0xb0   : > { %v726_v50 = vsel %vm724_vm3, %v721_v32, %v722_v45 }
  0xb1   : > { %v728_v36 = vsel %vm724_vm3, %v719_v33, %v720_v31  ;;  %v729_v59 = vsel %vm724_vm3, %v718_v58, %v719_v33  ;;  %v679_v32 = vsel %vm675_vm5, %v670_v25, %v671_v27 }
  0xb2   : > { %v761_v40 = vsel %vm737_vm2, %v728_v36, 0.0  ;;  %v3002_v63 = vpack.i.bf16 %v729_v59, %v730_v62 }
  0xb3   : > { %v651_v42 = vpop.f32.mrf.mxu3  ;;  %v2972_v43 = vpack.i.bf16 %v727_v39, %v761_v40  ;;  %v712_v39 = vsel %vm688_vm10, %v679_v32, 0.0 }
  0xb4   : > { %v3379_v44 = vadd.f32 %v3132_v22, %v651_v42 }
  0xb5   : > { %2973 = vrot.lane.b32.xlu0 %v2972_v43, %s3238_s19 }
  0xb6   : > { %v723_v47 = vrot.slane %v3379_v44, 7  ;;  %v2987_v60 = vpack.i.bf16 %v3379_v44, %v3362_v34  ;;  %v674_v5 = vrot.slane %v3379_v44, 6 }
  0xb8   : > { %v725_v49 = vsel %vm724_vm3, %v722_v45, %v723_v47  ;;  %v732_v51 = vsel %vm724_vm3, %v723_v47, %v716_v48  ;;  %v683_v10 = vsel %vm675_vm5, %v674_v5, %v667_v6 }
  0xb9   : > { %v2982_v52 = vpack.i.bf16 %v725_v49, %v726_v50  ;;  %v757_v54 = vsel %vm733_vm4, %v732_v51, 0.0  ;;  %v708_v13 = vsel %vm684_vm6, %v683_v10, 0.0  ;;  %v669_v51 = vrot.slane %v3395_v55, 6 }
  0xba   : > { %v2992_v56 = vpack.i.bf16 %v731_v53, %v757_v54  ;;  %vm1185_vm4 = vcmp.lt.s32.totalorder %v3338_v20, 4  ;;  %v2929_v20 = vld [vmem:[%s4397_s3 + $0x30] sm:$0xff] }
  0xbb   : > { %2983 = vrot.lane.b32.xlu1 %v2982_v52, %s3238_s19  ;;  %v673_v52 = vrot.slane %v3362_v34, 6 }
  0xbc   : > { %2993 = vrot.lane.b32.xlu2 %v2992_v56, %s3238_s19 }
  0xbd   : > { %2978 = vrot.lane.b32.xlu0 %v2977_v57, %s3239_s20 }
  0xc3   : > { %2988 = vrot.lane.b32.xlu1 %v2987_v60, %s3239_s20  ;;  %v677_v60 = vsel %vm675_vm5, %v672_v28, %v673_v52 }
  0xc4   : > { %2998 = vrot.lane.b32.xlu2 %v2997_v61, %s3239_s20  ;;  %v681_v61 = vsel %vm675_vm5, %v668_v7, %v669_v51 }
  0xc5   : > { %3003 = vrot.lane.b32.xlu0 %v3002_v63, %s3238_s19  ;;  %v676_v63 = vsel %vm675_vm5, %v673_v52, %v674_v5 }
  0xcb   : > { %3008 = vrot.lane.b32.xlu1 %v3007_v0, %s3239_s20  ;;  %v680_v0 = vsel %vm675_vm5, %v669_v51, %v670_v25 }
 0x116   : > { %v2994_v4 = vpop.permute.xlu2 %2993 }
 0x117   : > { %v2996_v8 = vunpack.i.h.bf16 %v2994_v4  ;;  %v2995_v9 = vunpack.i.l.bf16 %v2994_v4 }
 0x119   : > { %v830_v16 = vsel %vm829_vm7, %v708_v13, %v2995_v9  ;;  %v831_v17 = vsel %vm829_vm7, %v682_v12, %v2996_v8  ;;  %v3133_v13 = vld [vmem:[%s4398_s4] ss:$0 sm:$0xff] }
 0x11e   : > { %v2999_v11 = vpop.permute.xlu2 %2998 }
 0x11f   : > { %v3001_v14 = vunpack.i.h.bf16 %v2999_v11  ;;  %v3000_v15 = vunpack.i.l.bf16 %v2999_v11 }
 0x121   : > { %v839_v18 = vsel %vm838_vm8, %v830_v16, %v3000_v15  ;;  %v840_v19 = vsel %vm838_vm8, %v831_v17, %v3001_v14 }
 0x122   : > { %v847_v21 = vpack.c.bf16 %v840_v19, %v839_v18 }
 0x124   : > { %2784 = vmatmul.msk.bf16.vlgmr.msra.gmra.mxu1 %vm890_vm9, %v847_v21 }
 0x127   : > { %v2974_v22 = vpop.permute.xlu0 %2973 }
 0x128   : > { %v2976_v30 = vunpack.i.h.bf16 %v2974_v22  ;;  %v2975_v31 = vunpack.i.l.bf16 %v2974_v22 }
 0x12a   : > { %v835_v43 = vsel %vm829_vm7, %v678_v37, %v2976_v30  ;;  %v834_v45 = vsel %vm829_vm7, %v712_v39, %v2975_v31 }
 0x12d   : > { %v2984_v33 = vpop.permute.xlu1 %2983 }
 0x12e   : > { %v2986_v53 = vunpack.i.h.bf16 %v2984_v33  ;;  %v2985_v54 = vunpack.i.l.bf16 %v2984_v33 }
 0x12f   : > { %v2979_v36 = vpop.permute.xlu0 %2978 }
 0x130   : > { %v2981_v40 = vunpack.i.h.bf16 %v2979_v36  ;;  %v2980_v42 = vunpack.i.l.bf16 %v2979_v36  ;;  %v837_v3 = vsel %vm829_vm7, %v676_v63, %v2986_v53  ;;  %v836_v4 = vsel %vm829_vm7, %v677_v60, %v2985_v54 }
 0x132   : > { %v843_v46 = vsel %vm838_vm8, %v834_v45, %v2980_v42  ;;  %v844_v47 = vsel %vm838_vm8, %v835_v43, %v2981_v40 }
 0x133   : > { %v849_v48 = vpack.c.bf16 %v844_v47, %v843_v46 }
 0x135   : > { %v2989_v49 = vpop.permute.xlu1 %2988  ;;  %2786 = vmatmul.msk.bf16.vlgmr.msra.gmra.mxu2 %vm890_vm9, %v849_v48 }
 0x136   : > { %v2991_v58 = vunpack.i.h.bf16 %v2989_v49  ;;  %v2990_v59 = vunpack.i.l.bf16 %v2989_v49 }
 0x137   : > { %v3004_v50 = vpop.permute.xlu0 %3003 }
 0x138   : > { %v3006_v56 = vunpack.i.h.bf16 %v3004_v50  ;;  %v3005_v57 = vunpack.i.l.bf16 %v3004_v50  ;;  %v845_v10 = vsel %vm838_vm8, %v836_v4, %v2990_v59  ;;  %v846_v5 = vsel %vm838_vm8, %v837_v3, %v2991_v58 }
 0x139   : > { %v850_v12 = vpack.c.bf16 %v846_v5, %v845_v10 }
 0x13a   : > { %v833_v6 = vsel %vm829_vm7, %v680_v0, %v3006_v56  ;;  %v832_v8 = vsel %vm829_vm7, %v681_v61, %v3005_v57 }
 0x13d   : > { %v3009_v62 = vpop.permute.xlu1 %3008 }
 0x13e   : > { %v3011_v1 = vunpack.i.h.bf16 %v3009_v62  ;;  %v3010_v2 = vunpack.i.l.bf16 %v3009_v62 }
 0x140   : > { %v841_v9 = vsel %vm838_vm8, %v832_v8, %v3010_v2  ;;  %v842_v7 = vsel %vm838_vm8, %v833_v6, %v3011_v1 }
 0x141   : > { %v848_v11 = vpack.c.bf16 %v842_v7, %v841_v9 }
 0x143   : > { %2785 = vmatmul.msk.bf16.gmra.mxu1 %vm890_vm9, %v848_v11 }
 0x145   : > { %2787 = vmatmul.msk.bf16.gmra.mxu2 %vm890_vm9, %v850_v12 }
 0x1a1   : > { %v912_v14 = vpop.f32.mrf.mxu1 }
 0x1a2   : > { %v3480_v15 = vadd.f32 %v3133_v13, %v912_v14 }
 0x1a4   : > { %v934_v16 = vsel %vm829_vm7, %v3480_v15, 0.0  ;;  %v966_v17 = vmul.f32 %v3480_v15, %v3480_v15 }
 0x1a5   : > { %935 = vadd.xlane.f32.xlu2 %v934_v16 }
 0x1a6   : > { %v974_v22 = vsel %vm829_vm7, %v966_v17, 0.0 }
 0x1a9   : > { %v914_v18 = vpop.f32.mrf.mxu1 }
 0x1aa   : > { %v3486_v19 = vadd.f32 %v3133_v13, %v914_v18 }
 0x1ac   : > { %v937_v21 = vsel %vm829_vm7, %v3486_v19, 0.0  ;;  %v967_v51 = vmul.f32 %v3486_v19, %v3486_v19 }
 0x1ad   : > { %938 = vadd.xlane.f32.xlu1 %v937_v21  ;;  %975 = vadd.xlane.f32.xlu2 %v974_v22 }
 0x1ae   : > { %v977_v53 = vsel %vm829_vm7, %v967_v51, 0.0 }
 0x1b8   : > { %v922_v25 = vpop.f32.mrf.mxu2 }
 0x1b9   : > { %v3499_v39 = vadd.f32 %v3133_v13, %v922_v25 }
 0x1bb   : > { %v970_v45 = vmul.f32 %v3499_v39, %v3499_v39  ;;  %v946_v60 = vsel %vm829_vm7, %v3499_v39, 0.0 }
 0x1bd   : > { %v986_v49 = vsel %vm829_vm7, %v970_v45, 0.0 }
 0x1c0   : > { %v917_v27 = vpop.f32.mrf.mxu1  ;;  %v924_v28 = vpop.f32.mrf.mxu2 }
 0x1c1   : > { %v3491_v30 = vadd.f32 %v3133_v13, %v917_v27  ;;  %v3525_v59 = vadd.f32 %v3133_v13, %v924_v28 }
 0x1c3   : > { %v940_v31 = vsel %vm829_vm7, %v3491_v30, 0.0  ;;  %v968_v57 = vmul.f32 %v3491_v30, %v3491_v30  ;;  %v971_v61 = vmul.f32 %v3525_v59, %v3525_v59  ;;  %v949_v62 = vsel %vm829_vm7, %v3525_v59, 0.0 }
 0x1c4   : > { %941 = vadd.xlane.f32.xlu1 %v940_v31 }
 0x1c5   : > { %v980_v58 = vsel %vm829_vm7, %v968_v57, 0.0  ;;  %v989_v63 = vsel %vm829_vm7, %v971_v61, 0.0  ;;  %v3552_v57 = vld [vmem:[%s4399_s5] ss:$0 sm:$0xff] }
 0x1c8   : > { %v919_v32 = vpop.f32.mrf.mxu1  ;;  %v927_v33 = vpop.f32.mrf.mxu2 }
 0x1c9   : > { %v3495_v36 = vadd.f32 %v3133_v13, %v919_v32  ;;  %v3510_v48 = vadd.f32 %v3133_v13, %v927_v33 }
 0x1cb   : > { %v969_v37 = vmul.f32 %v3495_v36, %v3495_v36  ;;  %v972_v52 = vmul.f32 %v3510_v48, %v3510_v48  ;;  %v943_v56 = vsel %vm829_vm7, %v3495_v36, 0.0  ;;  %v952_v0 = vsel %vm829_vm7, %v3510_v48, 0.0 }
 0x1cd   : > { %v983_v40 = vsel %vm829_vm7, %v969_v37, 0.0  ;;  %v992_v54 = vsel %vm829_vm7, %v972_v52, 0.0 }
 0x1ce   : > { %984 = vadd.xlane.f32.xlu1 %v983_v40 }
 0x1d0   : > { %v929_v42 = vpop.f32.mrf.mxu2 }
 0x1d1   : > { %v3502_v43 = vadd.f32 %v3133_v13, %v929_v42 }
 0x1d3   : > { %v955_v46 = vsel %vm829_vm7, %v3502_v43, 0.0  ;;  %v973_v47 = vmul.f32 %v3502_v43, %v3502_v43 }
 0x1d4   : > { %956 = vadd.xlane.f32.xlu0 %v955_v46 }
 0x1d5   : > { %v995_v50 = vsel %vm829_vm7, %v973_v47, 0.0 }
 0x1d6   : > { %987 = vadd.xlane.f32.xlu1 %v986_v49  ;;  %996 = vadd.xlane.f32.xlu2 %v995_v50 }
 0x1dc   : > { %978 = vadd.xlane.f32.xlu0 %v977_v53 }
 0x1de   : > { %993 = vadd.xlane.f32.xlu1 %v992_v54  ;;  %944 = vadd.xlane.f32.xlu2 %v943_v56 }
 0x1e4   : > { %981 = vadd.xlane.f32.xlu0 %v980_v58 }
 0x1e6   : > { %947 = vadd.xlane.f32.xlu2 %v946_v60 }
 0x1ec   : > { %950 = vadd.xlane.f32.xlu0 %v949_v62 }
 0x1ee   : > { %990 = vadd.xlane.f32.xlu2 %v989_v63 }
 0x1f4   : > { %953 = vadd.xlane.f32.xlu0 %v952_v0 }
 0x218   : > { %v936_v1 = vpop.xlane.xlu2 %935 }
 0x219   : > { %v958_v3 = vmul.f32 0.03125, %v936_v1 }
 0x21b   : > { %v1006_v6 = vmul.f32 %v958_v3, %v958_v3  ;;  %v1030_v50 = vsub.f32 %v3480_v15, %v958_v3  ;;  %v3564_v3 = vld [vmem:[%s4400_s6] ss:$0 sm:$0xff] }
 0x220   : > { %v976_v2 = vpop.xlane.xlu2 %975  ;;  %v939_v11 = vpop.xlane.xlu1 %938 }
 0x221   : > { %v998_v4 = vmul.f32 0.03125, %v976_v2  ;;  %v3540_v27 = vmul.f32 0.03125, %v939_v11 }
 0x223   : > { %v1014_v8 = vsub.f32 %v998_v4, %v1006_v6  ;;  %v1007_v40 = vmul.f32 %v3540_v27, %v3540_v27 }
 0x225   : > { %v1022_v9 = vmax.f32 %v1014_v8, 0.0 }
 0x227   : > { %v1038_v7 = vadd.f32 1e-08, %v1022_v9 }
 0x229   : > { %3146 = vrsqrt.f32 %v1038_v7  ;;  %vm1052_vm12 = vweird.f32 %v1038_v7 }
 0x22f   : > { %v3147_v10 = vpop.eup %3146 }
 0x230   : > { %v1047_v5 = vmul.f32 %v3147_v10, %v1038_v7  ;;  %vm1053_vm11 = vweird.f32 %v3147_v10 }
 0x231   : > { %vm1054_vm13 = vmor %vm1052_vm12, %vm1053_vm11 }
 0x232   : > { %v1048_v12 = vmul.f32 %v3147_v10, %v1047_v5 }
 0x234   : > { %v1049_v13 = vmul.f32 0.5, %v1048_v12 }
 0x236   : > { %v1050_v21 = vsub.f32 1.5, %v1049_v13 }
 0x237   : > { %v942_v14 = vpop.xlane.xlu1 %941 }
 0x238   : > { %v1051_v31 = vmul.f32 %v3147_v10, %v1050_v21  ;;  %v3547_v52 = vmul.f32 0.03125, %v942_v14 }
 0x23a   : > { %v1055_v47 = vsel %vm1054_vm13, %v3147_v10, %v1051_v31  ;;  %v1008_v63 = vmul.f32 %v3547_v52, %v3547_v52 }
 0x23b   : > { %v1126_v54 = vmul.f32 %v1055_v47, %v1030_v50 }
 0x23d   : > { %v1137_v8 = vmul.f32 %v3552_v57, %v1126_v54 }
 0x241   : > { %v985_v33 = vpop.xlane.xlu1 %984 }
 0x242   : > { %v1001_v56 = vmul.f32 0.03125, %v985_v33 }
 0x247   : > { %v957_v16 = vpop.xlane.xlu0 %956 }
 0x248   : > { %v3536_v17 = vmul.f32 0.03125, %v957_v16  ;;  %v1148_v16 = vadd.f32 %v3564_v3, %v1137_v8 }
 0x249   : > { %v997_v18 = vpop.xlane.xlu2 %996  ;;  %v988_v1 = vpop.xlane.xlu1 %987 }
 0x24a   : > { %v1013_v22 = vmul.f32 %v3536_v17, %v3536_v17  ;;  %v1005_v25 = vmul.f32 0.03125, %v997_v18  ;;  %v1002_v11 = vmul.f32 0.03125, %v988_v1  ;;  %v1037_v47 = vsub.f32 %v3502_v43, %v3536_v17 }
 0x24b   : > { %v1032_v1 = vsub.f32 %v3491_v30, %v3547_v52 }
 0x24c   : > { %v1021_v28 = vsub.f32 %v1005_v25, %v1013_v22 }
 0x24e   : > { %v1029_v32 = vmax.f32 %v1021_v28, 0.0 }
 0x24f   : > { %v979_v37 = vpop.xlane.xlu0 %978 }
 0x250   : > { %v1045_v42 = vadd.f32 1e-08, %v1029_v32  ;;  %v999_v45 = vmul.f32 0.03125, %v979_v37 }
 0x251   : > { %v945_v46 = vpop.xlane.xlu2 %944  ;;  %v994_v43 = vpop.xlane.xlu1 %993 }
 0x252   : > { %3148 = vrsqrt.f32 %v1045_v42  ;;  %v1015_v49 = vsub.f32 %v999_v45, %v1007_v40  ;;  %v3545_v51 = vmul.f32 0.03125, %v945_v46  ;;  %vm1122_vm15 = vweird.f32 %v1045_v42 }
 0x253   : > { %v3581_v46 = vmax.f32 %v1148_v16, 0.0 }
 0x254   : > { %v1023_v53 = vmax.f32 %v1015_v49, 0.0  ;;  %v1009_v58 = vmul.f32 %v3545_v51, %v3545_v51 }
 0x256   : > { %v3556_v60 = vadd.f32 1e-08, %v1023_v53  ;;  %v1017_v61 = vsub.f32 %v1001_v56, %v1009_v58 }
 0x257   : > { %v982_v62 = vpop.xlane.xlu0 %981 }
 0x258   : > { %v3149_v15 = vpop.eup %3148  ;;  %3150 = vrsqrt.f32 %v3556_v60  ;;  %v1000_v0 = vmul.f32 0.03125, %v982_v62  ;;  %v1025_v4 = vmax.f32 %v1017_v61, 0.0  ;;  %v1031_v62 = vsub.f32 %v3486_v19, %v3540_v27 }
 0x259   : > { %v1117_v2 = vmul.f32 %v3149_v15, %v1045_v42  ;;  %v948_v6 = vpop.xlane.xlu2 %947  ;;  %vm1123_vm14 = vweird.f32 %v3149_v15  ;;  %vm1062_vm2 = vweird.f32 %v3556_v60  ;;  %v1004_v27 = vmul.f32 0.03125, %v994_v43 }
 0x25a   : > { %v1016_v9 = vsub.f32 %v1000_v0, %v1008_v63  ;;  %v3567_v7 = vmul.f32 0.03125, %v948_v6  ;;  %v3569_v5 = vadd.f32 1e-08, %v1025_v4  ;;  %vm1124_vm0 = vmor %vm1122_vm15, %vm1123_vm14  ;;  %v1226_v4 = vrot.slane %v3581_v46, 6 }
 0x25b   : > { %v1118_v10 = vmul.f32 %v3149_v15, %v1117_v2 }
 0x25c   : > { %v1024_v12 = vmax.f32 %v1016_v9, 0.0  ;;  %v1010_v13 = vmul.f32 %v3567_v7, %v3567_v7  ;;  %3152 = vrsqrt.f32 %v3569_v5  ;;  %vm1082_vm12 = vweird.f32 %v3569_v5 }
 0x25d   : > { %v1119_v14 = vmul.f32 0.5, %v1118_v10 }
 0x25e   : > { %v3151_v18 = vpop.eup %3150  ;;  %v3575_v21 = vadd.f32 1e-08, %v1024_v12  ;;  %v1018_v22 = vsub.f32 %v1002_v11, %v1010_v13  ;;  %v1177_v12 = vrot.slane %v3581_v46, 4 }
 0x25f   : > { %v1120_v25 = vsub.f32 1.5, %v1119_v14  ;;  %v1057_v28 = vmul.f32 %v3151_v18, %v3556_v60  ;;  %v951_v31 = vpop.xlane.xlu0 %950  ;;  %vm1063_vm1 = vweird.f32 %v3151_v18 }
 0x260   : > { %3154 = vrsqrt.f32 %v3575_v21  ;;  %v1026_v32 = vmax.f32 %v1018_v22, 0.0  ;;  %v3579_v33 = vmul.f32 0.03125, %v951_v31  ;;  %vm1064_vm3 = vmor %vm1062_vm2, %vm1063_vm1  ;;  %vm1072_vm15 = vweird.f32 %v3575_v21 }
 0x261   : > { %v1121_v37 = vmul.f32 %v3149_v15, %v1120_v25  ;;  %v1058_v40 = vmul.f32 %v3151_v18, %v1057_v28  ;;  %v991_v45 = vpop.xlane.xlu2 %990  ;;  %v1033_v28 = vsub.f32 %v3495_v36, %v3545_v51 }
 0x262   : > { %v3585_v49 = vadd.f32 1e-08, %v1026_v32  ;;  %v1011_v50 = vmul.f32 %v3579_v33, %v3579_v33  ;;  %v1003_v53 = vmul.f32 0.03125, %v991_v45  ;;  %v3153_v54 = vpop.eup %3152 }
 0x263   : > { %v1125_v56 = vsel %vm1124_vm0, %v3149_v15, %v1121_v37  ;;  %v1059_v58 = vmul.f32 0.5, %v1058_v40  ;;  %v1077_v42 = vmul.f32 %v3153_v54, %v3569_v5  ;;  %vm1083_vm11 = vweird.f32 %v3153_v54 }
 0x264   : > { %v1133_v61 = vmul.f32 %v1125_v56, %v1037_v47  ;;  %3156 = vrsqrt.f32 %v3585_v49  ;;  %v1019_v17 = vsub.f32 %v1003_v53, %v1011_v50  ;;  %vm1084_vm13 = vmor %vm1082_vm12, %vm1083_vm11  ;;  %vm1092_vm2 = vweird.f32 %v3585_v49 }
 0x265   : > { %v1060_v63 = vsub.f32 1.5, %v1059_v58  ;;  %v1078_v15 = vmul.f32 %v3153_v54, %v1077_v42 }
 0x266   : > { %v3155_v0 = vpop.eup %3154  ;;  %v1144_v2 = vmul.f32 %v3552_v57, %v1133_v61  ;;  %v1027_v9 = vmax.f32 %v1019_v17, 0.0 }
 0x267   : > { %v1061_v6 = vmul.f32 %v3151_v18, %v1060_v63  ;;  %v1067_v8 = vmul.f32 %v3155_v0, %v3575_v21  ;;  %v954_v19 = vpop.xlane.xlu0 %953  ;;  %v1079_v10 = vmul.f32 0.5, %v1078_v15  ;;  %vm1073_vm14 = vweird.f32 %v3155_v0 }
 0x268   : > { %v3599_v11 = vmul.f32 0.03125, %v954_v19  ;;  %v3602_v13 = vadd.f32 1e-08, %v1027_v9  ;;  %v1155_v14 = vadd.f32 %v3564_v3, %v1144_v2  ;;  %vm1074_vm0 = vmor %vm1072_vm15, %vm1073_vm14 }
 0x269   : > { %v1065_v30 = vsel %vm1064_vm3, %v3151_v18, %v1061_v6  ;;  %v1068_v52 = vmul.f32 %v3155_v0, %v1067_v8  ;;  %v1080_v22 = vsub.f32 1.5, %v1079_v10  ;;  %v1034_v6 = vsub.f32 %v3499_v39, %v3567_v7 }
 0x26a   : > { %v3157_v16 = vpop.eup %3156  ;;  %v1127_v60 = vmul.f32 %v1065_v30, %v1031_v62  ;;  %v1012_v25 = vmul.f32 %v3599_v11, %v3599_v11  ;;  %3158 = vrsqrt.f32 %v3602_v13  ;;  %v3614_v50 = vmax.f32 %v1155_v14, 0.0 }
 0x26b   : > { %v1069_v31 = vmul.f32 0.5, %v1068_v52  ;;  %v1087_v18 = vmul.f32 %v3157_v16, %v3585_v49  ;;  %v1081_v32 = vmul.f32 %v3153_v54, %v1080_v22  ;;  %vm1093_vm1 = vweird.f32 %v3157_v16 }
 0x26c   : > { %v1020_v37 = vsub.f32 %v1004_v27, %v1012_v25  ;;  %v1138_v40 = vmul.f32 %v3552_v57, %v1127_v60  ;;  %v1233_v5 = vrot.slane %v3614_v50, 6  ;;  %v1184_v63 = vrot.slane %v3614_v50, 4  ;;  %vm1094_vm3 = vmor %vm1092_vm2, %vm1093_vm1 }
 0x26d   : > { %v1070_v45 = vsub.f32 1.5, %v1069_v31  ;;  %v1088_v47 = vmul.f32 %v3157_v16, %v1087_v18  ;;  %v1085_v53 = vsel %vm1084_vm13, %v3153_v54, %v1081_v32  ;;  %vm1102_vm11 = vweird.f32 %v3602_v13 }
 0x26e   : > { %v1028_v36 = vmax.f32 %v1020_v37, 0.0  ;;  %v1149_v51 = vadd.f32 %v3564_v3, %v1138_v40  ;;  %v1129_v56 = vmul.f32 %v1085_v53, %v1033_v28  ;;  %v1241_v2 = vsel %vm675_vm5, %v1233_v5, %v1226_v4 }
 0x26f   : > { %v1071_v58 = vmul.f32 %v3155_v0, %v1070_v45  ;;  %v1089_v61 = vmul.f32 0.5, %v1088_v47  ;;  %v1242_v39 = vsel %vm684_vm6, %v1241_v2, 0.0  ;;  %v3650_v49 = vsel %vm1185_vm4, %v1184_v63, %v1177_v12 }
 0x270   : > { %v3619_v42 = vadd.f32 1e-08, %v1028_v36  ;;  %v1157_v62 = vmax.f32 %v1149_v51, 0.0  ;;  %v3159_v43 = vpop.eup %3158  ;;  %v1140_v54 = vmul.f32 %v3552_v57, %v1129_v56 }
 0x271   : > { %v1075_v17 = vsel %vm1074_vm0, %v3155_v0, %v1071_v58  ;;  %v1090_v21 = vsub.f32 1.5, %v1089_v61  ;;  %v1097_v8 = vmul.f32 %v3159_v43, %v3602_v13  ;;  %v2928_v0 = vld [vmem:[%s4401_s7 + $0x28] sm:$0xff]  ;;  %vm1103_vm6 = vweird.f32 %v3159_v43 }
 0x272   : > { %v1128_v15 = vmul.f32 %v1075_v17, %v1032_v1  ;;  %3160 = vrsqrt.f32 %v3619_v42  ;;  %v1151_v9 = vadd.f32 %v3564_v3, %v1140_v54  ;;  %v3017_v27 = vpack.i.bf16 %v1157_v62, %v3581_v46  ;;  %1387 = vmatpush.bf16.msrb.mxu2 %v2928_v0  ;;  %vm1104_vm12 = vmor %vm1102_vm11, %vm1103_vm6 }
 0x273   : > { %v1091_v19 = vmul.f32 %v3157_v16, %v1090_v21  ;;  %v1098_v1 = vmul.f32 %v3159_v43, %v1097_v8  ;;  %v1227_v10 = vrot.slane %v1157_v62, 6  ;;  %v1178_v14 = vrot.slane %v1157_v62, 4 }
 0x274   : > { %v1139_v7 = vmul.f32 %v3552_v57, %v1128_v15  ;;  %3018 = vrot.lane.b32.xlu0 %v3017_v27, %s3239_s20  ;;  %v1159_v52 = vmax.f32 %v1151_v9, 0.0  ;;  %vm1112_vm14 = vweird.f32 %v3619_v42  ;;  %v1036_v27 = vsub.f32 %v3510_v48, %v3599_v11 }
 0x275   : > { %v1095_v30 = vsel %vm1094_vm3, %v3157_v16, %v1091_v19  ;;  %v1099_v22 = vmul.f32 0.5, %v1098_v1  ;;  %v1240_v25 = vsel %vm675_vm5, %v1226_v4, %v1227_v10  ;;  %v3661_v31 = vsel %vm1185_vm4, %v1177_v12, %v1178_v14 }
 0x276   : > { %v1130_v60 = vmul.f32 %v1095_v30, %v1034_v6  ;;  %v1150_v16 = vadd.f32 %v3564_v3, %v1139_v7  ;;  %v3012_v28 = vpack.i.bf16 %v1240_v25, %v1242_v39  ;;  %v1229_v4 = vrot.slane %v1159_v52, 6 }
 0x277   : > { %v1100_v37 = vsub.f32 1.5, %v1099_v22  ;;  %v1035_v12 = vsub.f32 %v3525_v59, %v3579_v33  ;;  %v1180_v56 = vrot.slane %v1159_v52, 4 }
 0x278   : > { %v3161_v18 = vpop.eup %3160  ;;  %v1141_v32 = vmul.f32 %v3552_v57, %v1130_v60  ;;  %v1158_v40 = vmax.f32 %v1150_v16, 0.0  ;;  %3013 = vrot.lane.b32.xlu2 %v3012_v28, %s3238_s19 }
 0x279   : > { %v1107_v45 = vmul.f32 %v3161_v18, %v3619_v42  ;;  %v1101_v46 = vmul.f32 %v3159_v43, %v1100_v37  ;;  %vm1113_vm13 = vweird.f32 %v3161_v18 }
 0x27a   : > { %v1152_v47 = vadd.f32 %v3564_v3, %v1141_v32  ;;  %v3027_v53 = vpack.i.bf16 %v1159_v52, %v1158_v40  ;;  %v1228_v36 = vrot.slane %v1158_v40, 6  ;;  %v1179_v58 = vrot.slane %v1158_v40, 4  ;;  %vm1114_vm15 = vmor %vm1112_vm14, %vm1113_vm13 }
 0x27b   : > { %v1108_v51 = vmul.f32 %v3161_v18, %v1107_v45  ;;  %v1105_v61 = vsel %vm1104_vm12, %v3159_v43, %v1101_v46 }
 0x27c   : > { %v1238_v13 = vsel %vm675_vm5, %v1228_v36, %v1229_v4  ;;  %v1239_v62 = vsel %vm675_vm5, %v1227_v10, %v1228_v36  ;;  %v1160_v54 = vmax.f32 %v1152_v47, 0.0  ;;  %v1131_v17 = vmul.f32 %v1105_v61, %v1035_v12  ;;  %3028 = vrot.lane.b32.xlu0 %v3027_v53, %s3239_s20  ;;  %v2923_v47 = vld [vmem:[%s4401_s7] sm:$0xff] }
 0x27d   : > { %v1109_v21 = vmul.f32 0.5, %v1108_v51  ;;  %v3022_v2 = vpack.i.bf16 %v1238_v13, %v1239_v62  ;;  %v3677_v59 = vsel %vm1185_vm4, %v1178_v14, %v1179_v58  ;;  %v3681_v43 = vsel %vm1185_vm4, %v1179_v58, %v1180_v56 }
 0x27e   : > { %v1181_v33 = vrot.slane %v1160_v54, 4  ;;  %v1142_v6 = vmul.f32 %v3552_v57, %v1131_v17  ;;  %v1230_v8 = vrot.slane %v1160_v54, 6 }
 0x27f   : > { %v1110_v15 = vsub.f32 1.5, %v1109_v21  ;;  %3023 = vrot.lane.b32.xlu1 %v3022_v2, %s3238_s19 }
 0x280   : > { %v3687_v0 = vsel %vm1185_vm4, %v1180_v56, %v1181_v33  ;;  %v1153_v19 = vadd.f32 %v3564_v3, %v1142_v6  ;;  %v1237_v7 = vsel %vm675_vm5, %v1229_v4, %v1230_v8  ;;  %v2926_v4 = vld [vmem:[%s4401_s7 + $0x18] sm:$0xff] }
 0x281   : > { %v1111_v9 = vmul.f32 %v3161_v18, %v1110_v15  ;;  %v1246_v48 = vsel %vm688_vm10, %v1237_v7, 0.0  ;;  %vm1198_vm10 = vcmp.ge.s32.totalorder %v3348_v26, 4 }
 0x282   : > { %v1161_v10 = vmax.f32 %v1153_v19, 0.0 }
 0x283   : > { %v1115_v1 = vsel %vm1114_vm15, %v3161_v18, %v1111_v9 }
 0x284   : > { %v1132_v39 = vmul.f32 %v1115_v1, %v1036_v27  ;;  %v3037_v30 = vpack.i.bf16 %v1161_v10, %v1160_v54  ;;  %v1231_v52 = vrot.slane %v1161_v10, 6  ;;  %v1182_v14 = vrot.slane %v1161_v10, 4 }
 0x286   : > { %v1143_v60 = vmul.f32 %v3552_v57, %v1132_v39  ;;  %v1236_v42 = vsel %vm675_vm5, %v1230_v8, %v1231_v52  ;;  %v1188_v11 = vsel %vm1185_vm4, %v1181_v33, %v1182_v14 }
 0x287   : > { %3038 = vrot.lane.b32.xlu1 %v3037_v30, %s3239_s20  ;;  %v3032_v25 = vpack.i.bf16 %v1236_v42, %v1246_v48  ;;  %v1222_v30 = vsel %vm1198_vm10, %v3687_v0, 0.0 }
 0x288   : > { %v1154_v22 = vadd.f32 %v3564_v3, %v1143_v60 }
 0x289   : > { %3033 = vrot.lane.b32.xlu2 %v3032_v25, %s3238_s19 }
 0x28a   : > { %v1162_v16 = vmax.f32 %v1154_v22, 0.0 }
 0x28c   : > { %v1232_v28 = vrot.slane %v1162_v16, 6  ;;  %v1183_v18 = vrot.slane %v1162_v16, 4  ;;  %v3047_v45 = vpack.i.bf16 %v3614_v50, %v1162_v16  ;;  %v2924_v50 = vld [vmem:[%s4401_s7 + $0x8] sm:$0xff] }
 0x28e   : > { %v1234_v57 = vsel %vm675_vm5, %v1232_v28, %v1233_v5  ;;  %v1235_v32 = vsel %vm675_vm5, %v1231_v52, %v1232_v28  ;;  %v1186_v37 = vsel %vm1185_vm4, %v1183_v18, %v1184_v63  ;;  %v1187_v3 = vsel %vm1185_vm4, %v1182_v14, %v1183_v18  ;;  %v2927_v5 = vld [vmem:[%s4401_s7 + $0x20] sm:$0xff]  ;;  %v2925_v63 = vld [vmem:[%s4401_s7 + $0x10] sm:$0xff] }
 0x28f   : > { %v3042_v40 = vpack.i.bf16 %v1234_v57, %v1235_v32  ;;  %1388 = vmatpush.bf16.msrb.mxu2 %v2927_v5  ;;  %vm1194_vm5 = vcmp.ge.s32.totalorder %v3377_v41, 4  ;;  %v3136_v5 = vld [vmem:[%s4402_s8] ss:$0 sm:$0xff] }
 0x290   : > { %v1218_v51 = vsel %vm1194_vm5, %v3650_v49, 0.0 }
 0x291   : > { %3043 = vrot.lane.b32.xlu0 %v3042_v40, %s3238_s19  ;;  %3048 = vrot.lane.b32.xlu2 %v3047_v45, %s3239_s20 }
 0x293   : > { %1389 = vmatpush.bf16.msrb.mxu2 %v2926_v4 }
 0x297   : > { %1390 = vmatpush.bf16.msrb.mxu2 %v2925_v63 }
 0x29b   : > { %1391 = vmatpush.bf16.msrb.mxu2 %v2924_v50 }
 0x29f   : > { %1392 = vmatpush.bf16.msrb.mxu2 %v2923_v47 }
 0x2d2   : > { %v3014_v46 = vpop.permute.xlu2 %3013 }
 0x2d3   : > { %v3016_v53 = vunpack.i.h.bf16 %v3014_v46  ;;  %v3015_v36 = vunpack.i.l.bf16 %v3014_v46 }
 0x2d5   : > { %v1315_v61 = vsel %vm829_vm7, %v3661_v31, %v3016_v53  ;;  %v1314_v13 = vsel %vm829_vm7, %v1218_v51, %v3015_v36 }
 0x2e3   : > { %v3034_v8 = vpop.permute.xlu2 %3033 }
 0x2e4   : > { %v3036_v10 = vunpack.i.h.bf16 %v3034_v8  ;;  %v3035_v39 = vunpack.i.l.bf16 %v3034_v8 }
 0x2e6   : > { %v3019_v12 = vpop.permute.xlu0 %3018 }
 0x2e7   : > { %v3021_v56 = vunpack.i.h.bf16 %v3019_v12  ;;  %v3020_v58 = vunpack.i.l.bf16 %v3019_v12 }
 0x2e9   : > { %v1322_v62 = vsel %vm838_vm8, %v1314_v13, %v3020_v58  ;;  %v1323_v54 = vsel %vm838_vm8, %v1315_v61, %v3021_v56 }
 0x2ea   : > { %v1330_v17 = vpack.c.bf16 %v1323_v54, %v1322_v62 }
 0x2eb   : > { %v3049_v22 = vpop.permute.xlu2 %3048 }
 0x2ec   : > { %2812 = vmatmul.msk.bf16.vlgmr.msrb.gmra.mxu2 %vm890_vm9, %v1330_v17  ;;  %v3051_v18 = vunpack.i.h.bf16 %v3049_v22  ;;  %v3050_v57 = vunpack.i.l.bf16 %v3049_v22 }
 0x2ee   : > { %v3029_v21 = vpop.permute.xlu0 %3028 }
 0x2ef   : > { %v3031_v6 = vunpack.i.h.bf16 %v3029_v21  ;;  %v3030_v49 = vunpack.i.l.bf16 %v3029_v21 }
 0x2f1   : > { %v3024_v2 = vpop.permute.xlu1 %3023 }
 0x2f2   : > { %v3026_v33 = vunpack.i.h.bf16 %v3024_v2  ;;  %v3025_v15 = vunpack.i.l.bf16 %v3024_v2 }
 0x2f4   : > { %v1316_v9 = vsel %vm829_vm7, %v3677_v59, %v3025_v15  ;;  %v1317_v31 = vsel %vm829_vm7, %v3681_v43, %v3026_v33  ;;  %v1319_v59 = vsel %vm829_vm7, %v1188_v11, %v3036_v10  ;;  %v1318_v43 = vsel %vm829_vm7, %v1222_v30, %v3035_v39 }
 0x2f5   : > { %v1324_v19 = vsel %vm838_vm8, %v1316_v9, %v3030_v49  ;;  %v1325_v27 = vsel %vm838_vm8, %v1317_v31, %v3031_v6 }
 0x2f6   : > { %v1331_v1 = vpack.c.bf16 %v1325_v27, %v1324_v19 }
 0x2f9   : > { %v3039_v7 = vpop.permute.xlu1 %3038 }
 0x2fa   : > { %v3041_v52 = vunpack.i.h.bf16 %v3039_v7  ;;  %v3040_v14 = vunpack.i.l.bf16 %v3039_v7 }
 0x2fc   : > { %v1326_v60 = vsel %vm838_vm8, %v1318_v43, %v3040_v14  ;;  %v1327_v42 = vsel %vm838_vm8, %v1319_v59, %v3041_v52  ;;  %2813 = vmatmul.msk.bf16.gmra.mxu2 %vm890_vm9, %v1331_v1 }
 0x2fd   : > { %v1332_v48 = vpack.c.bf16 %v1327_v42, %v1326_v60 }
 0x303   : > { %v3044_v25 = vpop.permute.xlu0 %3043 }
 0x304   : > { %v3046_v16 = vunpack.i.h.bf16 %v3044_v25  ;;  %v3045_v28 = vunpack.i.l.bf16 %v3044_v25 }
 0x306   : > { %v1321_v0 = vsel %vm829_vm7, %v1186_v37, %v3046_v16  ;;  %v1320_v32 = vsel %vm829_vm7, %v1187_v3, %v3045_v28 }
 0x307   : > { %v1328_v11 = vsel %vm838_vm8, %v1320_v32, %v3050_v57  ;;  %v1329_v40 = vsel %vm838_vm8, %v1321_v0, %v3051_v18 }
 0x308   : > { %v1333_v45 = vpack.c.bf16 %v1329_v40, %v1328_v11 }
 0x30c   : > { %2814 = vmatmul.msk.bf16.gmra.mxu2 %vm890_vm9, %v1332_v48 }
 0x31c   : > { %2815 = vmatmul.msk.bf16.gmra.mxu2 %vm890_vm9, %v1333_v45 }
 0x36f   : > { %v1394_v4 = vpop.f32.mrf.mxu2 }
 0x370   : > { %v3769_v63 = vadd.f32 %v3136_v5, %v1394_v4 }
 0x372   : > { %v1416_v37 = vsel %vm829_vm7, %v3769_v63, 0.0  ;;  %v1448_v3 = vmul.f32 %v3769_v63, %v3769_v63 }
 0x373   : > { %1417 = vadd.xlane.f32.xlu1 %v1416_v37 }
 0x374   : > { %v1456_v53 = vsel %vm829_vm7, %v1448_v3, 0.0 }
 0x377   : > { %v1396_v50 = vpop.f32.mrf.mxu2 }
 0x378   : > { %v3775_v47 = vadd.f32 %v3136_v5, %v1396_v50 }
 0x37a   : > { %v1419_v46 = vsel %vm829_vm7, %v3775_v47, 0.0  ;;  %v1449_v36 = vmul.f32 %v3775_v47, %v3775_v47 }
 0x37b   : > { %1420 = vadd.xlane.f32.xlu2 %v1419_v46  ;;  %1457 = vadd.xlane.f32.xlu1 %v1456_v53 }
 0x37c   : > { %v1459_v56 = vsel %vm829_vm7, %v1449_v36, 0.0 }
 0x37f   : > { %v1399_v12 = vpop.f32.mrf.mxu2 }
 0x380   : > { %v3782_v51 = vadd.f32 %v3136_v5, %v1399_v12 }
 0x382   : > { %v1422_v58 = vsel %vm829_vm7, %v3782_v51, 0.0  ;;  %v1450_v61 = vmul.f32 %v3782_v51, %v3782_v51 }
 0x383   : > { %1460 = vadd.xlane.f32.xlu2 %v1459_v56  ;;  %1423 = vadd.xlane.f32.xlu1 %v1422_v58 }
 0x384   : > { %v1462_v54 = vsel %vm829_vm7, %v1450_v61, 0.0 }
 0x387   : > { %v1401_v13 = vpop.f32.mrf.mxu2 }
 0x388   : > { %v3789_v62 = vadd.f32 %v3136_v5, %v1401_v13 }
 0x38a   : > { %v1451_v17 = vmul.f32 %v3789_v62, %v3789_v62  ;;  %v1425_v59 = vsel %vm829_vm7, %v3789_v62, 0.0 }
 0x38b   : > { %1463 = vadd.xlane.f32.xlu2 %v1462_v54 }
 0x38c   : > { %v1465_v21 = vsel %vm829_vm7, %v1451_v17, 0.0 }
 0x38d   : > { %1466 = vadd.xlane.f32.xlu1 %v1465_v21 }
 0x38f   : > { %v1404_v2 = vpop.f32.mrf.mxu2 }
 0x390   : > { %v3795_v33 = vadd.f32 %v3136_v5, %v1404_v2  ;;  %v3831_v2 = vld [vmem:[%s4403_s9] ss:$0 sm:$0xff] }
 0x392   : > { %v1452_v15 = vmul.f32 %v3795_v33, %v3795_v33  ;;  %v1428_v43 = vsel %vm829_vm7, %v3795_v33, 0.0 }
 0x394   : > { %v1468_v6 = vsel %vm829_vm7, %v1452_v15, 0.0 }
 0x395   : > { %1469 = vadd.xlane.f32.xlu1 %v1468_v6 }
 0x397   : > { %v1406_v49 = vpop.f32.mrf.mxu2 }
 0x398   : > { %v3800_v8 = vadd.f32 %v3136_v5, %v1406_v49 }
 0x39a   : > { %v1431_v9 = vsel %vm829_vm7, %v3800_v8, 0.0  ;;  %v1453_v60 = vmul.f32 %v3800_v8, %v3800_v8 }
 0x39b   : > { %1432 = vadd.xlane.f32.xlu2 %v1431_v9 }
 0x39c   : > { %v1471_v42 = vsel %vm829_vm7, %v1453_v60, 0.0 }
 0x39f   : > { %v1409_v31 = vpop.f32.mrf.mxu2 }
 0x3a0   : > { %v3804_v19 = vadd.f32 %v3136_v5, %v1409_v31 }
 0x3a2   : > { %v1434_v27 = vsel %vm829_vm7, %v3804_v19, 0.0  ;;  %v1454_v1 = vmul.f32 %v3804_v19, %v3804_v19 }
 0x3a3   : > { %1435 = vadd.xlane.f32.xlu2 %v1434_v27 }
 0x3a4   : > { %v1474_v10 = vsel %vm829_vm7, %v1454_v1, 0.0  ;;  %v3838_v1 = vld [vmem:[%s4404_s10] ss:$0 sm:$0xff] }
 0x3a5   : > { %1475 = vadd.xlane.f32.xlu1 %v1474_v10 }
 0x3a7   : > { %v1411_v39 = vpop.f32.mrf.mxu2 }
 0x3a8   : > { %v3811_v7 = vadd.f32 %v3136_v5, %v1411_v39 }
 0x3aa   : > { %v1437_v30 = vsel %vm829_vm7, %v3811_v7, 0.0  ;;  %v1455_v52 = vmul.f32 %v3811_v7, %v3811_v7 }
 0x3ab   : > { %1438 = vadd.xlane.f32.xlu0 %v1437_v30 }
 0x3ac   : > { %v1477_v14 = vsel %vm829_vm7, %v1455_v52, 0.0 }
 0x3b3   : > { %1478 = vadd.xlane.f32.xlu0 %v1477_v14 }
 0x3bb   : > { %1426 = vadd.xlane.f32.xlu0 %v1425_v59 }
 0x3c3   : > { %1429 = vadd.xlane.f32.xlu0 %v1428_v43 }
 0x3cb   : > { %1472 = vadd.xlane.f32.xlu0 %v1471_v42 }
 0x3e6   : > { %v1418_v48 = vpop.xlane.xlu1 %1417 }
 0x3e7   : > { %v1440_v22 = vmul.f32 0.03125, %v1418_v48 }
 0x3e9   : > { %v1488_v28 = vmul.f32 %v1440_v22, %v1440_v22  ;;  %v1512_v21 = vsub.f32 %v3769_v63, %v1440_v22 }
 0x3ee   : > { %v1421_v25 = vpop.xlane.xlu2 %1420  ;;  %v1458_v16 = vpop.xlane.xlu1 %1457 }
 0x3ef   : > { %v1480_v18 = vmul.f32 0.03125, %v1458_v16  ;;  %v1441_v0 = vmul.f32 0.03125, %v1421_v25 }
 0x3f1   : > { %v1496_v57 = vsub.f32 %v1480_v18, %v1488_v28  ;;  %v1489_v45 = vmul.f32 %v1441_v0, %v1441_v0  ;;  %v1513_v14 = vsub.f32 %v3775_v47, %v1441_v0  ;;  %v3849_v18 = vstv %s1646_s16 }
 0x3f3   : > { %v1504_v32 = vmax.f32 %v1496_v57, 0.0 }
 0x3f5   : > { %v1520_v11 = vadd.f32 1e-08, %v1504_v32 }
 0x3f6   : > { %v1461_v40 = vpop.xlane.xlu2 %1460  ;;  %v1424_v53 = vpop.xlane.xlu1 %1423 }
 0x3f7   : > { %3162 = vrsqrt.f32 %v1520_v11  ;;  %v1481_v5 = vmul.f32 0.03125, %v1461_v40  ;;  %vm1534_vm1 = vweird.f32 %v1520_v11  ;;  %v3833_v9 = vmul.f32 0.03125, %v1424_v53 }
 0x3f9   : > { %v1497_v4 = vsub.f32 %v1481_v5, %v1489_v45  ;;  %v1490_v39 = vmul.f32 %v3833_v9, %v3833_v9 }
 0x3fb   : > { %v1505_v37 = vmax.f32 %v1497_v4, 0.0 }
 0x3fd   : > { %v3163_v3 = vpop.eup %3162  ;;  %v1521_v50 = vadd.f32 1e-08, %v1505_v37 }
 0x3fe   : > { %v1529_v46 = vmul.f32 %v3163_v3, %v1520_v11  ;;  %vm1535_vm0 = vweird.f32 %v3163_v3  ;;  %v1464_v54 = vpop.xlane.xlu2 %1463 }
 0x3ff   : > { %3164 = vrsqrt.f32 %v1521_v50  ;;  %vm1536_vm2 = vmor %vm1534_vm1, %vm1535_vm0  ;;  %v1482_v27 = vmul.f32 0.03125, %v1464_v54  ;;  %vm1544_vm6 = vweird.f32 %v1521_v50 }
 0x400   : > { %v1530_v36 = vmul.f32 %v3163_v3, %v1529_v46  ;;  %v3825_v17 = vpop.xlane.xlu1 %1466 }
 0x401   : > { %v1498_v59 = vsub.f32 %v1482_v27, %v1490_v39  ;;  %v1483_v39 = vmul.f32 0.03125, %v3825_v17 }
 0x402   : > { %v1531_v12 = vmul.f32 0.5, %v1530_v36 }
 0x403   : > { %v1506_v25 = vmax.f32 %v1498_v59, 0.0 }
 0x404   : > { %v1532_v56 = vsub.f32 1.5, %v1531_v12 }
 0x405   : > { %v3165_v58 = vpop.eup %3164  ;;  %v1522_v32 = vadd.f32 1e-08, %v1506_v25 }
 0x406   : > { %v1533_v61 = vmul.f32 %v3163_v3, %v1532_v56  ;;  %v1539_v13 = vmul.f32 %v3165_v58, %v1521_v50  ;;  %vm1545_vm3 = vweird.f32 %v3165_v58 }
 0x407   : > { %vm1546_vm11 = vmor %vm1544_vm6, %vm1545_vm3  ;;  %3166 = vrsqrt.f32 %v1522_v32  ;;  %vm1554_vm13 = vweird.f32 %v1522_v32 }
 0x408   : > { %v1537_v15 = vsel %vm1536_vm2, %v3163_v3, %v1533_v61  ;;  %v1540_v6 = vmul.f32 %v3165_v58, %v1539_v13  ;;  %v1470_v42 = vpop.xlane.xlu1 %1469 }
 0x409   : > { %v1608_v49 = vmul.f32 %v1537_v15, %v1512_v21 }
 0x40a   : > { %v1541_v31 = vmul.f32 0.5, %v1540_v6 }
 0x40b   : > { %v1619_v63 = vmul.f32 %v3831_v2, %v1608_v49 }
 0x40c   : > { %v1542_v10 = vsub.f32 1.5, %v1541_v31 }
 0x40d   : > { %v1630_v43 = vadd.f32 %v3838_v1, %v1619_v63  ;;  %v3167_v36 = vpop.eup %3166 }
 0x40e   : > { %v1543_v30 = vmul.f32 %v3165_v58, %v1542_v10  ;;  %v3843_v52 = vpop.xlane.xlu2 %1432  ;;  %vm1555_vm12 = vweird.f32 %v3167_v36 }
 0x40f   : > { %v1638_v16 = vmax.f32 %v1630_v43, 0.0  ;;  %vm1556_vm14 = vmor %vm1554_vm13, %vm1555_vm12 }
 0x410   : > { %v1547_v60 = vsel %vm1546_vm11, %v3165_v58, %v1543_v30  ;;  %v1549_v58 = vmul.f32 %v3167_v36, %v1522_v32  ;;  %v3886_v32 = vmul.f32 0.03125, %v3843_v52 }
 0x411   : > { %v1609_v48 = vmul.f32 %v1547_v60, %v1513_v14  ;;  %v1648_v40 = vmul.f32 %v3849_v18, %v1638_v16 }
 0x412   : > { %v1550_v21 = vmul.f32 %v3167_v36, %v1549_v58 }
 0x413   : > { %v1620_v22 = vmul.f32 %v3831_v2, %v1609_v48  ;;  %v3858_v37 = vadd.f32 %v1648_v40, %v3372_v38  ;;  %v1484_v40 = vmul.f32 0.03125, %v1470_v42 }
 0x414   : > { %v1551_v6 = vmul.f32 0.5, %v1550_v21 }
 0x415   : > { %v1631_v28 = vadd.f32 %v3838_v1, %v1620_v22 }
 0x416   : > { %v1436_v57 = vpop.xlane.xlu2 %1435  ;;  %v1552_v63 = vsub.f32 1.5, %v1551_v6 }
 0x417   : > { %v3851_v11 = vmul.f32 0.03125, %v1436_v57  ;;  %v1639_v47 = vmax.f32 %v1631_v28, 0.0 }
 0x418   : > { %v1476_v0 = vpop.xlane.xlu1 %1475  ;;  %v1553_v59 = vmul.f32 %v3167_v36, %v1552_v63 }
 0x419   : > { %v1649_v45 = vmul.f32 %v3849_v18, %v1639_v47  ;;  %v1494_v5 = vmul.f32 %v3851_v11, %v3851_v11  ;;  %v1486_v4 = vmul.f32 0.03125, %v1476_v0  ;;  %v1514_v0 = vsub.f32 %v3782_v51, %v3833_v9 }
 0x41a   : > { %v1557_v57 = vsel %vm1556_vm14, %v3167_v36, %v1553_v59 }
 0x41b   : > { %v3861_v3 = vadd.f32 %v1649_v45, %v3365_v35  ;;  %v1502_v53 = vsub.f32 %v1486_v4, %v1494_v5  ;;  %v1610_v4 = vmul.f32 %v1557_v57, %v1514_v0 }
 0x41d   : > { %v3057_v46 = vpack.i.bf16 %v3861_v3, %v3858_v37  ;;  %v1510_v12 = vmax.f32 %v1502_v53, 0.0  ;;  %v1621_v42 = vmul.f32 %v3831_v2, %v1610_v4 }
 0x41e   : > { %v1439_v50 = vpop.xlane.xlu0 %1438 }
 0x41f   : > { %3058 = vrot.lane.b32.xlu2 %v3057_v46, %s3239_s20  ;;  %v1447_v56 = vmul.f32 0.03125, %v1439_v50  ;;  %v3866_v13 = vadd.f32 1e-08, %v1510_v12  ;;  %v1493_v12 = vmul.f32 %v3886_v32, %v3886_v32  ;;  %v1632_v63 = vadd.f32 %v3838_v1, %v1621_v42 }
 0x421   : > { %v1495_v54 = vmul.f32 %v1447_v56, %v1447_v56  ;;  %3168 = vrsqrt.f32 %v3866_v13  ;;  %vm1594_vm3 = vweird.f32 %v3866_v13 }
 0x426   : > { %v1479_v61 = vpop.xlane.xlu0 %1478 }
 0x427   : > { %v1487_v38 = vmul.f32 0.03125, %v1479_v61  ;;  %v3871_v10 = vpop.eup %3168  ;;  %v1519_v61 = vsub.f32 %v3811_v7, %v1447_v56 }
 0x428   : > { %v1589_v43 = vmul.f32 %v3871_v10, %v3866_v13  ;;  %vm1595_vm2 = vweird.f32 %v3871_v10 }
 0x429   : > { %v1503_v15 = vsub.f32 %v1487_v38, %v1495_v54  ;;  %vm1596_vm11 = vmor %vm1594_vm3, %vm1595_vm2 }
 0x42a   : > { %v1590_v17 = vmul.f32 %v3871_v10, %v1589_v43 }
 0x42b   : > { %v1511_v35 = vmax.f32 %v1503_v15, 0.0 }
 0x42c   : > { %v1591_v46 = vmul.f32 0.5, %v1590_v17  ;;  %v1518_v17 = vsub.f32 %v3804_v19, %v3851_v11  ;;  %v1711_v19 = vrot.slane %v3858_v37, 4 }
 0x42d   : > { %v1527_v49 = vadd.f32 1e-08, %v1511_v35 }
 0x42e   : > { %v1427_v31 = vpop.xlane.xlu0 %1426  ;;  %v1592_v38 = vsub.f32 1.5, %v1591_v46 }
 0x42f   : > { %3170 = vrsqrt.f32 %v1527_v49  ;;  %v3869_v27 = vmul.f32 0.03125, %v1427_v31  ;;  %vm1604_vm0 = vweird.f32 %v1527_v49 }
 0x431   : > { %v1491_v30 = vmul.f32 %v3869_v27, %v3869_v27 }
 0x433   : > { %v1499_v14 = vsub.f32 %v1483_v39, %v1491_v30  ;;  %v1593_v30 = vmul.f32 %v3871_v10, %v1592_v38 }
 0x435   : > { %v3171_v60 = vpop.eup %3170  ;;  %v1507_v48 = vmax.f32 %v1499_v14, 0.0 }
 0x436   : > { %v1599_v22 = vmul.f32 %v3171_v60, %v1527_v49  ;;  %v1430_v25 = vpop.xlane.xlu0 %1429  ;;  %vm1605_vm15 = vweird.f32 %v3171_v60 }
 0x437   : > { %v1523_v16 = vadd.f32 1e-08, %v1507_v48  ;;  %v3878_v28 = vmul.f32 0.03125, %v1430_v25  ;;  %vm1606_vm1 = vmor %vm1604_vm0, %vm1605_vm15  ;;  %v1640_v48 = vmax.f32 %v1632_v63, 0.0 }
 0x438   : > { %v1600_v47 = vmul.f32 %v3171_v60, %v1599_v22  ;;  %v1597_v22 = vsel %vm1596_vm11, %v3871_v10, %v1593_v30 }
 0x439   : > { %3172 = vrsqrt.f32 %v1523_v16  ;;  %v1492_v45 = vmul.f32 %v3878_v28, %v3878_v28  ;;  %vm1564_vm12 = vweird.f32 %v1523_v16  ;;  %v1516_v38 = vsub.f32 %v3795_v33, %v3878_v28 }
 0x43a   : > { %v1601_v5 = vmul.f32 0.5, %v1600_v47  ;;  %v1515_v47 = vsub.f32 %v3789_v62, %v3869_v27  ;;  %v1517_v28 = vsub.f32 %v3800_v8, %v3886_v32 }
 0x43b   : > { %v1500_v50 = vsub.f32 %v1484_v40, %v1492_v45  ;;  %v1712_v45 = vrot.slane %v3861_v3, 4 }
 0x43c   : > { %v1602_v53 = vsub.f32 1.5, %v1601_v5  ;;  %v1614_v5 = vmul.f32 %v1597_v22, %v1518_v17  ;;  %v2934_v22 = vld [vmem:[%s4397_s3 + $0x58] sm:$0xff] }
 0x43d   : > { %v1508_v36 = vmax.f32 %v1500_v50, 0.0  ;;  %1872 = vmatpush.bf16.msrb.mxu3 %v2934_v22 }
 0x43e   : > { %v1603_v58 = vmul.f32 %v3171_v60, %v1602_v53  ;;  %v1473_v51 = vpop.xlane.xlu0 %1472 }
 0x43f   : > { %v3173_v9 = vpop.eup %3172  ;;  %v1524_v52 = vadd.f32 1e-08, %v1508_v36  ;;  %v1485_v54 = vmul.f32 0.03125, %v1473_v51  ;;  %v1725_v36 = vsel %vm1185_vm4, %v1711_v19, %v1712_v45 }
 0x440   : > { %v1607_v21 = vsel %vm1606_vm1, %v3171_v60, %v1603_v58  ;;  %v1559_v15 = vmul.f32 %v3173_v9, %v1523_v16  ;;  %vm1565_vm6 = vweird.f32 %v3173_v9  ;;  %v1650_v16 = vmul.f32 %v3849_v18, %v1640_v48 }
 0x441   : > { %v1615_v35 = vmul.f32 %v1607_v21, %v1519_v61  ;;  %3174 = vrsqrt.f32 %v1524_v52  ;;  %v1501_v6 = vsub.f32 %v1485_v54, %v1493_v12  ;;  %vm1566_vm13 = vmor %vm1564_vm12, %vm1565_vm6  ;;  %v1625_v12 = vmul.f32 %v3831_v2, %v1614_v5 }
 0x442   : > { %v1560_v31 = vmul.f32 %v3173_v9, %v1559_v15  ;;  %v3921_v51 = vadd.f32 %v1650_v16, %v3395_v55  ;;  %vm1574_vm15 = vweird.f32 %v1524_v52 }
 0x443   : > { %v1626_v49 = vmul.f32 %v3831_v2, %v1615_v35  ;;  %v1509_v39 = vmax.f32 %v1501_v6, 0.0 }
 0x444   : > { %v1561_v7 = vmul.f32 0.5, %v1560_v31  ;;  %v1636_v31 = vadd.f32 %v3838_v1, %v1625_v12  ;;  %v1713_v41 = vrot.slane %v3921_v51, 4 }
 0x445   : > { %v1637_v56 = vadd.f32 %v3838_v1, %v1626_v49  ;;  %v1525_v14 = vadd.f32 1e-08, %v1509_v39 }
 0x446   : > { %v1562_v59 = vsub.f32 1.5, %v1561_v7  ;;  %v1644_v7 = vmax.f32 %v1636_v31, 0.0 }
 0x447   : > { %v3175_v43 = vpop.eup %3174  ;;  %v1645_v60 = vmax.f32 %v1637_v56, 0.0  ;;  %3176 = vrsqrt.f32 %v1525_v14 }
 0x448   : > { %v1563_v25 = vmul.f32 %v3173_v9, %v1562_v59  ;;  %v1569_v57 = vmul.f32 %v3175_v43, %v1524_v52  ;;  %vm1575_vm14 = vweird.f32 %v3175_v43  ;;  %v1724_v59 = vsel %vm1185_vm4, %v1712_v45, %v1713_v41 }
 0x449   : > { %v1655_v13 = vmul.f32 %v3849_v18, %v1645_v60  ;;  %vm1576_vm0 = vmor %vm1574_vm15, %vm1575_vm14 }
 0x44a   : > { %v1567_v0 = vsel %vm1566_vm13, %v3173_v9, %v1563_v25  ;;  %v1570_v40 = vmul.f32 %v3175_v43, %v1569_v57  ;;  %v1654_v25 = vmul.f32 %v3849_v18, %v1644_v7 }
 0x44b   : > { %v1611_v4 = vmul.f32 %v1567_v0, %v1515_v47  ;;  %v3906_v10 = vadd.f32 %v1655_v13, %v3379_v44 }
 0x44c   : > { %v1571_v50 = vmul.f32 0.5, %v1570_v40  ;;  %v3963_v40 = vadd.f32 %v1654_v25, %v3362_v34  ;;  %v2931_v34 = vld [vmem:[%s4397_s3 + $0x40] sm:$0xff] }
 0x44d   : > { %v3177_v11 = vpop.eup %3176  ;;  %v1622_v62 = vmul.f32 %v3831_v2, %v1611_v4  ;;  %v1718_v27 = vrot.slane %v3906_v10, 4 }
 0x44e   : > { %v1572_v46 = vsub.f32 1.5, %v1571_v50  ;;  %v1579_v53 = vmul.f32 %v3177_v11, %v1525_v14  ;;  %vm1585_vm1 = vweird.f32 %v3177_v11  ;;  %v3087_v26 = vpack.i.bf16 %v3906_v10, %v3963_v40 }
 0x44f   : > { %v1633_v44 = vadd.f32 %v3838_v1, %v1622_v62  ;;  %v1726_v58 = vsel %vm1185_vm4, %v1718_v27, %v1711_v19 }
 0x450   : > { %v1573_v9 = vmul.f32 %v3175_v43, %v1572_v46  ;;  %v1580_v42 = vmul.f32 %v3177_v11, %v1579_v53  ;;  %v1727_v61 = vsel %vm1194_vm5, %v1726_v58, 0.0  ;;  %vm1584_vm5 = vweird.f32 %v1525_v14  ;;  %v2930_v46 = vld [vmem:[%s4397_s3 + $0x38] sm:$0xff] }
 0x451   : > { %v1641_v54 = vmax.f32 %v1633_v44, 0.0  ;;  %v3052_v21 = vpack.i.bf16 %v1725_v36, %v1727_v61  ;;  %vm1586_vm2 = vmor %vm1584_vm5, %vm1585_vm1 }
 0x452   : > { %v1577_v15 = vsel %vm1576_vm0, %v3175_v43, %v1573_v9  ;;  %v1581_v35 = vmul.f32 0.5, %v1580_v42 }
 0x453   : > { %v1612_v6 = vmul.f32 %v1577_v15, %v1516_v38  ;;  %3053 = vrot.lane.b32.xlu0 %v3052_v21, %s3238_s19  ;;  %v1651_v55 = vmul.f32 %v3849_v18, %v1641_v54 }
 0x454   : > { %v1582_v52 = vsub.f32 1.5, %v1581_v35 }
 0x455   : > { %v1623_v63 = vmul.f32 %v3831_v2, %v1612_v6  ;;  %v3933_v49 = vadd.f32 %v1651_v55, %v3353_v29 }
 0x456   : > { %v1583_v33 = vmul.f32 %v3177_v11, %v1582_v52 }
 0x457   : > { %v1634_v39 = vadd.f32 %v3838_v1, %v1623_v63  ;;  %v1714_v30 = vrot.slane %v3933_v49, 4  ;;  %v3067_v29 = vpack.i.bf16 %v3933_v49, %v3921_v51 }
 0x458   : > { %v1587_v56 = vsel %vm1586_vm2, %v3177_v11, %v1583_v33 }
 0x459   : > { %v1642_v43 = vmax.f32 %v1634_v39, 0.0  ;;  %v1613_v60 = vmul.f32 %v1587_v56, %v1517_v28  ;;  %v1723_v14 = vsel %vm1185_vm4, %v1713_v41, %v1714_v30 }
 0x45a   : > { %v3062_v48 = vpack.i.bf16 %v1723_v14, %v1724_v59 }
 0x45b   : > { %v1652_v8 = vmul.f32 %v3849_v18, %v1642_v43  ;;  %v1624_v32 = vmul.f32 %v3831_v2, %v1613_v60  ;;  %3068 = vrot.lane.b32.xlu0 %v3067_v29, %s3239_s20  ;;  %v2933_v2 = vld [vmem:[%s4397_s3 + $0x50] sm:$0xff] }
 0x45c   : > { %3063 = vrot.lane.b32.xlu1 %v3062_v48, %s3238_s19  ;;  %1873 = vmatpush.bf16.msrb.mxu3 %v2933_v2 }
 0x45d   : > { %v1635_v57 = vadd.f32 %v3838_v1, %v1624_v32  ;;  %v3955_v17 = vadd.f32 %v1652_v8, %v3344_v23  ;;  %v2932_v1 = vld [vmem:[%s4397_s3 + $0x48] sm:$0xff] }
 0x45f   : > { %v1643_v47 = vmax.f32 %v1635_v57, 0.0  ;;  %v1715_v13 = vrot.slane %v3955_v17, 4 }
 0x460   : > { %1874 = vmatpush.bf16.msrb.mxu3 %v2932_v1 }
 0x461   : > { %v1653_v0 = vmul.f32 %v3849_v18, %v1643_v47  ;;  %v1722_v45 = vsel %vm1185_vm4, %v1714_v30, %v1715_v13  ;;  %v1717_v18 = vrot.slane %v3963_v40, 4 }
 0x462   : > { %v1731_v16 = vsel %vm1198_vm10, %v1722_v45, 0.0 }
 0x463   : > { %v3969_v23 = vadd.f32 %v1653_v0, %v3346_v24  ;;  %v1719_v50 = vsel %vm1185_vm4, %v1717_v18, %v1718_v27 }
 0x464   : > { %1875 = vmatpush.bf16.msrb.mxu3 %v2931_v34 }
 0x465   : > { %v3077_v5 = vpack.i.bf16 %v3969_v23, %v3955_v17  ;;  %v1716_v4 = vrot.slane %v3969_v23, 4 }
 0x467   : > { %3078 = vrot.lane.b32.xlu0 %v3077_v5, %s3239_s20  ;;  %v1721_v24 = vsel %vm1185_vm4, %v1715_v13, %v1716_v4  ;;  %v1720_v19 = vsel %vm1185_vm4, %v1716_v4, %v1717_v18  ;;  %v3139_v4 = vld [vmem:[%s4398_s4 + $0x1] ss:$0 sm:$0xff] }
 0x468   : > { %v3072_v11 = vpack.i.bf16 %v1721_v24, %v1731_v16  ;;  %v3082_v62 = vpack.i.bf16 %v1719_v50, %v1720_v19  ;;  %1876 = vmatpush.bf16.msrb.mxu3 %v2930_v46 }
 0x46a   : > { %3073 = vrot.lane.b32.xlu2 %v3072_v11, %s3238_s19  ;;  %3083 = vrot.lane.b32.xlu1 %v3082_v62, %s3238_s19 }
 0x46c   : > { %1877 = vmatpush.bf16.msrb.mxu3 %v2929_v20 }
 0x472   : > { %3088 = vrot.lane.b32.xlu2 %v3087_v26, %s3239_s20 }
 0x479   : > { %v3059_v27 = vpop.permute.xlu2 %3058 }
 0x47a   : > { %v3061_v44 = vunpack.i.h.bf16 %v3059_v27  ;;  %v3060_v58 = vunpack.i.l.bf16 %v3059_v27 }
 0x4c4   : > { %v3074_v39 = vpop.permute.xlu2 %3073 }
 0x4c5   : > { %v3054_v53 = vpop.permute.xlu0 %3053  ;;  %v3076_v7 = vunpack.i.h.bf16 %v3074_v39  ;;  %v3075_v56 = vunpack.i.l.bf16 %v3074_v39 }
 0x4c6   : > { %v3056_v36 = vunpack.i.h.bf16 %v3054_v53  ;;  %v3055_v12 = vunpack.i.l.bf16 %v3054_v53 }
 0x4c7   : > { %v1804_v60 = vsel %vm829_vm7, %v3955_v17, %v3076_v7  ;;  %v1803_v29 = vsel %vm829_vm7, 0.0, %v3075_v56 }
 0x4c8   : > { %v1800_v9 = vsel %vm829_vm7, %v3858_v37, %v3056_v36  ;;  %v1799_v42 = vsel %vm829_vm7, 0.0, %v3055_v12 }
 0x4c9   : > { %v1808_v61 = vsel %vm838_vm8, %v1800_v9, %v3061_v44  ;;  %v1807_v54 = vsel %vm838_vm8, %v1799_v42, %v3060_v58 }
 0x4ca   : > { %v1815_v38 = vpack.c.bf16 %v1808_v61, %v1807_v54 }
 0x4cc   : > { %2853 = vmatmul.msk.bf16.vlgmr.msrb.gmra.mxu3 %vm890_vm9, %v1815_v38  ;;  %v3089_v57 = vpop.permute.xlu2 %3088 }
 0x4cd   : > { %v3069_v6 = vpop.permute.xlu0 %3068  ;;  %v3091_v13 = vunpack.i.h.bf16 %v3089_v57  ;;  %v3090_v0 = vunpack.i.l.bf16 %v3089_v57 }
 0x4ce   : > { %v3064_v21 = vpop.permute.xlu1 %3063  ;;  %v3071_v52 = vunpack.i.h.bf16 %v3069_v6  ;;  %v3070_v41 = vunpack.i.l.bf16 %v3069_v6 }
 0x4cf   : > { %v3066_v15 = vunpack.i.h.bf16 %v3064_v21  ;;  %v3065_v35 = vunpack.i.l.bf16 %v3064_v21 }
 0x4d1   : > { %v1802_v55 = vsel %vm829_vm7, %v3921_v51, %v3066_v15  ;;  %v1801_v31 = vsel %vm829_vm7, %v3861_v3, %v3065_v35 }
 0x4d2   : > { %v1809_v63 = vsel %vm838_vm8, %v1801_v31, %v3070_v41  ;;  %v1810_v33 = vsel %vm838_vm8, %v1802_v55, %v3071_v52 }
 0x4d3   : > { %v1816_v28 = vpack.c.bf16 %v1810_v33, %v1809_v63 }
 0x4d9   : > { %v3079_v30 = vpop.permute.xlu0 %3078 }
 0x4da   : > { %v3081_v59 = vunpack.i.h.bf16 %v3079_v30  ;;  %v3080_v43 = vunpack.i.l.bf16 %v3079_v30 }
 0x4dc   : > { %2854 = vmatmul.msk.bf16.gmra.mxu3 %vm890_vm9, %v1816_v28  ;;  %v1811_v14 = vsel %vm838_vm8, %v1803_v29, %v3080_v43  ;;  %v1812_v48 = vsel %vm838_vm8, %v1804_v60, %v3081_v59  ;;  %v3084_v32 = vpop.permute.xlu1 %3083 }
 0x4dd   : > { %v1817_v8 = vpack.c.bf16 %v1812_v48, %v1811_v14  ;;  %v3086_v22 = vunpack.i.h.bf16 %v3084_v32  ;;  %v3085_v25 = vunpack.i.l.bf16 %v3084_v32 }
 0x4df   : > { %v1806_v2 = vsel %vm829_vm7, %v3963_v40, %v3086_v22  ;;  %v1805_v47 = vsel %vm829_vm7, %v3969_v23, %v3085_v25 }
 0x4e0   : > { %v1813_v1 = vsel %vm838_vm8, %v1805_v47, %v3090_v0  ;;  %v1814_v45 = vsel %vm838_vm8, %v1806_v2, %v3091_v13 }
 0x4e1   : > { %v1818_v5 = vpack.c.bf16 %v1814_v45, %v1813_v1 }
 0x4ec   : > { %2855 = vmatmul.msk.bf16.gmra.mxu3 %vm890_vm9, %v1817_v8 }
 0x4fc   : > { %2856 = vmatmul.msk.bf16.gmra.mxu3 %vm890_vm9, %v1818_v5 }
 0x54f   : > { %v1879_v18 = vpop.f32.mrf.mxu3 }
 0x550   : > { %v4031_v34 = vadd.f32 %v3139_v4, %v1879_v18 }
 0x552   : > { %v1903_v24 = vsel %vm829_vm7, %v4031_v34, 0.0  ;;  %v1935_v16 = vmul.f32 %v4031_v34, %v4031_v34 }
 0x553   : > { %1904 = vadd.xlane.f32.xlu0 %v1903_v24 }
 0x554   : > { %v1943_v50 = vsel %vm829_vm7, %v1935_v16, 0.0 }
 0x555   : > { %1944 = vadd.xlane.f32.xlu2 %v1943_v50 }
 0x557   : > { %v1881_v19 = vpop.f32.mrf.mxu3 }
 0x558   : > { %v4038_v11 = vadd.f32 %v3139_v4, %v1881_v19 }
 0x55a   : > { %v1906_v62 = vsel %vm829_vm7, %v4038_v11, 0.0  ;;  %v1936_v46 = vmul.f32 %v4038_v11, %v4038_v11 }
 0x55b   : > { %1907 = vadd.xlane.f32.xlu1 %v1906_v62 }
 0x55c   : > { %v1946_v26 = vsel %vm829_vm7, %v1936_v46, 0.0 }
 0x55d   : > { %1947 = vadd.xlane.f32.xlu0 %v1946_v26 }
 0x55f   : > { %v1884_v20 = vpop.f32.mrf.mxu3 }
 0x560   : > { %v4045_v27 = vadd.f32 %v3139_v4, %v1884_v20 }
 0x562   : > { %v1909_v53 = vsel %vm829_vm7, %v4045_v27, 0.0  ;;  %v1937_v36 = vmul.f32 %v4045_v27, %v4045_v27 }
 0x563   : > { %1910 = vadd.xlane.f32.xlu1 %v1909_v53 }
 0x564   : > { %v1949_v12 = vsel %vm829_vm7, %v1937_v36, 0.0 }
 0x565   : > { %1950 = vadd.xlane.f32.xlu0 %v1949_v12 }
 0x567   : > { %v1886_v44 = vpop.f32.mrf.mxu3 }
 0x568   : > { %v4052_v58 = vadd.f32 %v3139_v4, %v1886_v44 }
 0x56a   : > { %v1912_v9 = vsel %vm829_vm7, %v4052_v58, 0.0  ;;  %v1938_v42 = vmul.f32 %v4052_v58, %v4052_v58 }
 0x56b   : > { %1913 = vadd.xlane.f32.xlu2 %v1912_v9 }
 0x56c   : > { %v1952_v61 = vsel %vm829_vm7, %v1938_v42, 0.0 }
 0x56d   : > { %1953 = vadd.xlane.f32.xlu1 %v1952_v61 }
 0x56f   : > { %v1889_v54 = vpop.f32.mrf.mxu3 }
 0x570   : > { %v4059_v38 = vadd.f32 %v3139_v4, %v1889_v54 }
 0x572   : > { %v1915_v21 = vsel %vm829_vm7, %v4059_v38, 0.0  ;;  %v1939_v15 = vmul.f32 %v4059_v38, %v4059_v38 }
 0x573   : > { %1916 = vadd.xlane.f32.xlu2 %v1915_v21 }
 0x574   : > { %v1955_v35 = vsel %vm829_vm7, %v1939_v15, 0.0 }
 0x575   : > { %1956 = vadd.xlane.f32.xlu1 %v1955_v35 }
 0x577   : > { %v1891_v6 = vpop.f32.mrf.mxu3 }
 0x578   : > { %v4066_v55 = vadd.f32 %v3139_v4, %v1891_v6  ;;  %v4101_v6 = vld [vmem:[%s4399_s5 + $0x1] ss:$0 sm:$0xff] }
 0x57a   : > { %v1918_v31 = vsel %vm829_vm7, %v4066_v55, 0.0  ;;  %v1940_v52 = vmul.f32 %v4066_v55, %v4066_v55 }
 0x57b   : > { %1919 = vadd.xlane.f32.xlu0 %v1918_v31 }
 0x57c   : > { %v1958_v41 = vsel %vm829_vm7, %v1940_v52, 0.0 }
 0x57d   : > { %1959 = vadd.xlane.f32.xlu2 %v1958_v41 }
 0x57f   : > { %v1894_v63 = vpop.f32.mrf.mxu3 }
 0x580   : > { %v4073_v33 = vadd.f32 %v3139_v4, %v1894_v63 }
 0x582   : > { %v1921_v28 = vsel %vm829_vm7, %v4073_v33, 0.0  ;;  %v1941_v39 = vmul.f32 %v4073_v33, %v4073_v33 }
 0x583   : > { %1922 = vadd.xlane.f32.xlu0 %v1921_v28 }
 0x584   : > { %v1961_v30 = vsel %vm829_vm7, %v1941_v39, 0.0  ;;  %v4108_v39 = vld [vmem:[%s4400_s6 + $0x1] ss:$0 sm:$0xff] }
 0x585   : > { %1962 = vadd.xlane.f32.xlu2 %v1961_v30 }
 0x587   : > { %v1896_v7 = vpop.f32.mrf.mxu3 }
 0x588   : > { %v4080_v56 = vadd.f32 %v3139_v4, %v1896_v7 }
 0x58a   : > { %v1924_v59 = vsel %vm829_vm7, %v4080_v56, 0.0  ;;  %v1942_v43 = vmul.f32 %v4080_v56, %v4080_v56 }
 0x58b   : > { %1925 = vadd.xlane.f32.xlu1 %v1924_v59 }
 0x58c   : > { %v1964_v60 = vsel %vm829_vm7, %v1942_v43, 0.0 }
 0x58d   : > { %1965 = vadd.xlane.f32.xlu0 %v1964_v60 }
 0x5c6   : > { %v1905_v29 = vpop.xlane.xlu0 %1904 }
 0x5c7   : > { %v1927_v14 = vmul.f32 0.03125, %v1905_v29 }
 0x5c8   : > { %v1945_v48 = vpop.xlane.xlu2 %1944 }
 0x5c9   : > { %v1975_v8 = vmul.f32 %v1927_v14, %v1927_v14  ;;  %v1967_v32 = vmul.f32 0.03125, %v1945_v48  ;;  %v1999_v15 = vsub.f32 %v4031_v34, %v1927_v14 }
 0x5cb   : > { %v1983_v22 = vsub.f32 %v1967_v32, %v1975_v8 }
 0x5cd   : > { %v1991_v25 = vmax.f32 %v1983_v22, 0.0 }
 0x5ce   : > { %v1908_v57 = vpop.xlane.xlu1 %1907 }
 0x5cf   : > { %v2007_v2 = vadd.f32 1e-08, %v1991_v25  ;;  %v4087_v47 = vmul.f32 0.03125, %v1908_v57 }
 0x5d0   : > { %v1948_v13 = vpop.xlane.xlu0 %1947 }
 0x5d1   : > { %3178 = vrsqrt.f32 %v2007_v2  ;;  %v1976_v0 = vmul.f32 %v4087_v47, %v4087_v47  ;;  %v1968_v1 = vmul.f32 0.03125, %v1948_v13  ;;  %vm2021_vm10 = vweird.f32 %v2007_v2 }
 0x5d2   : > { %v2000_v13 = vsub.f32 %v4038_v11, %v4087_v47 }
 0x5d3   : > { %v1984_v45 = vsub.f32 %v1968_v1, %v1976_v0 }
 0x5d5   : > { %v1992_v5 = vmax.f32 %v1984_v45, 0.0 }
 0x5d6   : > { %v1911_v4 = vpop.xlane.xlu1 %1910 }
 0x5d7   : > { %v3179_v18 = vpop.eup %3178  ;;  %v4091_v24 = vmul.f32 0.03125, %v1911_v4  ;;  %v2008_v50 = vadd.f32 1e-08, %v1992_v5 }
 0x5d8   : > { %v2016_v16 = vmul.f32 %v3179_v18, %v2007_v2  ;;  %v1951_v19 = vpop.xlane.xlu0 %1950  ;;  %vm2022_vm4 = vweird.f32 %v3179_v18 }
 0x5d9   : > { %v1977_v62 = vmul.f32 %v4091_v24, %v4091_v24  ;;  %v1969_v46 = vmul.f32 0.03125, %v1951_v19  ;;  %3180 = vrsqrt.f32 %v2008_v50  ;;  %vm2023_vm3 = vmor %vm2021_vm10, %vm2022_vm4  ;;  %vm2031_vm11 = vweird.f32 %v2008_v50 }
 0x5da   : > { %v2017_v26 = vmul.f32 %v3179_v18, %v2016_v16  ;;  %v3240_v16 = vmov 0.0  }
 0x5db   : > { %v1985_v20 = vsub.f32 %v1969_v46, %v1977_v62 }
 0x5dc   : > { %v2018_v53 = vmul.f32 0.5, %v2017_v26 }
 0x5dd   : > { %v1993_v36 = vmax.f32 %v1985_v20, 0.0 }
 0x5de   : > { %v2019_v12 = vsub.f32 1.5, %v2018_v53  ;;  %v1914_v44 = vpop.xlane.xlu2 %1913 }
 0x5df   : > { %v2009_v9 = vadd.f32 1e-08, %v1993_v36  ;;  %v4095_v42 = vmul.f32 0.03125, %v1914_v44  ;;  %v3181_v61 = vpop.eup %3180  ;;  %v2001_v44 = vsub.f32 %v4045_v27, %v4091_v24 }
 0x5e0   : > { %v2020_v54 = vmul.f32 %v3179_v18, %v2019_v12  ;;  %v1954_v21 = vpop.xlane.xlu1 %1953  ;;  %v2026_v35 = vmul.f32 %v3181_v61, %v2008_v50  ;;  %vm2032_vm6 = vweird.f32 %v3181_v61 }
 0x5e1   : > { %3182 = vrsqrt.f32 %v2009_v9  ;;  %v1978_v52 = vmul.f32 %v4095_v42, %v4095_v42  ;;  %v1970_v41 = vmul.f32 0.03125, %v1954_v21  ;;  %vm2033_vm12 = vmor %vm2031_vm11, %vm2032_vm6  ;;  %vm2041_vm14 = vweird.f32 %v2009_v9 }
 0x5e2   : > { %v2024_v31 = vsel %vm2023_vm3, %v3179_v18, %v2020_v54  ;;  %v2027_v28 = vmul.f32 %v3181_v61, %v2026_v35 }
 0x5e3   : > { %v2095_v63 = vmul.f32 %v2024_v31, %v1999_v15  ;;  %v1986_v34 = vsub.f32 %v1970_v41, %v1978_v52 }
 0x5e4   : > { %v2028_v30 = vmul.f32 0.5, %v2027_v28 }
 0x5e5   : > { %v2106_v7 = vmul.f32 %v4101_v6, %v2095_v63  ;;  %v1994_v59 = vmax.f32 %v1986_v34, 0.0 }
 0x5e6   : > { %v1917_v43 = vpop.xlane.xlu2 %1916  ;;  %v2029_v29 = vsub.f32 1.5, %v2028_v30 }
 0x5e7   : > { %v3183_v60 = vpop.eup %3182  ;;  %v4111_v14 = vmul.f32 0.03125, %v1917_v43  ;;  %v2117_v48 = vadd.f32 %v4108_v39, %v2106_v7  ;;  %v2010_v32 = vadd.f32 1e-08, %v1994_v59 }
 0x5e8   : > { %v2036_v8 = vmul.f32 %v3183_v60, %v2009_v9  ;;  %v1957_v22 = vpop.xlane.xlu1 %1956  ;;  %v2030_v25 = vmul.f32 %v3181_v61, %v2029_v29  ;;  %vm2042_vm13 = vweird.f32 %v3183_v60 }
 0x5e9   : > { %v1979_v57 = vmul.f32 %v4111_v14, %v4111_v14  ;;  %v1971_v2 = vmul.f32 0.03125, %v1957_v22  ;;  %3184 = vrsqrt.f32 %v2010_v32  ;;  %v4118_v1 = vmax.f32 %v2117_v48, 0.0  ;;  %vm2043_vm15 = vmor %vm2041_vm14, %vm2042_vm13 }
 0x5ea   : > { %v2037_v0 = vmul.f32 %v3183_v60, %v2036_v8  ;;  %v2034_v45 = vsel %vm2033_vm12, %v3181_v61, %v2030_v25  ;;  %vm2051_vm1 = vweird.f32 %v2010_v32  ;;  %v2002_v25 = vsub.f32 %v4052_v58, %v4095_v42 }
 0x5eb   : > { %v1987_v5 = vsub.f32 %v1971_v2, %v1979_v57  ;;  %v2096_v4 = vmul.f32 %v2034_v45, %v2000_v13  ;;  %v3092_v50 = vpack.i.bf16 %v4118_v1, %v3240_v16 }
 0x5ec   : > { %v2038_v18 = vmul.f32 0.5, %v2037_v0 }
 0x5ed   : > { %v1995_v19 = vmax.f32 %v1987_v5, 0.0  ;;  %3093 = vrot.lane.b32.xlu1 %v3092_v50, %s3238_s19  ;;  %v2107_v11 = vmul.f32 %v4101_v6, %v2096_v4 }
 0x5ee   : > { %v2039_v62 = vsub.f32 1.5, %v2038_v18  ;;  %v1920_v46 = vpop.xlane.xlu0 %1919 }
 0x5ef   : > { %v2011_v47 = vadd.f32 1e-08, %v1995_v19  ;;  %v4124_v26 = vmul.f32 0.03125, %v1920_v46  ;;  %v3185_v20 = vpop.eup %3184  ;;  %v2118_v12 = vadd.f32 %v4108_v39, %v2107_v11 }
 0x5f0   : > { %v2040_v53 = vmul.f32 %v3183_v60, %v2039_v62  ;;  %v1960_v36 = vpop.xlane.xlu2 %1959  ;;  %v2046_v61 = vmul.f32 %v3185_v20, %v2010_v32  ;;  %vm2052_vm0 = vweird.f32 %v3185_v20 }
 0x5f1   : > { %3186 = vrsqrt.f32 %v2011_v47  ;;  %v1980_v21 = vmul.f32 %v4124_v26, %v4124_v26  ;;  %v1972_v15 = vmul.f32 0.03125, %v1960_v36  ;;  %v4131_v31 = vmax.f32 %v2118_v12, 0.0  ;;  %vm2053_vm5 = vmor %vm2051_vm1, %vm2052_vm0 }
 0x5f2   : > { %v2044_v54 = vsel %vm2043_vm15, %v3183_v60, %v2040_v53  ;;  %v2047_v35 = vmul.f32 %v3185_v20, %v2046_v61  ;;  %vm2061_vm4 = vweird.f32 %v2011_v47  ;;  %v2003_v53 = vsub.f32 %v4059_v38, %v4111_v14  ;;  %v2940_v38 = vld [vmem:[%s4401_s7 + $0x58] sm:$0xff] }
 0x5f3   : > { %v2097_v52 = vmul.f32 %v2044_v54, %v2001_v44  ;;  %v1988_v41 = vsub.f32 %v1972_v15, %v1980_v21  ;;  %v3097_v63 = vpack.i.bf16 %v4131_v31, %v4118_v1  ;;  %2325 = vmatpush.bf16.msrb.mxu0 %v2940_v38 }
 0x5f4   : > { %v2048_v9 = vmul.f32 0.5, %v2047_v35 }
 0x5f5   : > { %v2108_v28 = vmul.f32 %v4101_v6, %v2097_v52  ;;  %v1996_v27 = vmax.f32 %v1988_v41, 0.0  ;;  %3098 = vrot.lane.b32.xlu2 %v3097_v63, %s3239_s20 }
 0x5f6   : > { %v1923_v24 = vpop.xlane.xlu0 %1922  ;;  %v2049_v30 = vsub.f32 1.5, %v2048_v9 }
 0x5f7   : > { %v3187_v34 = vpop.eup %3186  ;;  %v4137_v7 = vmul.f32 0.03125, %v1923_v24  ;;  %v2119_v59 = vadd.f32 %v4108_v39, %v2108_v28  ;;  %v2012_v60 = vadd.f32 1e-08, %v1996_v27 }
 0x5f8   : > { %v2056_v43 = vmul.f32 %v3187_v34, %v2011_v47  ;;  %v1963_v29 = vpop.xlane.xlu2 %1962  ;;  %v2050_v48 = vmul.f32 %v3185_v20, %v2049_v30  ;;  %vm2062_vm2 = vweird.f32 %v3187_v34 }
 0x5f9   : > { %v1981_v8 = vmul.f32 %v4137_v7, %v4137_v7  ;;  %v1973_v22 = vmul.f32 0.03125, %v1963_v29  ;;  %3188 = vrsqrt.f32 %v2012_v60  ;;  %v2127_v2 = vmax.f32 %v2119_v59, 0.0  ;;  %vm2063_vm10 = vmor %vm2061_vm4, %vm2062_vm2 }
 0x5fa   : > { %v2057_v57 = vmul.f32 %v3187_v34, %v2056_v43  ;;  %v2054_v13 = vsel %vm2053_vm5, %v3185_v20, %v2050_v48  ;;  %vm2071_vm6 = vweird.f32 %v2012_v60  ;;  %v2004_v59 = vsub.f32 %v4066_v55, %v4124_v26 }
 0x5fb   : > { %v1989_v0 = vsub.f32 %v1973_v22, %v1981_v8  ;;  %v3102_v5 = vpack.i.bf16 %v2127_v2, %v4131_v31  ;;  %v2098_v4 = vmul.f32 %v2054_v13, %v2002_v25  ;;  %v2005_v26 = vsub.f32 %v4073_v33, %v4137_v7 }
 0x5fc   : > { %v2058_v45 = vmul.f32 0.5, %v2057_v57 }
 0x5fd   : > { %v1997_v18 = vmax.f32 %v1989_v0, 0.0  ;;  %3103 = vrot.lane.b32.xlu0 %v3102_v5, %s3238_s19  ;;  %v2109_v19 = vmul.f32 %v4101_v6, %v2098_v4 }
 0x5fe   : > { %v2059_v50 = vsub.f32 1.5, %v2058_v45  ;;  %v1926_v32 = vpop.xlane.xlu1 %1925 }
 0x5ff   : > { %v2013_v62 = vadd.f32 1e-08, %v1997_v18  ;;  %v4147_v58 = vmul.f32 0.03125, %v1926_v32  ;;  %v3189_v42 = vpop.eup %3188  ;;  %v2120_v20 = vadd.f32 %v4108_v39, %v2109_v19 }
 0x600   : > { %v2060_v46 = vmul.f32 %v3187_v34, %v2059_v50  ;;  %v1966_v11 = vpop.xlane.xlu0 %1965  ;;  %v2066_v36 = vmul.f32 %v3189_v42, %v2012_v60  ;;  %vm2072_vm3 = vweird.f32 %v3189_v42 }
 0x601   : > { %3190 = vrsqrt.f32 %v2013_v62  ;;  %v1982_v44 = vmul.f32 %v4147_v58, %v4147_v58  ;;  %v1974_v61 = vmul.f32 0.03125, %v1966_v11  ;;  %v2128_v15 = vmax.f32 %v2120_v20, 0.0  ;;  %vm2073_vm11 = vmor %vm2071_vm6, %vm2072_vm3 }
 0x602   : > { %v2064_v12 = vsel %vm2063_vm10, %v3187_v34, %v2060_v46  ;;  %v2067_v21 = vmul.f32 %v3189_v42, %v2066_v36  ;;  %vm2081_vm13 = vweird.f32 %v2013_v62 }
 0x603   : > { %v2099_v54 = vmul.f32 %v2064_v12, %v2003_v53  ;;  %v1990_v35 = vsub.f32 %v1974_v61, %v1982_v44  ;;  %v3107_v47 = vpack.i.bf16 %v2128_v15, %v2127_v2  ;;  %v2939_v44 = vld [vmem:[%s4401_s7 + $0x50] sm:$0xff] }
 0x604   : > { %v2068_v52 = vmul.f32 0.5, %v2067_v21  ;;  %2326 = vmatpush.bf16.msrb.mxu0 %v2939_v44 }
 0x605   : > { %v2110_v41 = vmul.f32 %v4101_v6, %v2099_v54  ;;  %v1998_v9 = vmax.f32 %v1990_v35, 0.0  ;;  %3108 = vrot.lane.b32.xlu1 %v3107_v47, %s3239_s20 }
 0x606   : > { %v2069_v63 = vsub.f32 1.5, %v2068_v52 }
 0x607   : > { %v3191_v14 = vpop.eup %3190  ;;  %v2121_v28 = vadd.f32 %v4108_v39, %v2110_v41  ;;  %v2014_v24 = vadd.f32 1e-08, %v1998_v9 }
 0x608   : > { %v2076_v27 = vmul.f32 %v3191_v14, %v2013_v62  ;;  %v2070_v34 = vmul.f32 %v3189_v42, %v2069_v63  ;;  %vm2082_vm12 = vweird.f32 %v3191_v14  ;;  %v2006_v62 = vsub.f32 %v4080_v56, %v4147_v58  ;;  %v2938_v56 = vld [vmem:[%s4401_s7 + $0x48] sm:$0xff]  ;;  %v2935_v58 = vld [vmem:[%s4401_s7 + $0x30] sm:$0xff] }
 0x609   : > { %v4160_v30 = vmax.f32 %v2121_v28, 0.0  ;;  %3192 = vrsqrt.f32 %v2014_v24  ;;  %vm2083_vm14 = vmor %vm2081_vm13, %vm2082_vm12  ;;  %vm2091_vm0 = vweird.f32 %v2014_v24  ;;  %2327 = vmatpush.bf16.msrb.mxu0 %v2938_v56 }
 0x60a   : > { %v2077_v43 = vmul.f32 %v3191_v14, %v2076_v27  ;;  %v2074_v29 = vsel %vm2073_vm11, %v3189_v42, %v2070_v34 }
 0x60b   : > { %v3112_v48 = vpack.i.bf16 %v4160_v30, %v3240_v16  ;;  %v2100_v8 = vmul.f32 %v2074_v29, %v2004_v59 }
 0x60c   : > { %v2078_v22 = vmul.f32 0.5, %v2077_v43 }
 0x60d   : > { %3113 = vrot.lane.b32.xlu0 %v3112_v48, %s3238_s19  ;;  %v2111_v60 = vmul.f32 %v4101_v6, %v2100_v8 }
 0x60e   : > { %v2079_v25 = vsub.f32 1.5, %v2078_v22 }
 0x60f   : > { %v3193_v57 = vpop.eup %3192  ;;  %v2122_v55 = vadd.f32 %v4108_v39, %v2111_v60 }
 0x610   : > { %v2080_v2 = vmul.f32 %v3191_v14, %v2079_v25  ;;  %v2086_v13 = vmul.f32 %v3193_v57, %v2014_v24  ;;  %vm2092_vm15 = vweird.f32 %v3193_v57 }
 0x611   : > { %v4171_v16 = vmax.f32 %v2122_v55, 0.0  ;;  %vm2093_vm1 = vmor %vm2091_vm0, %vm2092_vm15 }
 0x612   : > { %v2084_v0 = vsel %vm2083_vm14, %v3191_v14, %v2080_v2  ;;  %v2087_v45 = vmul.f32 %v3193_v57, %v2086_v13 }
 0x613   : > { %v2101_v5 = vmul.f32 %v2084_v0, %v2005_v26  ;;  %v3117_v4 = vpack.i.bf16 %v4171_v16, %v4160_v30 }
 0x614   : > { %v2088_v18 = vmul.f32 0.5, %v2087_v45 }
 0x615   : > { %v2112_v50 = vmul.f32 %v4101_v6, %v2101_v5  ;;  %3118 = vrot.lane.b32.xlu2 %v3117_v4, %s3239_s20 }
 0x616   : > { %v2089_v32 = vsub.f32 1.5, %v2088_v18 }
 0x617   : > { %v2123_v19 = vadd.f32 %v4108_v39, %v2112_v50 }
 0x618   : > { %v2090_v33 = vmul.f32 %v3193_v57, %v2089_v32 }
 0x619   : > { %v2131_v7 = vmax.f32 %v2123_v19, 0.0 }
 0x61a   : > { %v2094_v42 = vsel %vm2093_vm1, %v3193_v57, %v2090_v33 }
 0x61b   : > { %v3122_v46 = vpack.i.bf16 %v2131_v7, %v4171_v16  ;;  %v2102_v11 = vmul.f32 %v2094_v42, %v2006_v62 }
 0x61d   : > { %3123 = vrot.lane.b32.xlu1 %v3122_v46, %s3238_s19  ;;  %v2113_v20 = vmul.f32 %v4101_v6, %v2102_v11  ;;  %v2937_v6 = vld [vmem:[%s4401_s7 + $0x40] sm:$0xff] }
 0x61e   : > { %2328 = vmatpush.bf16.msrb.mxu0 %v2937_v6  ;;  %v3142_v11 = vld [vmem:[%s4402_s8 + $0x1] ss:$0 sm:$0xff] }
 0x61f   : > { %v2124_v53 = vadd.f32 %v4108_v39, %v2113_v20  ;;  %v2936_v39 = vld [vmem:[%s4401_s7 + $0x38] sm:$0xff] }
 0x621   : > { %v2132_v36 = vmax.f32 %v2124_v53, 0.0 }
 0x622   : > { %2329 = vmatpush.bf16.msrb.mxu0 %v2936_v39 }
 0x623   : > { %v3127_v12 = vpack.i.bf16 %v2132_v36, %v2131_v7 }
 0x625   : > { %3128 = vrot.lane.b32.xlu0 %v3127_v12, %s3239_s20 }
 0x626   : > { %2330 = vmatpush.bf16.msrb.mxu0 %v2935_v58 }
 0x64f   : > { %v3099_v61 = vpop.permute.xlu2 %3098 }
 0x650   : > { %v3101_v35 = vunpack.i.h.bf16 %v3099_v61  ;;  %v3100_v52 = vunpack.i.l.bf16 %v3099_v61 }
 0x65f   : > { %v3094_v54 = vpop.permute.xlu1 %3093 }
 0x660   : > { %v3096_v21 = vunpack.i.h.bf16 %v3094_v54  ;;  %v3095_v15 = vunpack.i.l.bf16 %v3094_v54 }
 0x662   : > { %v2253_v47 = vsel %vm829_vm7, 0.0, %v3096_v21  ;;  %v2252_v41 = vsel %vm829_vm7, 0.0, %v3095_v15 }
 0x663   : > { %v2261_v9 = vsel %vm838_vm8, %v2253_v47, %v3101_v35  ;;  %v2260_v38 = vsel %vm838_vm8, %v2252_v41, %v3100_v52 }
 0x664   : > { %v2268_v14 = vpack.c.bf16 %v2261_v9, %v2260_v38 }
 0x666   : > { %2896 = vmatmul.msk.bf16.vlgmr.msrb.gmra.mxu0 %vm890_vm9, %v2268_v14 }
 0x66f   : > { %v3104_v63 = vpop.permute.xlu0 %3103  ;;  %v3119_v2 = vpop.permute.xlu2 %3118 }
 0x670   : > { %v3106_v28 = vunpack.i.h.bf16 %v3104_v63  ;;  %v3105_v27 = vunpack.i.l.bf16 %v3104_v63  ;;  %v3121_v13 = vunpack.i.h.bf16 %v3119_v2 }
 0x672   : > { %v2255_v43 = vsel %vm829_vm7, %v4131_v31, %v3106_v28  ;;  %v2254_v29 = vsel %vm829_vm7, %v4118_v1, %v3105_v27  ;;  %v3120_v31 = vunpack.i.l.bf16 %v3119_v2 }
 0x677   : > { %v3109_v24 = vpop.permute.xlu1 %3108 }
 0x678   : > { %v3111_v34 = vunpack.i.h.bf16 %v3109_v24  ;;  %v3110_v59 = vunpack.i.l.bf16 %v3109_v24 }
 0x67a   : > { %v2262_v48 = vsel %vm838_vm8, %v2254_v29, %v3110_v59  ;;  %v2263_v8 = vsel %vm838_vm8, %v2255_v43, %v3111_v34 }
 0x67b   : > { %v2269_v22 = vpack.c.bf16 %v2263_v8, %v2262_v48 }
 0x67d   : > { %2897 = vmatmul.msk.bf16.gmra.mxu0 %vm890_vm9, %v2269_v22 }
 0x67f   : > { %v3114_v25 = vpop.permute.xlu0 %3113 }
 0x680   : > { %v3116_v60 = vunpack.i.h.bf16 %v3114_v25  ;;  %v3115_v57 = vunpack.i.l.bf16 %v3114_v25 }
 0x682   : > { %v2257_v55 = vsel %vm829_vm7, 0.0, %v3116_v60  ;;  %v2256_v26 = vsel %vm829_vm7, 0.0, %v3115_v57 }
 0x683   : > { %v2264_v0 = vsel %vm838_vm8, %v2256_v26, %v3120_v31  ;;  %v2265_v1 = vsel %vm838_vm8, %v2257_v55, %v3121_v13 }
 0x684   : > { %v2270_v45 = vpack.c.bf16 %v2265_v1, %v2264_v0 }
 0x68d   : > { %2898 = vmatmul.msk.bf16.gmra.mxu0 %vm890_vm9, %v2270_v45 }
 0x68f   : > { %v3124_v5 = vpop.permute.xlu1 %3123 }
 0x690   : > { %v3126_v4 = vunpack.i.h.bf16 %v3124_v5  ;;  %v3125_v18 = vunpack.i.l.bf16 %v3124_v5 }
 0x692   : > { %v2259_v33 = vsel %vm829_vm7, %v4171_v16, %v3126_v4  ;;  %v2258_v7 = vsel %vm829_vm7, %v4160_v30, %v3125_v18 }
 0x697   : > { %v3129_v50 = vpop.permute.xlu0 %3128 }
 0x698   : > { %v3131_v32 = vunpack.i.h.bf16 %v3129_v50  ;;  %v3130_v19 = vunpack.i.l.bf16 %v3129_v50 }
 0x69a   : > { %v2266_v62 = vsel %vm838_vm8, %v2258_v7, %v3130_v19  ;;  %v2267_v42 = vsel %vm838_vm8, %v2259_v33, %v3131_v32 }
 0x69b   : > { %v2271_v46 = vpack.c.bf16 %v2267_v42, %v2266_v62 }
 0x69d   : > { %2899 = vmatmul.msk.bf16.gmra.mxu0 %vm890_vm9, %v2271_v46 }
 0x6e3   : > { %v2332_v20 = vpop.f32.mrf.mxu0 }
 0x6e4   : > { %v4227_v53 = vadd.f32 %v3142_v11, %v2332_v20  ;;  %v2942_v20 = vld [vmem:[%s4406_s12 + $0x8] sm:$0xff] }
 0x6e5   : > { %2646 = vmatpush.bf16.msrb.mxu1 %v2942_v20 }
 0x6e6   : > { %v2356_v16 = vsel %vm829_vm7, %v4227_v53, 0.0  ;;  %v2388_v30 = vmul.f32 %v4227_v53, %v4227_v53 }
 0x6e7   : > { %2357 = vadd.xlane.f32.xlu2 %v2356_v16 }
 0x6e8   : > { %v2396_v36 = vsel %vm829_vm7, %v2388_v30, 0.0 }
 0x6e9   : > { %2397 = vadd.xlane.f32.xlu0 %v2396_v36 }
 0x6eb   : > { %v2334_v12 = vpop.f32.mrf.mxu0 }
 0x6ec   : > { %v4234_v44 = vadd.f32 %v3142_v11, %v2334_v12  ;;  %v2941_v12 = vld [vmem:[%s4406_s12] sm:$0xff] }
 0x6ed   : > { %2647 = vmatpush.bf16.msrb.mxu1 %v2941_v12 }
 0x6ee   : > { %v2359_v56 = vsel %vm829_vm7, %v4234_v44, 0.0  ;;  %v2389_v6 = vmul.f32 %v4234_v44, %v4234_v44 }
 0x6ef   : > { %2360 = vadd.xlane.f32.xlu1 %v2359_v56 }
 0x6f0   : > { %v2399_v39 = vsel %vm829_vm7, %v2389_v6, 0.0 }
 0x6f1   : > { %2400 = vadd.xlane.f32.xlu2 %v2399_v39 }
 0x6fa   : > { %v2337_v58 = vpop.f32.mrf.mxu0 }
 0x6fb   : > { %v4241_v61 = vadd.f32 %v3142_v11, %v2337_v58 }
 0x6fd   : > { %v2362_v54 = vsel %vm829_vm7, %v4241_v61, 0.0  ;;  %v2390_v21 = vmul.f32 %v4241_v61, %v4241_v61 }
 0x6fe   : > { %2363 = vadd.xlane.f32.xlu1 %v2362_v54 }
 0x6ff   : > { %v2402_v15 = vsel %vm829_vm7, %v2390_v21, 0.0 }
 0x700   : > { %2403 = vadd.xlane.f32.xlu2 %v2402_v15 }
 0x702   : > { %v2339_v35 = vpop.f32.mrf.mxu0 }
 0x703   : > { %v4248_v52 = vadd.f32 %v3142_v11, %v2339_v35 }
 0x705   : > { %v2365_v47 = vsel %vm829_vm7, %v4248_v52, 0.0  ;;  %v2391_v41 = vmul.f32 %v4248_v52, %v4248_v52 }
 0x706   : > { %2366 = vadd.xlane.f32.xlu0 %v2365_v47 }
 0x707   : > { %v2405_v9 = vsel %vm829_vm7, %v2391_v41, 0.0 }
 0x708   : > { %2406 = vadd.xlane.f32.xlu1 %v2405_v9  ;;  %v4297_v9 = vld [vmem:[%s4403_s9 + $0x1] ss:$0 sm:$0xff] }
 0x70a   : > { %v2342_v38 = vpop.f32.mrf.mxu0 }
 0x70b   : > { %v4255_v14 = vadd.f32 %v3142_v11, %v2342_v38 }
 0x70d   : > { %v2368_v63 = vsel %vm829_vm7, %v4255_v14, 0.0  ;;  %v2392_v28 = vmul.f32 %v4255_v14, %v4255_v14 }
 0x70e   : > { %2369 = vadd.xlane.f32.xlu0 %v2368_v63 }
 0x70f   : > { %v2408_v27 = vsel %vm829_vm7, %v2392_v28, 0.0 }
 0x710   : > { %2409 = vadd.xlane.f32.xlu1 %v2408_v27 }
 0x712   : > { %v2344_v24 = vpop.f32.mrf.mxu0 }
 0x713   : > { %v4262_v34 = vadd.f32 %v3142_v11, %v2344_v24 }
 0x715   : > { %v2371_v59 = vsel %vm829_vm7, %v4262_v34, 0.0  ;;  %v2393_v43 = vmul.f32 %v4262_v34, %v4262_v34 }
 0x716   : > { %2372 = vadd.xlane.f32.xlu2 %v2371_v59 }
 0x717   : > { %v2411_v29 = vsel %vm829_vm7, %v2393_v43, 0.0 }
 0x718   : > { %2412 = vadd.xlane.f32.xlu0 %v2411_v29 }
 0x71a   : > { %v2347_v48 = vpop.f32.mrf.mxu0 }
 0x71b   : > { %v4269_v8 = vadd.f32 %v3142_v11, %v2347_v48  ;;  %v4303_v48 = vld [vmem:[%s4404_s10 + $0x1] ss:$0 sm:$0xff] }
 0x71d   : > { %v2374_v22 = vsel %vm829_vm7, %v4269_v8, 0.0  ;;  %v2394_v25 = vmul.f32 %v4269_v8, %v4269_v8 }
 0x71e   : > { %2375 = vadd.xlane.f32.xlu2 %v2374_v22 }
 0x71f   : > { %v2414_v60 = vsel %vm829_vm7, %v2394_v25, 0.0 }
 0x720   : > { %2415 = vadd.xlane.f32.xlu0 %v2414_v60 }
 0x722   : > { %v2349_v57 = vpop.f32.mrf.mxu0 }
 0x723   : > { %v4276_v2 = vadd.f32 %v3142_v11, %v2349_v57 }
 0x725   : > { %v2377_v55 = vsel %vm829_vm7, %v4276_v2, 0.0  ;;  %v2395_v26 = vmul.f32 %v4276_v2, %v4276_v2 }
 0x726   : > { %2378 = vadd.xlane.f32.xlu1 %v2377_v55 }
 0x727   : > { %v2417_v13 = vsel %vm829_vm7, %v2395_v26, 0.0 }
 0x728   : > { %2418 = vadd.xlane.f32.xlu2 %v2417_v13 }
 0x75a   : > { %v2358_v31 = vpop.xlane.xlu2 %2357 }
 0x75b   : > { %v2380_v0 = vmul.f32 0.03125, %v2358_v31 }
 0x75c   : > { %v2398_v1 = vpop.xlane.xlu0 %2397 }
 0x75d   : > { %v2428_v45 = vmul.f32 %v2380_v0, %v2380_v0  ;;  %v2420_v5 = vmul.f32 0.03125, %v2398_v1  ;;  %v2452_v35 = vsub.f32 %v4227_v53, %v2380_v0 }
 0x75f   : > { %v2436_v4 = vsub.f32 %v2420_v5, %v2428_v45 }
 0x761   : > { %v2444_v18 = vmax.f32 %v2436_v4, 0.0 }
 0x762   : > { %v2361_v50 = vpop.xlane.xlu1 %2360 }
 0x763   : > { %v2460_v32 = vadd.f32 1e-08, %v2444_v18  ;;  %v2381_v19 = vmul.f32 0.03125, %v2361_v50 }
 0x764   : > { %v2401_v33 = vpop.xlane.xlu2 %2400 }
 0x765   : > { %3194 = vrsqrt.f32 %v2460_v32  ;;  %v2429_v7 = vmul.f32 %v2381_v19, %v2381_v19  ;;  %v2421_v62 = vmul.f32 0.03125, %v2401_v33  ;;  %vm2474_vm9 = vweird.f32 %v2460_v32 }
 0x766   : > { %v2453_v31 = vsub.f32 %v4234_v44, %v2381_v19 }
 0x767   : > { %v2437_v42 = vsub.f32 %v2421_v62, %v2429_v7  ;;  %v4314_v62 = vstv %s2902_s25 }
 0x769   : > { %v2445_v46 = vmax.f32 %v2437_v42, 0.0 }
 0x76b   : > { %v3195_v11 = vpop.eup %3194  ;;  %v2461_v30 = vadd.f32 1e-08, %v2445_v46 }
 0x76c   : > { %v2469_v16 = vmul.f32 %v3195_v11, %v2460_v32  ;;  %vm2475_vm8 = vweird.f32 %v3195_v11 }
 0x76d   : > { %3196 = vrsqrt.f32 %v2461_v30  ;;  %vm2476_vm5 = vmor %vm2474_vm9, %vm2475_vm8  ;;  %vm2484_vm4 = vweird.f32 %v2461_v30 }
 0x76e   : > { %v2470_v36 = vmul.f32 %v3195_v11, %v2469_v16 }
 0x770   : > { %v2471_v56 = vmul.f32 0.5, %v2470_v36 }
 0x771   : > { %v2364_v39 = vpop.xlane.xlu1 %2363 }
 0x772   : > { %v2472_v6 = vsub.f32 1.5, %v2471_v56  ;;  %v4289_v58 = vmul.f32 0.03125, %v2364_v39 }
 0x773   : > { %v3197_v54 = vpop.eup %3196  ;;  %v2404_v15 = vpop.xlane.xlu2 %2403 }
 0x774   : > { %v2473_v21 = vmul.f32 %v3195_v11, %v2472_v6  ;;  %v2479_v47 = vmul.f32 %v3197_v54, %v2461_v30  ;;  %v2430_v41 = vmul.f32 %v4289_v58, %v4289_v58  ;;  %v2422_v63 = vmul.f32 0.03125, %v2404_v15 }
 0x775   : > { %vm2485_vm2 = vweird.f32 %v3197_v54 }
 0x776   : > { %v2477_v38 = vsel %vm2476_vm5, %v3195_v11, %v2473_v21  ;;  %v2480_v27 = vmul.f32 %v3197_v54, %v2479_v47  ;;  %v2438_v24 = vsub.f32 %v2422_v63, %v2430_v41  ;;  %vm2486_vm10 = vmor %vm2484_vm4, %vm2485_vm2 }
 0x777   : > { %v2548_v28 = vmul.f32 %v2477_v38, %v2452_v35 }
 0x778   : > { %v2481_v59 = vmul.f32 0.5, %v2480_v27  ;;  %v2446_v29 = vmax.f32 %v2438_v24, 0.0 }
 0x779   : > { %v2559_v43 = vmul.f32 %v4297_v9, %v2548_v28  ;;  %v2367_v53 = vpop.xlane.xlu0 %2366 }
 0x77a   : > { %v2482_v22 = vsub.f32 1.5, %v2481_v59  ;;  %v4305_v25 = vmul.f32 0.03125, %v2367_v53  ;;  %v2462_v60 = vadd.f32 1e-08, %v2446_v29 }
 0x77b   : > { %v2407_v57 = vpop.xlane.xlu1 %2406  ;;  %v2570_v0 = vadd.f32 %v4303_v48, %v2559_v43 }
 0x77c   : > { %v2483_v55 = vmul.f32 %v3197_v54, %v2482_v22  ;;  %v2431_v26 = vmul.f32 %v4305_v25, %v4305_v25  ;;  %v2423_v13 = vmul.f32 0.03125, %v2407_v57  ;;  %3198 = vrsqrt.f32 %v2462_v60 }
 0x77d   : > { %v2578_v32 = vmax.f32 %v2570_v0, 0.0  ;;  %vm2494_vm6 = vweird.f32 %v2462_v60 }
 0x77e   : > { %v2487_v1 = vsel %vm2486_vm10, %v3197_v54, %v2483_v55  ;;  %v2439_v45 = vsub.f32 %v2423_v13, %v2431_v26 }
 0x77f   : > { %v2549_v5 = vmul.f32 %v2487_v1, %v2453_v31  ;;  %v2588_v30 = vmul.f32 %v4314_v62, %v2578_v32 }
 0x780   : > { %v2447_v4 = vmax.f32 %v2439_v45, 0.0  ;;  %v2455_v45 = vsub.f32 %v4248_v52, %v4305_v25 }
 0x781   : > { %v2560_v18 = vmul.f32 %v4297_v9, %v2549_v5  ;;  %v2370_v50 = vpop.xlane.xlu0 %2369  ;;  %v2596_v21 = vadd.f32 %v2588_v30, %v3858_v37  ;;  %v2454_v37 = vsub.f32 %v4241_v61, %v4289_v58 }
 0x782   : > { %v2463_v33 = vadd.f32 1e-08, %v2447_v4  ;;  %v4312_v7 = vmul.f32 0.03125, %v2370_v50  ;;  %v3199_v42 = vpop.eup %3198 }
 0x783   : > { %v2410_v46 = vpop.xlane.xlu1 %2409  ;;  %v2571_v44 = vadd.f32 %v4303_v48, %v2560_v18  ;;  %v2489_v19 = vmul.f32 %v3199_v42, %v2462_v60  ;;  %vm2495_vm3 = vweird.f32 %v3199_v42 }
 0x784   : > { %3200 = vrsqrt.f32 %v2463_v33  ;;  %v2432_v11 = vmul.f32 %v4312_v7, %v4312_v7  ;;  %v2424_v20 = vmul.f32 0.03125, %v2410_v46  ;;  %vm2496_vm11 = vmor %vm2494_vm6, %vm2495_vm3  ;;  %vm2504_vm13 = vweird.f32 %v2463_v33 }
 0x785   : > { %v2579_v16 = vmax.f32 %v2571_v44, 0.0  ;;  %v2490_v36 = vmul.f32 %v3199_v42, %v2489_v19 }
 0x786   : > { %v2440_v12 = vsub.f32 %v2424_v20, %v2432_v11 }
 0x787   : > { %v2589_v56 = vmul.f32 %v4314_v62, %v2579_v16  ;;  %v2491_v6 = vmul.f32 0.5, %v2490_v36 }
 0x788   : > { %v2448_v39 = vmax.f32 %v2440_v12, 0.0 }
 0x789   : > { %v2373_v54 = vpop.xlane.xlu2 %2372  ;;  %v2597_v15 = vadd.f32 %v2589_v56, %v3861_v3  ;;  %v2492_v47 = vsub.f32 1.5, %v2491_v6 }
 0x78a   : > { %v3201_v35 = vpop.eup %3200  ;;  %v4323_v41 = vmul.f32 0.03125, %v2373_v54  ;;  %v2464_v63 = vadd.f32 1e-08, %v2448_v39 }
 0x78b   : > { %v2499_v38 = vmul.f32 %v3201_v35, %v2463_v33  ;;  %v2413_v28 = vpop.xlane.xlu0 %2412  ;;  %v2604_v27 = vpack.c.bf16 %v2597_v15, %v2596_v21  ;;  %v2493_v24 = vmul.f32 %v3199_v42, %v2492_v47  ;;  %vm2505_vm12 = vweird.f32 %v3201_v35 }
 0x78c   : > { %v2433_v59 = vmul.f32 %v4323_v41, %v4323_v41  ;;  %v2425_v43 = vmul.f32 0.03125, %v2413_v28  ;;  %3202 = vrsqrt.f32 %v2464_v63  ;;  %vm2506_vm14 = vmor %vm2504_vm13, %vm2505_vm12  ;;  %vm2514_vm0 = vweird.f32 %v2464_v63 }
 0x78d   : > { %v2500_v3 = vmul.f32 %v3201_v35, %v2499_v38  ;;  %2911 = vmatmul.msk.bf16.vlgmr.msrb.gmra.mxu1 %vm829_vm7, %v2604_v27  ;;  %v2497_v29 = vsel %vm2496_vm11, %v3199_v42, %v2493_v24 }
 0x78e   : > { %v2441_v53 = vsub.f32 %v2425_v43, %v2433_v59  ;;  %v2550_v22 = vmul.f32 %v2497_v29, %v2454_v37 }
 0x78f   : > { %v2501_v57 = vmul.f32 0.5, %v2500_v3 }
 0x790   : > { %v2449_v55 = vmax.f32 %v2441_v53, 0.0  ;;  %v2561_v13 = vmul.f32 %v4297_v9, %v2550_v22 }
 0x791   : > { %v2502_v26 = vsub.f32 1.5, %v2501_v57  ;;  %v2376_v60 = vpop.xlane.xlu2 %2375 }
 0x792   : > { %v2465_v31 = vadd.f32 1e-08, %v2449_v55  ;;  %v4331_v0 = vmul.f32 0.03125, %v2376_v60  ;;  %v3203_v1 = vpop.eup %3202  ;;  %v2572_v4 = vadd.f32 %v4303_v48, %v2561_v13  ;;  %v2457_v55 = vsub.f32 %v4262_v34, %v4323_v41 }
 0x793   : > { %v2503_v61 = vmul.f32 %v3201_v35, %v2502_v26  ;;  %v2416_v58 = vpop.xlane.xlu0 %2415  ;;  %v2509_v5 = vmul.f32 %v3203_v1, %v2464_v63  ;;  %vm2515_vm15 = vweird.f32 %v3203_v1 }
 0x794   : > { %3204 = vrsqrt.f32 %v2465_v31  ;;  %v2434_v50 = vmul.f32 %v4331_v0, %v4331_v0  ;;  %v2426_v32 = vmul.f32 0.03125, %v2416_v58  ;;  %v2580_v11 = vmax.f32 %v2572_v4, 0.0  ;;  %vm2516_vm1 = vmor %vm2514_vm0, %vm2515_vm15 }
 0x795   : > { %v2507_v18 = vsel %vm2506_vm14, %v3201_v35, %v2503_v61  ;;  %v2510_v46 = vmul.f32 %v3203_v1, %v2509_v5  ;;  %v2456_v35 = vsub.f32 %v4255_v14, %v4312_v7  ;;  %vm2524_vm9 = vweird.f32 %v2465_v31 }
 0x796   : > { %v2551_v42 = vmul.f32 %v2507_v18, %v2455_v45  ;;  %v2442_v44 = vsub.f32 %v2426_v32, %v2434_v50  ;;  %v2590_v15 = vmul.f32 %v4314_v62, %v2580_v11  ;;  %v2458_v50 = vsub.f32 %v4269_v8, %v4331_v0 }
 0x797   : > { %v2511_v19 = vmul.f32 0.5, %v2510_v46 }
 0x798   : > { %v2562_v33 = vmul.f32 %v4297_v9, %v2551_v42  ;;  %v2450_v20 = vmax.f32 %v2442_v44, 0.0  ;;  %v2598_v37 = vadd.f32 %v2590_v15, %v3921_v51  ;;  %v3145_v15 = vld [vmem:[%s4407_s13] ss:$0 sm:$0xff] }
 0x799   : > { %v2379_v16 = vpop.xlane.xlu1 %2378  ;;  %v2512_v25 = vsub.f32 1.5, %v2511_v19 }
 0x79a   : > { %v3205_v52 = vpop.eup %3204  ;;  %v4339_v30 = vmul.f32 0.03125, %v2379_v16  ;;  %v2573_v36 = vadd.f32 %v4303_v48, %v2562_v33  ;;  %v2466_v56 = vadd.f32 1e-08, %v2450_v20 }
 0x79b   : > { %v2519_v12 = vmul.f32 %v3205_v52, %v2465_v31  ;;  %v2419_v6 = vpop.xlane.xlu2 %2418  ;;  %v2513_v39 = vmul.f32 %v3203_v1, %v2512_v25  ;;  %vm2525_vm8 = vweird.f32 %v3205_v52 }
 0x79c   : > { %v2435_v54 = vmul.f32 %v4339_v30, %v4339_v30  ;;  %v2427_v21 = vmul.f32 0.03125, %v2419_v6  ;;  %3206 = vrsqrt.f32 %v2466_v56  ;;  %v2581_v38 = vmax.f32 %v2573_v36, 0.0  ;;  %vm2526_vm5 = vmor %vm2524_vm9, %vm2525_vm8 }
 0x79d   : > { %v2520_v47 = vmul.f32 %v3205_v52, %v2519_v12  ;;  %v2517_v28 = vsel %vm2516_vm1, %v3203_v1, %v2513_v39  ;;  %vm2534_vm4 = vweird.f32 %v2466_v56  ;;  %v2459_v8 = vsub.f32 %v4276_v2, %v4339_v30 }
 0x79e   : > { %v2443_v27 = vsub.f32 %v2427_v21, %v2435_v54  ;;  %v2552_v63 = vmul.f32 %v2517_v28, %v2456_v35  ;;  %v2591_v59 = vmul.f32 %v4314_v62, %v2581_v38 }
 0x79f   : > { %v2521_v24 = vmul.f32 0.5, %v2520_v47 }
 0x7a0   : > { %v2451_v43 = vmax.f32 %v2443_v27, 0.0  ;;  %v2599_v29 = vadd.f32 %v2591_v59, %v3933_v49  ;;  %v2563_v53 = vmul.f32 %v4297_v9, %v2552_v63 }
 0x7a1   : > { %v2522_v3 = vsub.f32 1.5, %v2521_v24 }
 0x7a2   : > { %v2467_v14 = vadd.f32 1e-08, %v2451_v43  ;;  %v3207_v7 = vpop.eup %3206  ;;  %v2605_v57 = vpack.c.bf16 %v2599_v29, %v2598_v37  ;;  %v2574_v60 = vadd.f32 %v4303_v48, %v2563_v53 }
 0x7a3   : > { %v2523_v22 = vmul.f32 %v3205_v52, %v2522_v3  ;;  %v2529_v26 = vmul.f32 %v3207_v7, %v2466_v56  ;;  %vm2535_vm2 = vweird.f32 %v3207_v7 }
 0x7a4   : > { %3208 = vrsqrt.f32 %v2467_v14  ;;  %2912 = vmatmul.msk.bf16.gmra.mxu1 %vm829_vm7, %v2605_v57  ;;  %v2582_v58 = vmax.f32 %v2574_v60, 0.0  ;;  %vm2536_vm10 = vmor %vm2534_vm4, %vm2535_vm2  ;;  %vm2544_vm6 = vweird.f32 %v2467_v14 }
 0x7a5   : > { %v2527_v51 = vsel %vm2526_vm5, %v3205_v52, %v2523_v22  ;;  %v2530_v49 = vmul.f32 %v3207_v7, %v2529_v26 }
 0x7a6   : > { %v2553_v13 = vmul.f32 %v2527_v51, %v2457_v55  ;;  %v2592_v18 = vmul.f32 %v4314_v62, %v2582_v58 }
 0x7a7   : > { %v2531_v1 = vmul.f32 0.5, %v2530_v49 }
 0x7a8   : > { %v2564_v61 = vmul.f32 %v4297_v9, %v2553_v13  ;;  %v2600_v33 = vadd.f32 %v2592_v18, %v3955_v17 }
 0x7a9   : > { %v2532_v31 = vsub.f32 1.5, %v2531_v1 }
 0x7aa   : > { %v3209_v45 = vpop.eup %3208  ;;  %v2575_v5 = vadd.f32 %v4303_v48, %v2564_v61 }
 0x7ab   : > { %v2539_v34 = vmul.f32 %v3209_v45, %v2467_v14  ;;  %v2533_v41 = vmul.f32 %v3207_v7, %v2532_v31  ;;  %vm2545_vm3 = vweird.f32 %v3209_v45 }
 0x7ac   : > { %v2583_v4 = vmax.f32 %v2575_v5, 0.0  ;;  %vm2546_vm11 = vmor %vm2544_vm6, %vm2545_vm3 }
 0x7ad   : > { %v2540_v32 = vmul.f32 %v3209_v45, %v2539_v34  ;;  %v2537_v42 = vsel %vm2536_vm10, %v3207_v7, %v2533_v41 }
 0x7ae   : > { %v2593_v46 = vmul.f32 %v4314_v62, %v2583_v4  ;;  %v2554_v44 = vmul.f32 %v2537_v42, %v2458_v50 }
 0x7af   : > { %v2541_v19 = vmul.f32 0.5, %v2540_v32 }
 0x7b0   : > { %v2601_v11 = vadd.f32 %v2593_v46, %v3969_v23  ;;  %v2565_v16 = vmul.f32 %v4297_v9, %v2554_v44 }
 0x7b1   : > { %v2542_v20 = vsub.f32 1.5, %v2541_v19 }
 0x7b2   : > { %v2606_v52 = vpack.c.bf16 %v2601_v11, %v2600_v33  ;;  %v2576_v0 = vadd.f32 %v4303_v48, %v2565_v16 }
 0x7b3   : > { %v2543_v25 = vmul.f32 %v3209_v45, %v2542_v20 }
 0x7b4   : > { %2913 = vmatmul.msk.bf16.gmra.mxu1 %vm829_vm7, %v2606_v52  ;;  %v2584_v12 = vmax.f32 %v2576_v0, 0.0 }
 0x7b5   : > { %v2547_v36 = vsel %vm2546_vm11, %v3209_v45, %v2543_v25 }
 0x7b6   : > { %v2555_v17 = vmul.f32 %v2547_v36, %v2459_v8  ;;  %v2594_v39 = vmul.f32 %v4314_v62, %v2584_v12 }
 0x7b8   : > { %v2566_v23 = vmul.f32 %v4297_v9, %v2555_v17  ;;  %v2602_v2 = vadd.f32 %v2594_v39, %v3963_v40 }
 0x7ba   : > { %v2577_v56 = vadd.f32 %v4303_v48, %v2566_v23 }
 0x7bc   : > { %v2585_v6 = vmax.f32 %v2577_v56, 0.0 }
 0x7be   : > { %v2595_v54 = vmul.f32 %v4314_v62, %v2585_v6 }
 0x7c0   : > { %v2603_v30 = vadd.f32 %v2595_v54, %v3906_v10 }
 0x7c2   : > { %v2607_v21 = vpack.c.bf16 %v2603_v30, %v2602_v2 }
 0x7c4   : > { %2914 = vmatmul.msk.bf16.gmra.mxu1 %vm829_vm7, %v2607_v21 }
 0x80a   : > { %v2649_v9 = vpop.f32.mrf.mxu1 }
 0x80b   : > { %v2650_v48 = vadd.f32 %v3145_v15, %v2649_v9 }
 0x80d   : > { %2669 = vst.msk [vmem:[%s483_s30] sm:$0xff] %vm829_vm7, %v2650_v48 }
 0x812   : > { %v2651_v62 = vpop.f32.mrf.mxu1 }
 0x813   : > { %v2652_v40 = vadd.f32 %v3145_v15, %v2651_v62 }
 0x815   : > { %2670 = vst.msk [vmem:[%s483_s30 + $0x8] sm:$0xff] %vm829_vm7, %v2652_v40 }
 0x821   : > { %v2654_v10 = vpop.f32.mrf.mxu1 }
 0x822   : > { %v2655_v35 = vadd.f32 %v3145_v15, %v2654_v10 }
 0x824   : > { %2671 = vst.msk [vmem:[%s483_s30 + $0x10] sm:$0xff] %vm829_vm7, %v2655_v35 }
 0x829   : > { %v2656_v47 = vpop.f32.mrf.mxu1 }
 0x82a   : > { %v2657_v38 = vadd.f32 %v3145_v15, %v2656_v47 }
 0x82c   : > { %2672 = vst.msk [vmem:[%s483_s30 + $0x18] sm:$0xff] %vm829_vm7, %v2657_v38 }
 0x831   : > { %v2659_v28 = vpop.f32.mrf.mxu1 }
 0x832   : > { %v2660_v27 = vadd.f32 %v3145_v15, %v2659_v28 }
 0x834   : > { %2673 = vst.msk [vmem:[%s483_s30 + $0x20] sm:$0xff] %vm829_vm7, %v2660_v27 }
 0x839   : > { %v2661_v63 = vpop.f32.mrf.mxu1 }
 0x83a   : > { %v2662_v24 = vadd.f32 %v3145_v15, %v2661_v63 }
 0x83c   : > { %2674 = vst.msk [vmem:[%s483_s30 + $0x28] sm:$0xff] %vm829_vm7, %v2662_v24 }
 0x841   : > { %v2664_v59 = vpop.f32.mrf.mxu1 }
 0x842   : > { %v2665_v43 = vadd.f32 %v3145_v15, %v2664_v59 }
 0x844   : > { %2675 = vst.msk [vmem:[%s483_s30 + $0x30] sm:$0xff] %vm829_vm7, %v2665_v43 }
 0x849   : > { %v2666_v37 = vpop.f32.mrf.mxu1 }
 0x84a   : > { %v2667_v3 = vadd.f32 %v3145_v15, %v2666_v37 }
 0x84c   : > { %2676 = vst.msk [vmem:[%s483_s30 + $0x38] sm:$0xff] %vm829_vm7, %v2667_v3 }
 0x84d PF: > { %s25_s29 = sadd.s32 1, %s3235_s29  }
 0x84e   : > { %p22_p7 = scmp.ge.s32.totalorder %s25_s29, 4  }
 0x850   :  { %24 = sbr.rel (!%p22_p7) target bundleno = 1 (0x1), region = 119 }
 0x855   :  { %2699 = vsyncpa [#allocation3], 1 }
 0x856   :  { %2701 = vsyncpa [#allocation3 + $0x1], 1 }

</bundles_post_ra>
